<compile_context>
chip_gen: v7x
topology: tpu7x:2x2x1
jax: 0.10.0
libtpu: 0.0.40
codegen_flags: <defaults>
</compile_context>

<pallas_src>
import math
import functools

import jax
import jax.numpy as jnp
from jax.experimental import pallas as pl
from jax.experimental.pallas import tpu as pltpu


# --------------------------------------------------------------------------- spec helpers
def _const_spec(a):
    """Whole-array block with a constant index_map (DMA'd once, resident across layers)."""
    nd = a.ndim
    return pl.BlockSpec(a.shape, lambda l: (0,) * nd)


def _layer_spec(w):
    """Per-layer slice of a weight stacked along a leading layer axis (pipelined DMA)."""
    nd = w.ndim
    return pl.BlockSpec((1,) + w.shape[1:], lambda l: (l,) + (0,) * (nd - 1))


# --------------------------------------------------------------------------- in-kernel math
def _linear(x, w, b):
    """x (M, K) f32 @ w (N, K).T  (w bf16, PyTorch layout) + b (1, N) f32; f32 accumulation."""
    y = jax.lax.dot_general(x.astype(jnp.bfloat16), w,
                            (((1,), (1,)), ((), ())),
                            preferred_element_type=jnp.float32)
    return y + b


def _layernorm(x, g, b):
    # LayerNorm over last dim, eps=1e-5 (PyTorch default); g/b are (1, E), math in f32
    mu = jnp.mean(x, axis=-1, keepdims=True)
    var = jnp.mean(jnp.square(x - mu), axis=-1, keepdims=True)
    return (x - mu) * jax.lax.rsqrt(var + 1e-5) * g + b


def _attention(q, k, v, bias, num_heads, head_dim):
    """Batched multi-head attention.

    q (B,Sq,E), k/v (B,Sk,E) f32; `bias` additive, broadcastable to (B,Sq,Sk).
    Heads are taken as lane slices (ideal FLOPs, no relayout); score matmuls use bf16
    operands with f32 accumulation, softmax stays f32 (EUP approx reciprocal for the denom).
    """
    scale = 1.0 / math.sqrt(head_dim)
    qb = q.astype(jnp.bfloat16)
    kb = k.astype(jnp.bfloat16)
    vb = v.astype(jnp.bfloat16)
    ctx = []
    for h in range(num_heads):
        sl = slice(h * head_dim, (h + 1) * head_dim)
        s = jax.lax.dot_general(qb[:, :, sl], kb[:, :, sl],
                                (((2,), (2,)), ((0,), (0,))),
                                preferred_element_type=jnp.float32)        # (B, Sq, Sk)
        s = s * scale + bias
        m = jnp.max(s, axis=-1, keepdims=True)
        e = jnp.exp(s - m)
        p = e * pl.reciprocal(jnp.sum(e, axis=-1, keepdims=True), approx=True)
        ctx.append(jax.lax.dot_general(p.astype(jnp.bfloat16), vb[:, :, sl],
                                       (((2,), (1,)), ((0,), (0,))),
                                       preferred_element_type=jnp.float32))  # (B, Sq, Dh)
    return jnp.concatenate(ctx, axis=-1)                                     # (B, Sq, E)


# --------------------------------------------------------------------------- fused stack kernels
def _encoder_stack_kernel(x_ref, pad_ref,
                          in_w, in_b, out_w, out_b, ln1_g, ln1_b,
                          fc1_w, fc1_b, fc2_w, fc2_b, ln2_g, ln2_b,
                          o_ref, act_ref, *, num_heads, head_dim):
    l = pl.program_id(0)

    @pl.when(l == 0)
    def _():
        act_ref[...] = x_ref[...].astype(jnp.float32)

    B, S, E = act_ref.shape
    x = act_ref[...]
    xf = x.reshape(B * S, E)

    # self-attention: single combined QKV projection over the flattened (B*S, E) slab
    qkv = _linear(xf, in_w[0], in_b[0])                       # (B*S, 3E)
    q = qkv[:, :E].reshape(B, S, E)
    k = qkv[:, E:2 * E].reshape(B, S, E)
    v = qkv[:, 2 * E:].reshape(B, S, E)
    bias = pad_ref[...][:, None, :]                           # (B, 1, S) key-padding bias
    ctx = _attention(q, k, v, bias, num_heads, head_dim)      # (B, S, E)
    att = _linear(ctx.reshape(B * S, E), out_w[0], out_b[0])

    h = _layernorm(xf + att, ln1_g[0], ln1_b[0])
    y = jnp.maximum(_linear(h, fc1_w[0], fc1_b[0]), 0.0)      # fused FFN with ReLU
    y = _linear(y, fc2_w[0], fc2_b[0])
    out = _layernorm(h + y, ln2_g[0], ln2_b[0])

    act_ref[...] = out.reshape(B, S, E)

    @pl.when(l == pl.num_programs(0) - 1)
    def _():
        o_ref[...] = act_ref[...].astype(o_ref.dtype)


def _decoder_stack_kernel(y_ref, enc_ref, tpad_ref, spad_ref, amask_ref,
                          s_in_w, s_in_b, s_out_w, s_out_b, ln1_g, ln1_b,
                          c_q_w, c_q_b, c_kv_w, c_kv_b, c_out_w, c_out_b, ln2_g, ln2_b,
                          fc1_w, fc1_b, fc2_w, fc2_b, ln3_g, ln3_b,
                          proj_w, proj_b,
                          o_ref, act_ref, *, num_heads, head_dim):
    l = pl.program_id(0)

    @pl.when(l == 0)
    def _():
        act_ref[...] = y_ref[...].astype(jnp.float32)

    B, St, E = act_ref.shape
    Ss = enc_ref.shape[1]
    x = act_ref[...]
    xf = x.reshape(B * St, E)

    # --- masked self-attention (caller-provided additive attn_mask + tgt key padding)
    qkv = _linear(xf, s_in_w[0], s_in_b[0])                   # (B*St, 3E)
    q = qkv[:, :E].reshape(B, St, E)
    k = qkv[:, E:2 * E].reshape(B, St, E)
    v = qkv[:, 2 * E:].reshape(B, St, E)
    sbias = tpad_ref[...][:, None, :] + amask_ref[...][None, :, :]   # (B, St, St)
    ctx = _attention(q, k, v, sbias, num_heads, head_dim)
    att = _linear(ctx.reshape(B * St, E), s_out_w[0], s_out_b[0])
    h1 = _layernorm(att + xf, ln1_g[0], ln1_b[0])

    # --- cross-attention against the resident encoder output (src key padding)
    enc = enc_ref[...].astype(jnp.float32)
    encf = enc.reshape(B * Ss, E)
    q2 = _linear(h1, c_q_w[0], c_q_b[0]).reshape(B, St, E)
    kv = _linear(encf, c_kv_w[0], c_kv_b[0])                  # (B*Ss, 2E) combined K/V proj
    k2 = kv[:, :E].reshape(B, Ss, E)
    v2 = kv[:, E:].reshape(B, Ss, E)
    cbias = spad_ref[...][:, None, :]                         # (B, 1, Ss)
    ctx2 = _attention(q2, k2, v2, cbias, num_heads, head_dim)
    att2 = _linear(ctx2.reshape(B * St, E), c_out_w[0], c_out_b[0])
    h2 = _layernorm(h1 + att2, ln2_g[0], ln2_b[0])

    # --- FFN
    y = jnp.maximum(_linear(h2, fc1_w[0], fc1_b[0]), 0.0)
    y = _linear(y, fc2_w[0], fc2_b[0])
    out = _layernorm(y + h2, ln3_g[0], ln3_b[0])
    act_ref[...] = out.reshape(B, St, E)

    # --- last layer: fused final projection + exact softmax (logits never leave VMEM)
    @pl.when(l == pl.num_programs(0) - 1)
    def _():
        logits = _linear(out, proj_w[...], proj_b[...])       # (B*St, V)
        m = jnp.max(logits, axis=-1, keepdims=True)
        e = jnp.exp(logits - m)
        probs = e / jnp.sum(e, axis=-1, keepdims=True)
        o_ref[...] = probs.reshape(B, St, -1).astype(o_ref.dtype)


# --------------------------------------------------------------------------- wrappers
ENC_KEYS = ('in_w', 'in_b', 'out_w', 'out_b', 'ln1_g', 'ln1_b',
            'fc1_w', 'fc1_b', 'fc2_w', 'fc2_b', 'ln2_g', 'ln2_b')
DEC_KEYS = ('s_in_w', 's_in_b', 's_out_w', 's_out_b', 'ln1_g', 'ln1_b',
            'c_q_w', 'c_q_b', 'c_kv_w', 'c_kv_b', 'c_out_w', 'c_out_b', 'ln2_g', 'ln2_b',
            'fc1_w', 'fc1_b', 'fc2_w', 'fc2_b', 'ln3_g', 'ln3_b')


def encoder_stack(x, src_pad_bias, ep, num_heads):
    B, S, E = x.shape
    L = ep['in_w'].shape[0]
    weights = [ep[k] for k in ENC_KEYS]
    return pl.pallas_call(
        functools.partial(_encoder_stack_kernel, num_heads=num_heads, head_dim=E // num_heads),
        out_shape=jax.ShapeDtypeStruct((B, S, E), jnp.float32),
        grid=(L,),
        in_specs=[_const_spec(x), _const_spec(src_pad_bias)] + [_layer_spec(w) for w in weights],
        out_specs=pl.BlockSpec((B, S, E), lambda l: (0, 0, 0)),
        scratch_shapes=[pltpu.VMEM((B, S, E), jnp.float32)],
        compiler_params=pltpu.CompilerParams(dimension_semantics=("arbitrary",)),
    )(x, src_pad_bias, *weights)


def decoder_stack(y, encoded, tgt_pad_bias, src_pad_bias, attn_mask, dp, proj_w, proj_b,
                  num_heads):
    B, St, E = y.shape
    V = proj_w.shape[0]
    L = dp['s_in_w'].shape[0]
    weights = [dp[k] for k in DEC_KEYS]
    return pl.pallas_call(
        functools.partial(_decoder_stack_kernel, num_heads=num_heads, head_dim=E // num_heads),
        out_shape=jax.ShapeDtypeStruct((B, St, V), jnp.float32),
        grid=(L,),
        in_specs=([_const_spec(y), _const_spec(encoded), _const_spec(tgt_pad_bias),
                   _const_spec(src_pad_bias), _const_spec(attn_mask)]
                  + [_layer_spec(w) for w in weights]
                  + [_const_spec(proj_w), _const_spec(proj_b)]),
        out_specs=pl.BlockSpec((B, St, V), lambda l: (0, 0, 0)),
        scratch_shapes=[pltpu.VMEM((B, St, E), jnp.float32)],
        compiler_params=pltpu.CompilerParams(dimension_semantics=("arbitrary",)),
    )(y, encoded, tgt_pad_bias, src_pad_bias, attn_mask, *weights, proj_w, proj_b)


def transformer_forward(params, x_tok, y_tok, src_padding_mask, tgt_padding_mask,
                        attn_mask, pos_encoding, *, num_heads):
    # TODO(synk): token-embedding gather stays in plain JAX — a tiny id lookup has no
    # rectangular Pallas tiling win at these sizes.
    x = params['src_embedding'][x_tok] + pos_encoding
    y = params['tgt_embedding'][y_tok] + pos_encoding

    # key_padding_mask (bool, True=ignore) -> small (B, S) additive bias; the full
    # (B, Sq, Sk) bias is never materialised in HBM (broadcast happens in-kernel).
    src_bias = jnp.where(src_padding_mask, -1e9, 0.0).astype(jnp.float32)
    tgt_bias = jnp.where(tgt_padding_mask, -1e9, 0.0).astype(jnp.float32)

    encoded = encoder_stack(x, src_bias, params['encoder'], num_heads)
    return decoder_stack(y, encoded, tgt_bias, src_bias, attn_mask,
                         params['decoder'], params['out_w'], params['out_b'], num_heads)


# --------------------------------------------------------------------------- params
def _w(key, shape):
    # matmul weights stored bf16 (MXU-native input dtype, half the weight DMA bytes)
    return (jax.random.normal(key, shape, jnp.float32) * 0.05).astype(jnp.bfloat16)


def init_encoder_params(key, L, E, DH):
    ks = jax.random.split(key, 4)
    return {
        'in_w': _w(ks[0], (L, 3 * E, E)), 'in_b': jnp.zeros((L, 1, 3 * E), jnp.float32),
        'out_w': _w(ks[1], (L, E, E)), 'out_b': jnp.zeros((L, 1, E), jnp.float32),
        'ln1_g': jnp.ones((L, 1, E), jnp.float32), 'ln1_b': jnp.zeros((L, 1, E), jnp.float32),
        'fc1_w': _w(ks[2], (L, DH, E)), 'fc1_b': jnp.zeros((L, 1, DH), jnp.float32),
        'fc2_w': _w(ks[3], (L, E, DH)), 'fc2_b': jnp.zeros((L, 1, E), jnp.float32),
        'ln2_g': jnp.ones((L, 1, E), jnp.float32), 'ln2_b': jnp.zeros((L, 1, E), jnp.float32),
    }


def init_decoder_params(key, L, E, DH):
    ks = jax.random.split(key, 7)
    return {
        's_in_w': _w(ks[0], (L, 3 * E, E)), 's_in_b': jnp.zeros((L, 1, 3 * E), jnp.float32),
        's_out_w': _w(ks[1], (L, E, E)), 's_out_b': jnp.zeros((L, 1, E), jnp.float32),
        'ln1_g': jnp.ones((L, 1, E), jnp.float32), 'ln1_b': jnp.zeros((L, 1, E), jnp.float32),
        'c_q_w': _w(ks[2], (L, E, E)), 'c_q_b': jnp.zeros((L, 1, E), jnp.float32),
        'c_kv_w': _w(ks[3], (L, 2 * E, E)), 'c_kv_b': jnp.zeros((L, 1, 2 * E), jnp.float32),
        'c_out_w': _w(ks[4], (L, E, E)), 'c_out_b': jnp.zeros((L, 1, E), jnp.float32),
        'ln2_g': jnp.ones((L, 1, E), jnp.float32), 'ln2_b': jnp.zeros((L, 1, E), jnp.float32),
        'fc1_w': _w(ks[5], (L, DH, E)), 'fc1_b': jnp.zeros((L, 1, DH), jnp.float32),
        'fc2_w': _w(ks[6], (L, E, DH)), 'fc2_b': jnp.zeros((L, 1, E), jnp.float32),
        'ln3_g': jnp.ones((L, 1, E), jnp.float32), 'ln3_b': jnp.zeros((L, 1, E), jnp.float32),
    }


def init_transformer(key, num_enc, num_dec, E, DH, V):
    k_enc, k_dec, k_out, k_se, k_te = jax.random.split(key, 5)
    return {
        'encoder': init_encoder_params(k_enc, num_enc, E, DH),
        'decoder': init_decoder_params(k_dec, num_dec, E, DH),
        'out_w': _w(k_out, (V, E)),
        'out_b': jnp.zeros((1, V), jnp.float32),
        'src_embedding': jax.random.normal(k_se, (V, E), jnp.float32) * 0.05,
        'tgt_embedding': jax.random.normal(k_te, (V, E), jnp.float32) * 0.05,
    }


# --------------------------------------------------------------------------- main
if __name__ == "__main__":
    # V is a multiple of 128 so the final output store is lane-dense (unmasked vst).
    B, S, E, H, DH, V = 2, 8, 32, 4, 64, 128
    NUM_ENC, NUM_DEC = 2, 2

    root = jax.random.PRNGKey(0)
    kp, kx, ky = jax.random.split(root, 3)
    params = init_transformer(kp, NUM_ENC, NUM_DEC, E, DH, V)

    x_tok = jax.random.randint(kx, (B, S), 0, V, dtype=jnp.int32)
    y_tok = jax.random.randint(ky, (B, S), 0, V, dtype=jnp.int32)
    src_padding_mask = jnp.zeros((B, S), jnp.bool_)
    tgt_padding_mask = jnp.zeros((B, S), jnp.bool_)
    # causal mask (additive float, like generate_square_subsequent_mask; -1e9 for safety)
    attn_mask = jnp.where(jnp.triu(jnp.ones((S, S), jnp.bool_), k=1), -1e9, 0.0).astype(jnp.float32)

    # sinusoidal positional encoding (1, S, E)
    position = jnp.arange(S, dtype=jnp.float32)[:, None]
    div = jnp.exp(jnp.arange(0, E, 2, dtype=jnp.float32) * (-math.log(10000.0) / E))
    pe = jnp.zeros((S, E), jnp.float32)
    pe = pe.at[:, 0::2].set(jnp.sin(position * div))
    pe = pe.at[:, 1::2].set(jnp.cos(position * div))
    pos_encoding = pe[None]

    fwd = jax.jit(functools.partial(transformer_forward, num_heads=H))
    out = fwd(params, x_tok, y_tok, src_padding_mask, tgt_padding_mask, attn_mask, pos_encoding)
    out = jax.block_until_ready(out)

    assert out.shape == (B, S, V)
    assert bool(jnp.all(jnp.isfinite(out)))
    row_sums = jnp.sum(out, axis=-1)
    assert bool(jnp.allclose(row_sums, 1.0, atol=1e-4))
    print("KERNEL_OK")
</pallas_src>

<mosaic_0001>
module attributes {stable_mosaic.version = 11 : i64} {
  func.func @_encoder_stack_kernel(%arg0: i32, %arg1: memref<2x8x32xf32, #tpu.memory_space<vmem>>, %arg2: memref<2x8xf32, #tpu.memory_space<vmem>>, %arg3: memref<1x96x32xbf16, #tpu.memory_space<vmem>>, %arg4: memref<1x1x96xf32, #tpu.memory_space<vmem>>, %arg5: memref<1x32x32xbf16, #tpu.memory_space<vmem>>, %arg6: memref<1x1x32xf32, #tpu.memory_space<vmem>>, %arg7: memref<1x1x32xf32, #tpu.memory_space<vmem>>, %arg8: memref<1x1x32xf32, #tpu.memory_space<vmem>>, %arg9: memref<1x64x32xbf16, #tpu.memory_space<vmem>>, %arg10: memref<1x1x64xf32, #tpu.memory_space<vmem>>, %arg11: memref<1x32x64xbf16, #tpu.memory_space<vmem>>, %arg12: memref<1x1x32xf32, #tpu.memory_space<vmem>>, %arg13: memref<1x1x32xf32, #tpu.memory_space<vmem>>, %arg14: memref<1x1x32xf32, #tpu.memory_space<vmem>>, %arg15: memref<2x8x32xf32, #tpu.memory_space<vmem>>, %arg16: memref<2x8x32xf32, #tpu.memory_space<vmem>>) attributes {dimension_semantics = [#tpu.dimension_semantics<arbitrary>], iteration_bounds = array<i64: 2>, scalar_prefetch = 0 : i64, scratch_operands = 1 : i64, tpu.core_type = #tpu.core_type<tc>, window_params = [{pipeline_mode = #tpu.pipeline_mode<synchronous>, transform_indices = @transform_0, window_bounds = array<i64: 2, 8, 32>}, {pipeline_mode = #tpu.pipeline_mode<synchronous>, transform_indices = @transform_1, window_bounds = array<i64: 2, 8>}, {transform_indices = @transform_2, window_bounds = array<i64: 1, 96, 32>}, {transform_indices = @transform_3, window_bounds = array<i64: 1, 1, 96>}, {transform_indices = @transform_4, window_bounds = array<i64: 1, 32, 32>}, {transform_indices = @transform_5, window_bounds = array<i64: 1, 1, 32>}, {transform_indices = @transform_6, window_bounds = array<i64: 1, 1, 32>}, {transform_indices = @transform_7, window_bounds = array<i64: 1, 1, 32>}, {transform_indices = @transform_8, window_bounds = array<i64: 1, 64, 32>}, {transform_indices = @transform_9, window_bounds = array<i64: 1, 1, 64>}, {transform_indices = @transform_10, window_bounds = array<i64: 1, 32, 64>}, {transform_indices = @transform_11, window_bounds = array<i64: 1, 1, 32>}, {transform_indices = @transform_12, window_bounds = array<i64: 1, 1, 32>}, {transform_indices = @transform_13, window_bounds = array<i64: 1, 1, 32>}, {pipeline_mode = #tpu.pipeline_mode<synchronous>, transform_indices = @transform_14, window_bounds = array<i64: 2, 8, 32>}]} {
    %c0_i32 = arith.constant 0 : i32
    %0 = arith.cmpi eq, %arg0, %c0_i32 : i32
    %1 = arith.extui %0 : i1 to i32
    %c0_i32_0 = arith.constant 0 : i32
    %2 = arith.cmpi ne, %1, %c0_i32_0 : i32
    scf.if %2 {
      %c0_79 = arith.constant 0 : index
      %c0_80 = arith.constant 0 : index
      %c0_81 = arith.constant 0 : index
      %191 = vector.load %arg1[%c0_79, %c0_80, %c0_81] : memref<2x8x32xf32, #tpu.memory_space<vmem>>, vector<2x8x32xf32>
      %c0_82 = arith.constant 0 : index
      %c0_83 = arith.constant 0 : index
      %c0_84 = arith.constant 0 : index
      %192 = vector.load %arg16[%c0_82, %c0_83, %c0_84] : memref<2x8x32xf32, #tpu.memory_space<vmem>>, vector<2x8x32xf32>
      tpu.vector_store %arg16[%c0_82, %c0_83, %c0_84], %191 {strides = array<i32>} : memref<2x8x32xf32, #tpu.memory_space<vmem>>, vector<2x8x32xf32>,
    } else {
    }
    %c0 = arith.constant 0 : index
    %c0_1 = arith.constant 0 : index
    %c0_2 = arith.constant 0 : index
    %3 = vector.load %arg16[%c0, %c0_1, %c0_2] : memref<2x8x32xf32, #tpu.memory_space<vmem>>, vector<2x8x32xf32>
    %4 = vector.shape_cast %3 : vector<2x8x32xf32> to vector<16x32xf32>
    %c0_3 = arith.constant 0 : index
    %c0_4 = arith.constant 0 : index
    %c0_5 = arith.constant 0 : index
    %5 = vector.load %arg3[%c0_3, %c0_4, %c0_5] : memref<1x96x32xbf16, #tpu.memory_space<vmem>>, vector<1x96x32xbf16>
    %6 = vector.shape_cast %5 : vector<1x96x32xbf16> to vector<96x32xbf16>
    %c0_6 = arith.constant 0 : index
    %c0_7 = arith.constant 0 : index
    %c0_8 = arith.constant 0 : index
    %7 = vector.load %arg4[%c0_6, %c0_7, %c0_8] : memref<1x1x96xf32, #tpu.memory_space<vmem>>, vector<1x1x96xf32>
    %8 = vector.shape_cast %7 : vector<1x1x96xf32> to vector<1x96xf32>
    %9 = arith.truncf %4 : vector<16x32xf32> to vector<16x32xbf16>
    %cst = arith.constant dense<0.000000e+00> : vector<16x96xf32>
    %10 = tpu.matmul %9, %6, %cst {dimension_numbers = #tpu.dot_dimension_numbers<[1], [1], [0], [0], [0, 0, 1, 0], [], []>} : vector<16x32xbf16>, vector<96x32xbf16>, vector<16x96xf32> -> vector<16x96xf32>
    %11 = vector.broadcast %8 : vector<1x96xf32> to vector<16x96xf32>
    %12 = arith.addf %10, %11 : vector<16x96xf32>
    %13 = vector.extract_strided_slice %12 {offsets = [0, 0], sizes = [16, 32], strides = [1, 1]} : vector<16x96xf32> to vector<16x32xf32>
    %14 = vector.shape_cast %13 : vector<16x32xf32> to vector<2x8x32xf32>
    %15 = vector.extract_strided_slice %12 {offsets = [0, 32], sizes = [16, 32], strides = [1, 1]} : vector<16x96xf32> to vector<16x32xf32>
    %16 = vector.shape_cast %15 : vector<16x32xf32> to vector<2x8x32xf32>
    %17 = vector.extract_strided_slice %12 {offsets = [0, 64], sizes = [16, 32], strides = [1, 1]} : vector<16x96xf32> to vector<16x32xf32>
    %18 = vector.shape_cast %17 : vector<16x32xf32> to vector<2x8x32xf32>
    %c0_9 = arith.constant 0 : index
    %c0_10 = arith.constant 0 : index
    %19 = vector.load %arg2[%c0_9, %c0_10] : memref<2x8xf32, #tpu.memory_space<vmem>>, vector<2x8xf32>
    %20 = vector.shape_cast %19 : vector<2x8xf32> to vector<2x1x8xf32>
    %21 = arith.truncf %14 : vector<2x8x32xf32> to vector<2x8x32xbf16>
    %22 = arith.truncf %16 : vector<2x8x32xf32> to vector<2x8x32xbf16>
    %23 = arith.truncf %18 : vector<2x8x32xf32> to vector<2x8x32xbf16>
    %24 = vector.extract_strided_slice %21 {offsets = [0, 0, 0], sizes = [2, 8, 8], strides = [1, 1, 1]} : vector<2x8x32xbf16> to vector<2x8x8xbf16>
    %25 = vector.extract_strided_slice %22 {offsets = [0, 0, 0], sizes = [2, 8, 8], strides = [1, 1, 1]} : vector<2x8x32xbf16> to vector<2x8x8xbf16>
    %cst_11 = arith.constant dense<0.000000e+00> : vector<2x8x8xf32>
    %26 = tpu.matmul %24, %25, %cst_11 {dimension_numbers = #tpu.dot_dimension_numbers<[2], [2], [1], [1], [0, 0, 0, 1, 1, 1], [0], [0]>} : vector<2x8x8xbf16>, vector<2x8x8xbf16>, vector<2x8x8xf32> -> vector<2x8x8xf32>
    %cst_12 = arith.constant 0.353553385 : f32
    %27 = vector.broadcast %cst_12 : f32 to vector<2x8x8xf32>
    %28 = arith.mulf %26, %27 : vector<2x8x8xf32>
    %29 = vector.broadcast %20 : vector<2x1x8xf32> to vector<2x8x8xf32>
    %30 = arith.addf %28, %29 : vector<2x8x8xf32>
    %cst_13 = arith.constant dense<0xFF800000> : vector<2x8xf32>
    %31 = vector.multi_reduction <maximumf>, %30, %cst_13 [2] : vector<2x8x8xf32> to vector<2x8xf32>
    %32 = vector.shape_cast %31 : vector<2x8xf32> to vector<2x8x1xf32>
    %33 = vector.broadcast %32 : vector<2x8x1xf32> to vector<2x8x8xf32>
    %34 = arith.subf %30, %33 : vector<2x8x8xf32>
    %35 = math.exp %34 : vector<2x8x8xf32>
    %cst_14 = arith.constant dense<0.000000e+00> : vector<2x8xf32>
    %36 = vector.multi_reduction <add>, %35, %cst_14 [2] : vector<2x8x8xf32> to vector<2x8xf32>
    %37 = vector.shape_cast %36 : vector<2x8xf32> to vector<2x8x1xf32>
    %38 = tpu.reciprocal %37 {approx = true} : vector<2x8x1xf32> -> vector<2x8x1xf32>
    %39 = vector.broadcast %38 : vector<2x8x1xf32> to vector<2x8x8xf32>
    %40 = arith.mulf %35, %39 : vector<2x8x8xf32>
    %41 = arith.truncf %40 : vector<2x8x8xf32> to vector<2x8x8xbf16>
    %42 = vector.extract_strided_slice %23 {offsets = [0, 0, 0], sizes = [2, 8, 8], strides = [1, 1, 1]} : vector<2x8x32xbf16> to vector<2x8x8xbf16>
    %cst_15 = arith.constant dense<0.000000e+00> : vector<2x8x8xf32>
    %43 = tpu.matmul %41, %42, %cst_15 {dimension_numbers = #tpu.dot_dimension_numbers<[2], [1], [1], [2], [0, 0, 0, 1, 1, 2], [0], [0]>} : vector<2x8x8xbf16>, vector<2x8x8xbf16>, vector<2x8x8xf32> -> vector<2x8x8xf32>
    %44 = vector.extract_strided_slice %21 {offsets = [0, 0, 8], sizes = [2, 8, 8], strides = [1, 1, 1]} : vector<2x8x32xbf16> to vector<2x8x8xbf16>
    %45 = vector.extract_strided_slice %22 {offsets = [0, 0, 8], sizes = [2, 8, 8], strides = [1, 1, 1]} : vector<2x8x32xbf16> to vector<2x8x8xbf16>
    %cst_16 = arith.constant dense<0.000000e+00> : vector<2x8x8xf32>
    %46 = tpu.matmul %44, %45, %cst_16 {dimension_numbers = #tpu.dot_dimension_numbers<[2], [2], [1], [1], [0, 0, 0, 1, 1, 1], [0], [0]>} : vector<2x8x8xbf16>, vector<2x8x8xbf16>, vector<2x8x8xf32> -> vector<2x8x8xf32>
    %cst_17 = arith.constant 0.353553385 : f32
    %47 = vector.broadcast %cst_17 : f32 to vector<2x8x8xf32>
    %48 = arith.mulf %46, %47 : vector<2x8x8xf32>
    %49 = vector.broadcast %20 : vector<2x1x8xf32> to vector<2x8x8xf32>
    %50 = arith.addf %48, %49 : vector<2x8x8xf32>
    %cst_18 = arith.constant dense<0xFF800000> : vector<2x8xf32>
    %51 = vector.multi_reduction <maximumf>, %50, %cst_18 [2] : vector<2x8x8xf32> to vector<2x8xf32>
    %52 = vector.shape_cast %51 : vector<2x8xf32> to vector<2x8x1xf32>
    %53 = vector.broadcast %52 : vector<2x8x1xf32> to vector<2x8x8xf32>
    %54 = arith.subf %50, %53 : vector<2x8x8xf32>
    %55 = math.exp %54 : vector<2x8x8xf32>
    %cst_19 = arith.constant dense<0.000000e+00> : vector<2x8xf32>
    %56 = vector.multi_reduction <add>, %55, %cst_19 [2] : vector<2x8x8xf32> to vector<2x8xf32>
    %57 = vector.shape_cast %56 : vector<2x8xf32> to vector<2x8x1xf32>
    %58 = tpu.reciprocal %57 {approx = true} : vector<2x8x1xf32> -> vector<2x8x1xf32>
    %59 = vector.broadcast %58 : vector<2x8x1xf32> to vector<2x8x8xf32>
    %60 = arith.mulf %55, %59 : vector<2x8x8xf32>
    %61 = arith.truncf %60 : vector<2x8x8xf32> to vector<2x8x8xbf16>
    %62 = vector.extract_strided_slice %23 {offsets = [0, 0, 8], sizes = [2, 8, 8], strides = [1, 1, 1]} : vector<2x8x32xbf16> to vector<2x8x8xbf16>
    %cst_20 = arith.constant dense<0.000000e+00> : vector<2x8x8xf32>
    %63 = tpu.matmul %61, %62, %cst_20 {dimension_numbers = #tpu.dot_dimension_numbers<[2], [1], [1], [2], [0, 0, 0, 1, 1, 2], [0], [0]>} : vector<2x8x8xbf16>, vector<2x8x8xbf16>, vector<2x8x8xf32> -> vector<2x8x8xf32>
    %64 = vector.extract_strided_slice %21 {offsets = [0, 0, 16], sizes = [2, 8, 8], strides = [1, 1, 1]} : vector<2x8x32xbf16> to vector<2x8x8xbf16>
    %65 = vector.extract_strided_slice %22 {offsets = [0, 0, 16], sizes = [2, 8, 8], strides = [1, 1, 1]} : vector<2x8x32xbf16> to vector<2x8x8xbf16>
    %cst_21 = arith.constant dense<0.000000e+00> : vector<2x8x8xf32>
    %66 = tpu.matmul %64, %65, %cst_21 {dimension_numbers = #tpu.dot_dimension_numbers<[2], [2], [1], [1], [0, 0, 0, 1, 1, 1], [0], [0]>} : vector<2x8x8xbf16>, vector<2x8x8xbf16>, vector<2x8x8xf32> -> vector<2x8x8xf32>
    %cst_22 = arith.constant 0.353553385 : f32
    %67 = vector.broadcast %cst_22 : f32 to vector<2x8x8xf32>
    %68 = arith.mulf %66, %67 : vector<2x8x8xf32>
    %69 = vector.broadcast %20 : vector<2x1x8xf32> to vector<2x8x8xf32>
    %70 = arith.addf %68, %69 : vector<2x8x8xf32>
    %cst_23 = arith.constant dense<0xFF800000> : vector<2x8xf32>
    %71 = vector.multi_reduction <maximumf>, %70, %cst_23 [2] : vector<2x8x8xf32> to vector<2x8xf32>
    %72 = vector.shape_cast %71 : vector<2x8xf32> to vector<2x8x1xf32>
    %73 = vector.broadcast %72 : vector<2x8x1xf32> to vector<2x8x8xf32>
    %74 = arith.subf %70, %73 : vector<2x8x8xf32>
    %75 = math.exp %74 : vector<2x8x8xf32>
    %cst_24 = arith.constant dense<0.000000e+00> : vector<2x8xf32>
    %76 = vector.multi_reduction <add>, %75, %cst_24 [2] : vector<2x8x8xf32> to vector<2x8xf32>
    %77 = vector.shape_cast %76 : vector<2x8xf32> to vector<2x8x1xf32>
    %78 = tpu.reciprocal %77 {approx = true} : vector<2x8x1xf32> -> vector<2x8x1xf32>
    %79 = vector.broadcast %78 : vector<2x8x1xf32> to vector<2x8x8xf32>
    %80 = arith.mulf %75, %79 : vector<2x8x8xf32>
    %81 = arith.truncf %80 : vector<2x8x8xf32> to vector<2x8x8xbf16>
    %82 = vector.extract_strided_slice %23 {offsets = [0, 0, 16], sizes = [2, 8, 8], strides = [1, 1, 1]} : vector<2x8x32xbf16> to vector<2x8x8xbf16>
    %cst_25 = arith.constant dense<0.000000e+00> : vector<2x8x8xf32>
    %83 = tpu.matmul %81, %82, %cst_25 {dimension_numbers = #tpu.dot_dimension_numbers<[2], [1], [1], [2], [0, 0, 0, 1, 1, 2], [0], [0]>} : vector<2x8x8xbf16>, vector<2x8x8xbf16>, vector<2x8x8xf32> -> vector<2x8x8xf32>
    %84 = vector.extract_strided_slice %21 {offsets = [0, 0, 24], sizes = [2, 8, 8], strides = [1, 1, 1]} : vector<2x8x32xbf16> to vector<2x8x8xbf16>
    %85 = vector.extract_strided_slice %22 {offsets = [0, 0, 24], sizes = [2, 8, 8], strides = [1, 1, 1]} : vector<2x8x32xbf16> to vector<2x8x8xbf16>
    %cst_26 = arith.constant dense<0.000000e+00> : vector<2x8x8xf32>
    %86 = tpu.matmul %84, %85, %cst_26 {dimension_numbers = #tpu.dot_dimension_numbers<[2], [2], [1], [1], [0, 0, 0, 1, 1, 1], [0], [0]>} : vector<2x8x8xbf16>, vector<2x8x8xbf16>, vector<2x8x8xf32> -> vector<2x8x8xf32>
    %cst_27 = arith.constant 0.353553385 : f32
    %87 = vector.broadcast %cst_27 : f32 to vector<2x8x8xf32>
    %88 = arith.mulf %86, %87 : vector<2x8x8xf32>
    %89 = vector.broadcast %20 : vector<2x1x8xf32> to vector<2x8x8xf32>
    %90 = arith.addf %88, %89 : vector<2x8x8xf32>
    %cst_28 = arith.constant dense<0xFF800000> : vector<2x8xf32>
    %91 = vector.multi_reduction <maximumf>, %90, %cst_28 [2] : vector<2x8x8xf32> to vector<2x8xf32>
    %92 = vector.shape_cast %91 : vector<2x8xf32> to vector<2x8x1xf32>
    %93 = vector.broadcast %92 : vector<2x8x1xf32> to vector<2x8x8xf32>
    %94 = arith.subf %90, %93 : vector<2x8x8xf32>
    %95 = math.exp %94 : vector<2x8x8xf32>
    %cst_29 = arith.constant dense<0.000000e+00> : vector<2x8xf32>
    %96 = vector.multi_reduction <add>, %95, %cst_29 [2] : vector<2x8x8xf32> to vector<2x8xf32>
    %97 = vector.shape_cast %96 : vector<2x8xf32> to vector<2x8x1xf32>
    %98 = tpu.reciprocal %97 {approx = true} : vector<2x8x1xf32> -> vector<2x8x1xf32>
    %99 = vector.broadcast %98 : vector<2x8x1xf32> to vector<2x8x8xf32>
    %100 = arith.mulf %95, %99 : vector<2x8x8xf32>
    %101 = arith.truncf %100 : vector<2x8x8xf32> to vector<2x8x8xbf16>
    %102 = vector.extract_strided_slice %23 {offsets = [0, 0, 24], sizes = [2, 8, 8], strides = [1, 1, 1]} : vector<2x8x32xbf16> to vector<2x8x8xbf16>
    %cst_30 = arith.constant dense<0.000000e+00> : vector<2x8x8xf32>
    %103 = tpu.matmul %101, %102, %cst_30 {dimension_numbers = #tpu.dot_dimension_numbers<[2], [1], [1], [2], [0, 0, 0, 1, 1, 2], [0], [0]>} : vector<2x8x8xbf16>, vector<2x8x8xbf16>, vector<2x8x8xf32> -> vector<2x8x8xf32>
    %104 = tpu.concatenate %43, %63, %83, %103 in 2 : vector<2x8x8xf32>, vector<2x8x8xf32>, vector<2x8x8xf32>, vector<2x8x8xf32> -> vector<2x8x32xf32>
    %105 = vector.shape_cast %104 : vector<2x8x32xf32> to vector<16x32xf32>
    %c0_31 = arith.constant 0 : index
    %c0_32 = arith.constant 0 : index
    %c0_33 = arith.constant 0 : index
    %106 = vector.load %arg5[%c0_31, %c0_32, %c0_33] : memref<1x32x32xbf16, #tpu.memory_space<vmem>>, vector<1x32x32xbf16>
    %107 = vector.shape_cast %106 : vector<1x32x32xbf16> to vector<32x32xbf16>
    %c0_34 = arith.constant 0 : index
    %c0_35 = arith.constant 0 : index
    %c0_36 = arith.constant 0 : index
    %108 = vector.load %arg6[%c0_34, %c0_35, %c0_36] : memref<1x1x32xf32, #tpu.memory_space<vmem>>, vector<1x1x32xf32>
    %109 = vector.shape_cast %108 : vector<1x1x32xf32> to vector<1x32xf32>
    %110 = arith.truncf %105 : vector<16x32xf32> to vector<16x32xbf16>
    %cst_37 = arith.constant dense<0.000000e+00> : vector<16x32xf32>
    %111 = tpu.matmul %110, %107, %cst_37 {dimension_numbers = #tpu.dot_dimension_numbers<[1], [1], [0], [0], [0, 0, 1, 0], [], []>} : vector<16x32xbf16>, vector<32x32xbf16>, vector<16x32xf32> -> vector<16x32xf32>
    %112 = vector.broadcast %109 : vector<1x32xf32> to vector<16x32xf32>
    %113 = arith.addf %111, %112 : vector<16x32xf32>
    %114 = arith.addf %4, %113 : vector<16x32xf32>
    %c0_38 = arith.constant 0 : index
    %c0_39 = arith.constant 0 : index
    %c0_40 = arith.constant 0 : index
    %115 = vector.load %arg7[%c0_38, %c0_39, %c0_40] : memref<1x1x32xf32, #tpu.memory_space<vmem>>, vector<1x1x32xf32>
    %116 = vector.shape_cast %115 : vector<1x1x32xf32> to vector<1x32xf32>
    %c0_41 = arith.constant 0 : index
    %c0_42 = arith.constant 0 : index
    %c0_43 = arith.constant 0 : index
    %117 = vector.load %arg8[%c0_41, %c0_42, %c0_43] : memref<1x1x32xf32, #tpu.memory_space<vmem>>, vector<1x1x32xf32>
    %118 = vector.shape_cast %117 : vector<1x1x32xf32> to vector<1x32xf32>
    %cst_44 = arith.constant dense<0.000000e+00> : vector<16xf32>
    %119 = vector.multi_reduction <add>, %114, %cst_44 [1] : vector<16x32xf32> to vector<16xf32>
    %120 = vector.shape_cast %119 : vector<16xf32> to vector<16x1xf32>
    %cst_45 = arith.constant 3.200000e+01 : f32
    %121 = vector.broadcast %cst_45 : f32 to vector<16x1xf32>
    %122 = arith.divf %120, %121 : vector<16x1xf32>
    %123 = vector.broadcast %122 : vector<16x1xf32> to vector<16x32xf32>
    %124 = arith.subf %114, %123 : vector<16x32xf32>
    %125 = arith.mulf %124, %124 : vector<16x32xf32>
    %cst_46 = arith.constant dense<0.000000e+00> : vector<16xf32>
    %126 = vector.multi_reduction <add>, %125, %cst_46 [1] : vector<16x32xf32> to vector<16xf32>
    %127 = vector.shape_cast %126 : vector<16xf32> to vector<16x1xf32>
    %cst_47 = arith.constant 3.200000e+01 : f32
    %128 = vector.broadcast %cst_47 : f32 to vector<16x1xf32>
    %129 = arith.divf %127, %128 : vector<16x1xf32>
    %130 = vector.broadcast %122 : vector<16x1xf32> to vector<16x32xf32>
    %131 = arith.subf %114, %130 : vector<16x32xf32>
    %cst_48 = arith.constant 9.99999974E-6 : f32
    %132 = vector.broadcast %cst_48 : f32 to vector<16x1xf32>
    %133 = arith.addf %129, %132 : vector<16x1xf32>
    %134 = math.rsqrt %133 : vector<16x1xf32>
    %135 = vector.broadcast %134 : vector<16x1xf32> to vector<16x32xf32>
    %136 = arith.mulf %131, %135 : vector<16x32xf32>
    %137 = vector.broadcast %116 : vector<1x32xf32> to vector<16x32xf32>
    %138 = arith.mulf %136, %137 : vector<16x32xf32>
    %139 = vector.broadcast %118 : vector<1x32xf32> to vector<16x32xf32>
    %140 = arith.addf %138, %139 : vector<16x32xf32>
    %c0_49 = arith.constant 0 : index
    %c0_50 = arith.constant 0 : index
    %c0_51 = arith.constant 0 : index
    %141 = vector.load %arg9[%c0_49, %c0_50, %c0_51] : memref<1x64x32xbf16, #tpu.memory_space<vmem>>, vector<1x64x32xbf16>
    %142 = vector.shape_cast %141 : vector<1x64x32xbf16> to vector<64x32xbf16>
    %c0_52 = arith.constant 0 : index
    %c0_53 = arith.constant 0 : index
    %c0_54 = arith.constant 0 : index
    %143 = vector.load %arg10[%c0_52, %c0_53, %c0_54] : memref<1x1x64xf32, #tpu.memory_space<vmem>>, vector<1x1x64xf32>
    %144 = vector.shape_cast %143 : vector<1x1x64xf32> to vector<1x64xf32>
    %145 = arith.truncf %140 : vector<16x32xf32> to vector<16x32xbf16>
    %cst_55 = arith.constant dense<0.000000e+00> : vector<16x64xf32>
    %146 = tpu.matmul %145, %142, %cst_55 {dimension_numbers = #tpu.dot_dimension_numbers<[1], [1], [0], [0], [0, 0, 1, 0], [], []>} : vector<16x32xbf16>, vector<64x32xbf16>, vector<16x64xf32> -> vector<16x64xf32>
    %147 = vector.broadcast %144 : vector<1x64xf32> to vector<16x64xf32>
    %148 = arith.addf %146, %147 : vector<16x64xf32>
    %cst_56 = arith.constant 0.000000e+00 : f32
    %149 = vector.broadcast %cst_56 : f32 to vector<16x64xf32>
    %150 = arith.maximumf %148, %149 : vector<16x64xf32>
    %c0_57 = arith.constant 0 : index
    %c0_58 = arith.constant 0 : index
    %c0_59 = arith.constant 0 : index
    %151 = vector.load %arg11[%c0_57, %c0_58, %c0_59] : memref<1x32x64xbf16, #tpu.memory_space<vmem>>, vector<1x32x64xbf16>
    %152 = vector.shape_cast %151 : vector<1x32x64xbf16> to vector<32x64xbf16>
    %c0_60 = arith.constant 0 : index
    %c0_61 = arith.constant 0 : index
    %c0_62 = arith.constant 0 : index
    %153 = vector.load %arg12[%c0_60, %c0_61, %c0_62] : memref<1x1x32xf32, #tpu.memory_space<vmem>>, vector<1x1x32xf32>
    %154 = vector.shape_cast %153 : vector<1x1x32xf32> to vector<1x32xf32>
    %155 = arith.truncf %150 : vector<16x64xf32> to vector<16x64xbf16>
    %cst_63 = arith.constant dense<0.000000e+00> : vector<16x32xf32>
    %156 = tpu.matmul %155, %152, %cst_63 {dimension_numbers = #tpu.dot_dimension_numbers<[1], [1], [0], [0], [0, 0, 1, 0], [], []>} : vector<16x64xbf16>, vector<32x64xbf16>, vector<16x32xf32> -> vector<16x32xf32>
    %157 = vector.broadcast %154 : vector<1x32xf32> to vector<16x32xf32>
    %158 = arith.addf %156, %157 : vector<16x32xf32>
    %159 = arith.addf %140, %158 : vector<16x32xf32>
    %c0_64 = arith.constant 0 : index
    %c0_65 = arith.constant 0 : index
    %c0_66 = arith.constant 0 : index
    %160 = vector.load %arg13[%c0_64, %c0_65, %c0_66] : memref<1x1x32xf32, #tpu.memory_space<vmem>>, vector<1x1x32xf32>
    %161 = vector.shape_cast %160 : vector<1x1x32xf32> to vector<1x32xf32>
    %c0_67 = arith.constant 0 : index
    %c0_68 = arith.constant 0 : index
    %c0_69 = arith.constant 0 : index
    %162 = vector.load %arg14[%c0_67, %c0_68, %c0_69] : memref<1x1x32xf32, #tpu.memory_space<vmem>>, vector<1x1x32xf32>
    %163 = vector.shape_cast %162 : vector<1x1x32xf32> to vector<1x32xf32>
    %cst_70 = arith.constant dense<0.000000e+00> : vector<16xf32>
    %164 = vector.multi_reduction <add>, %159, %cst_70 [1] : vector<16x32xf32> to vector<16xf32>
    %165 = vector.shape_cast %164 : vector<16xf32> to vector<16x1xf32>
    %cst_71 = arith.constant 3.200000e+01 : f32
    %166 = vector.broadcast %cst_71 : f32 to vector<16x1xf32>
    %167 = arith.divf %165, %166 : vector<16x1xf32>
    %168 = vector.broadcast %167 : vector<16x1xf32> to vector<16x32xf32>
    %169 = arith.subf %159, %168 : vector<16x32xf32>
    %170 = arith.mulf %169, %169 : vector<16x32xf32>
    %cst_72 = arith.constant dense<0.000000e+00> : vector<16xf32>
    %171 = vector.multi_reduction <add>, %170, %cst_72 [1] : vector<16x32xf32> to vector<16xf32>
    %172 = vector.shape_cast %171 : vector<16xf32> to vector<16x1xf32>
    %cst_73 = arith.constant 3.200000e+01 : f32
    %173 = vector.broadcast %cst_73 : f32 to vector<16x1xf32>
    %174 = arith.divf %172, %173 : vector<16x1xf32>
    %175 = vector.broadcast %167 : vector<16x1xf32> to vector<16x32xf32>
    %176 = arith.subf %159, %175 : vector<16x32xf32>
    %cst_74 = arith.constant 9.99999974E-6 : f32
    %177 = vector.broadcast %cst_74 : f32 to vector<16x1xf32>
    %178 = arith.addf %174, %177 : vector<16x1xf32>
    %179 = math.rsqrt %178 : vector<16x1xf32>
    %180 = vector.broadcast %179 : vector<16x1xf32> to vector<16x32xf32>
    %181 = arith.mulf %176, %180 : vector<16x32xf32>
    %182 = vector.broadcast %161 : vector<1x32xf32> to vector<16x32xf32>
    %183 = arith.mulf %181, %182 : vector<16x32xf32>
    %184 = vector.broadcast %163 : vector<1x32xf32> to vector<16x32xf32>
    %185 = arith.addf %183, %184 : vector<16x32xf32>
    %186 = vector.shape_cast %185 : vector<16x32xf32> to vector<2x8x32xf32>
    %c0_75 = arith.constant 0 : index
    %c0_76 = arith.constant 0 : index
    %c0_77 = arith.constant 0 : index
    %187 = vector.load %arg16[%c0_75, %c0_76, %c0_77] : memref<2x8x32xf32, #tpu.memory_space<vmem>>, vector<2x8x32xf32>
    tpu.vector_store %arg16[%c0_75, %c0_76, %c0_77], %186 {strides = array<i32>} : memref<2x8x32xf32, #tpu.memory_space<vmem>>, vector<2x8x32xf32>,
    %c1_i32 = arith.constant 1 : i32
    %188 = arith.cmpi eq, %arg0, %c1_i32 : i32
    %189 = arith.extui %188 : i1 to i32
    %c0_i32_78 = arith.constant 0 : i32
    %190 = arith.cmpi ne, %189, %c0_i32_78 : i32
    scf.if %190 {
      %c0_79 = arith.constant 0 : index
      %c0_80 = arith.constant 0 : index
      %c0_81 = arith.constant 0 : index
      %191 = vector.load %arg16[%c0_79, %c0_80, %c0_81] : memref<2x8x32xf32, #tpu.memory_space<vmem>>, vector<2x8x32xf32>
      %c0_82 = arith.constant 0 : index
      %c0_83 = arith.constant 0 : index
      %c0_84 = arith.constant 0 : index
      %192 = vector.load %arg15[%c0_82, %c0_83, %c0_84] : memref<2x8x32xf32, #tpu.memory_space<vmem>>, vector<2x8x32xf32>
      tpu.vector_store %arg15[%c0_82, %c0_83, %c0_84], %191 {strides = array<i32>} : memref<2x8x32xf32, #tpu.memory_space<vmem>>, vector<2x8x32xf32>,
    } else {
    }
    return
  }
  func.func @transform_0(%arg0: i32) -> (i32, i32, i32) {
    %c0_i32 = arith.constant 0 : i32
    %c0_i32_0 = arith.constant 0 : i32
    %c0_i32_1 = arith.constant 0 : i32
    %c0_i32_2 = arith.constant 0 : i32
    return %c0_i32, %c0_i32_0, %c0_i32_1 : i32, i32, i32
  }
  func.func @transform_1(%arg0: i32) -> (i32, i32) {
    %c0_i32 = arith.constant 0 : i32
    %c0_i32_0 = arith.constant 0 : i32
    %c0_i32_1 = arith.constant 0 : i32
    return %c0_i32, %c0_i32_0 : i32, i32
  }
  func.func @transform_2(%arg0: i32) -> (i32, i32, i32) {
    %c0_i32 = arith.constant 0 : i32
    %c0_i32_0 = arith.constant 0 : i32
    %c0_i32_1 = arith.constant 0 : i32
    return %arg0, %c0_i32, %c0_i32_0 : i32, i32, i32
  }
  func.func @transform_3(%arg0: i32) -> (i32, i32, i32) {
    %c0_i32 = arith.constant 0 : i32
    %c0_i32_0 = arith.constant 0 : i32
    %c0_i32_1 = arith.constant 0 : i32
    return %arg0, %c0_i32, %c0_i32_0 : i32, i32, i32
  }
  func.func @transform_4(%arg0: i32) -> (i32, i32, i32) {
    %c0_i32 = arith.constant 0 : i32
    %c0_i32_0 = arith.constant 0 : i32
    %c0_i32_1 = arith.constant 0 : i32
    return %arg0, %c0_i32, %c0_i32_0 : i32, i32, i32
  }
  func.func @transform_5(%arg0: i32) -> (i32, i32, i32) {
    %c0_i32 = arith.constant 0 : i32
    %c0_i32_0 = arith.constant 0 : i32
    %c0_i32_1 = arith.constant 0 : i32
    return %arg0, %c0_i32, %c0_i32_0 : i32, i32, i32
  }
  func.func @transform_6(%arg0: i32) -> (i32, i32, i32) {
    %c0_i32 = arith.constant 0 : i32
    %c0_i32_0 = arith.constant 0 : i32
    %c0_i32_1 = arith.constant 0 : i32
    return %arg0, %c0_i32, %c0_i32_0 : i32, i32, i32
  }
  func.func @transform_7(%arg0: i32) -> (i32, i32, i32) {
    %c0_i32 = arith.constant 0 : i32
    %c0_i32_0 = arith.constant 0 : i32
    %c0_i32_1 = arith.constant 0 : i32
    return %arg0, %c0_i32, %c0_i32_0 : i32, i32, i32
  }
  func.func @transform_8(%arg0: i32) -> (i32, i32, i32) {
    %c0_i32 = arith.constant 0 : i32
    %c0_i32_0 = arith.constant 0 : i32
    %c0_i32_1 = arith.constant 0 : i32
    return %arg0, %c0_i32, %c0_i32_0 : i32, i32, i32
  }
  func.func @transform_9(%arg0: i32) -> (i32, i32, i32) {
    %c0_i32 = arith.constant 0 : i32
    %c0_i32_0 = arith.constant 0 : i32
    %c0_i32_1 = arith.constant 0 : i32
    return %arg0, %c0_i32, %c0_i32_0 : i32, i32, i32
  }
  func.func @transform_10(%arg0: i32) -> (i32, i32, i32) {
    %c0_i32 = arith.constant 0 : i32
    %c0_i32_0 = arith.constant 0 : i32
    %c0_i32_1 = arith.constant 0 : i32
    return %arg0, %c0_i32, %c0_i32_0 : i32, i32, i32
  }
  func.func @transform_11(%arg0: i32) -> (i32, i32, i32) {
    %c0_i32 = arith.constant 0 : i32
    %c0_i32_0 = arith.constant 0 : i32
    %c0_i32_1 = arith.constant 0 : i32
    return %arg0, %c0_i32, %c0_i32_0 : i32, i32, i32
  }
  func.func @transform_12(%arg0: i32) -> (i32, i32, i32) {
    %c0_i32 = arith.constant 0 : i32
    %c0_i32_0 = arith.constant 0 : i32
    %c0_i32_1 = arith.constant 0 : i32
    return %arg0, %c0_i32, %c0_i32_0 : i32, i32, i32
  }
  func.func @transform_13(%arg0: i32) -> (i32, i32, i32) {
    %c0_i32 = arith.constant 0 : i32
    %c0_i32_0 = arith.constant 0 : i32
    %c0_i32_1 = arith.constant 0 : i32
    return %arg0, %c0_i32, %c0_i32_0 : i32, i32, i32
  }
  func.func @transform_14(%arg0: i32) -> (i32, i32, i32) {
    %c0_i32 = arith.constant 0 : i32
    %c0_i32_0 = arith.constant 0 : i32
    %c0_i32_1 = arith.constant 0 : i32
    %c0_i32_2 = arith.constant 0 : i32
    return %c0_i32, %c0_i32_0, %c0_i32_1 : i32, i32, i32
  }
}

module attributes {stable_mosaic.version = 11 : i64} {
  func.func @_decoder_stack_kernel(%arg0: i32, %arg1: memref<2x8x32xf32, #tpu.memory_space<vmem>>, %arg2: memref<2x8x32xf32, #tpu.memory_space<vmem>>, %arg3: memref<2x8xf32, #tpu.memory_space<vmem>>, %arg4: memref<2x8xf32, #tpu.memory_space<vmem>>, %arg5: memref<8x8xf32, #tpu.memory_space<vmem>>, %arg6: memref<1x96x32xbf16, #tpu.memory_space<vmem>>, %arg7: memref<1x1x96xf32, #tpu.memory_space<vmem>>, %arg8: memref<1x32x32xbf16, #tpu.memory_space<vmem>>, %arg9: memref<1x1x32xf32, #tpu.memory_space<vmem>>, %arg10: memref<1x1x32xf32, #tpu.memory_space<vmem>>, %arg11: memref<1x1x32xf32, #tpu.memory_space<vmem>>, %arg12: memref<1x32x32xbf16, #tpu.memory_space<vmem>>, %arg13: memref<1x1x32xf32, #tpu.memory_space<vmem>>, %arg14: memref<1x64x32xbf16, #tpu.memory_space<vmem>>, %arg15: memref<1x1x64xf32, #tpu.memory_space<vmem>>, %arg16: memref<1x32x32xbf16, #tpu.memory_space<vmem>>, %arg17: memref<1x1x32xf32, #tpu.memory_space<vmem>>, %arg18: memref<1x1x32xf32, #tpu.memory_space<vmem>>, %arg19: memref<1x1x32xf32, #tpu.memory_space<vmem>>, %arg20: memref<1x64x32xbf16, #tpu.memory_space<vmem>>, %arg21: memref<1x1x64xf32, #tpu.memory_space<vmem>>, %arg22: memref<1x32x64xbf16, #tpu.memory_space<vmem>>, %arg23: memref<1x1x32xf32, #tpu.memory_space<vmem>>, %arg24: memref<1x1x32xf32, #tpu.memory_space<vmem>>, %arg25: memref<1x1x32xf32, #tpu.memory_space<vmem>>, %arg26: memref<128x32xbf16, #tpu.memory_space<vmem>>, %arg27: memref<1x128xf32, #tpu.memory_space<vmem>>, %arg28: memref<2x8x128xf32, #tpu.memory_space<vmem>>, %arg29: memref<2x8x32xf32, #tpu.memory_space<vmem>>) attributes {dimension_semantics = [#tpu.dimension_semantics<arbitrary>], iteration_bounds = array<i64: 2>, scalar_prefetch = 0 : i64, scratch_operands = 1 : i64, tpu.core_type = #tpu.core_type<tc>, window_params = [{pipeline_mode = #tpu.pipeline_mode<synchronous>, transform_indices = @transform_0, window_bounds = array<i64: 2, 8, 32>}, {pipeline_mode = #tpu.pipeline_mode<synchronous>, transform_indices = @transform_1, window_bounds = array<i64: 2, 8, 32>}, {pipeline_mode = #tpu.pipeline_mode<synchronous>, transform_indices = @transform_2, window_bounds = array<i64: 2, 8>}, {pipeline_mode = #tpu.pipeline_mode<synchronous>, transform_indices = @transform_3, window_bounds = array<i64: 2, 8>}, {pipeline_mode = #tpu.pipeline_mode<synchronous>, transform_indices = @transform_4, window_bounds = array<i64: 8, 8>}, {transform_indices = @transform_5, window_bounds = array<i64: 1, 96, 32>}, {transform_indices = @transform_6, window_bounds = array<i64: 1, 1, 96>}, {transform_indices = @transform_7, window_bounds = array<i64: 1, 32, 32>}, {transform_indices = @transform_8, window_bounds = array<i64: 1, 1, 32>}, {transform_indices = @transform_9, window_bounds = array<i64: 1, 1, 32>}, {transform_indices = @transform_10, window_bounds = array<i64: 1, 1, 32>}, {transform_indices = @transform_11, window_bounds = array<i64: 1, 32, 32>}, {transform_indices = @transform_12, window_bounds = array<i64: 1, 1, 32>}, {transform_indices = @transform_13, window_bounds = array<i64: 1, 64, 32>}, {transform_indices = @transform_14, window_bounds = array<i64: 1, 1, 64>}, {transform_indices = @transform_15, window_bounds = array<i64: 1, 32, 32>}, {transform_indices = @transform_16, window_bounds = array<i64: 1, 1, 32>}, {transform_indices = @transform_17, window_bounds = array<i64: 1, 1, 32>}, {transform_indices = @transform_18, window_bounds = array<i64: 1, 1, 32>}, {transform_indices = @transform_19, window_bounds = array<i64: 1, 64, 32>}, {transform_indices = @transform_20, window_bounds = array<i64: 1, 1, 64>}, {transform_indices = @transform_21, window_bounds = array<i64: 1, 32, 64>}, {transform_indices = @transform_22, window_bounds = array<i64: 1, 1, 32>}, {transform_indices = @transform_23, window_bounds = array<i64: 1, 1, 32>}, {transform_indices = @transform_24, window_bounds = array<i64: 1, 1, 32>}, {pipeline_mode = #tpu.pipeline_mode<synchronous>, transform_indices = @transform_25, window_bounds = array<i64: 128, 32>}, {pipeline_mode = #tpu.pipeline_mode<synchronous>, transform_indices = @transform_26, window_bounds = array<i64: 1, 128>}, {pipeline_mode = #tpu.pipeline_mode<synchronous>, transform_indices = @transform_27, window_bounds = array<i64: 2, 8, 128>}]} {
    %c0_i32 = arith.constant 0 : i32
    %0 = arith.cmpi eq, %arg0, %c0_i32 : i32
    %1 = arith.extui %0 : i1 to i32
    %c0_i32_0 = arith.constant 0 : i32
    %2 = arith.cmpi ne, %1, %c0_i32_0 : i32
    scf.if %2 {
      %c0_138 = arith.constant 0 : index
      %c0_139 = arith.constant 0 : index
      %c0_140 = arith.constant 0 : index
      %337 = vector.load %arg1[%c0_138, %c0_139, %c0_140] : memref<2x8x32xf32, #tpu.memory_space<vmem>>, vector<2x8x32xf32>
      %c0_141 = arith.constant 0 : index
      %c0_142 = arith.constant 0 : index
      %c0_143 = arith.constant 0 : index
      %338 = vector.load %arg29[%c0_141, %c0_142, %c0_143] : memref<2x8x32xf32, #tpu.memory_space<vmem>>, vector<2x8x32xf32>
      tpu.vector_store %arg29[%c0_141, %c0_142, %c0_143], %337 {strides = array<i32>} : memref<2x8x32xf32, #tpu.memory_space<vmem>>, vector<2x8x32xf32>,
    } else {
    }
    %c0 = arith.constant 0 : index
    %c0_1 = arith.constant 0 : index
    %c0_2 = arith.constant 0 : index
    %3 = vector.load %arg29[%c0, %c0_1, %c0_2] : memref<2x8x32xf32, #tpu.memory_space<vmem>>, vector<2x8x32xf32>
    %4 = vector.shape_cast %3 : vector<2x8x32xf32> to vector<16x32xf32>
    %c0_3 = arith.constant 0 : index
    %c0_4 = arith.constant 0 : index
    %c0_5 = arith.constant 0 : index
    %5 = vector.load %arg6[%c0_3, %c0_4, %c0_5] : memref<1x96x32xbf16, #tpu.memory_space<vmem>>, vector<1x96x32xbf16>
    %6 = vector.shape_cast %5 : vector<1x96x32xbf16> to vector<96x32xbf16>
    %c0_6 = arith.constant 0 : index
    %c0_7 = arith.constant 0 : index
    %c0_8 = arith.constant 0 : index
    %7 = vector.load %arg7[%c0_6, %c0_7, %c0_8] : memref<1x1x96xf32, #tpu.memory_space<vmem>>, vector<1x1x96xf32>
    %8 = vector.shape_cast %7 : vector<1x1x96xf32> to vector<1x96xf32>
    %9 = arith.truncf %4 : vector<16x32xf32> to vector<16x32xbf16>
    %cst = arith.constant dense<0.000000e+00> : vector<16x96xf32>
    %10 = tpu.matmul %9, %6, %cst {dimension_numbers = #tpu.dot_dimension_numbers<[1], [1], [0], [0], [0, 0, 1, 0], [], []>} : vector<16x32xbf16>, vector<96x32xbf16>, vector<16x96xf32> -> vector<16x96xf32>
    %11 = vector.broadcast %8 : vector<1x96xf32> to vector<16x96xf32>
    %12 = arith.addf %10, %11 : vector<16x96xf32>
    %13 = vector.extract_strided_slice %12 {offsets = [0, 0], sizes = [16, 32], strides = [1, 1]} : vector<16x96xf32> to vector<16x32xf32>
    %14 = vector.shape_cast %13 : vector<16x32xf32> to vector<2x8x32xf32>
    %15 = vector.extract_strided_slice %12 {offsets = [0, 32], sizes = [16, 32], strides = [1, 1]} : vector<16x96xf32> to vector<16x32xf32>
    %16 = vector.shape_cast %15 : vector<16x32xf32> to vector<2x8x32xf32>
    %17 = vector.extract_strided_slice %12 {offsets = [0, 64], sizes = [16, 32], strides = [1, 1]} : vector<16x96xf32> to vector<16x32xf32>
    %18 = vector.shape_cast %17 : vector<16x32xf32> to vector<2x8x32xf32>
    %c0_9 = arith.constant 0 : index
    %c0_10 = arith.constant 0 : index
    %19 = vector.load %arg3[%c0_9, %c0_10] : memref<2x8xf32, #tpu.memory_space<vmem>>, vector<2x8xf32>
    %20 = vector.shape_cast %19 : vector<2x8xf32> to vector<2x1x8xf32>
    %c0_11 = arith.constant 0 : index
    %c0_12 = arith.constant 0 : index
    %21 = vector.load %arg5[%c0_11, %c0_12] : memref<8x8xf32, #tpu.memory_space<vmem>>, vector<8x8xf32>
    %22 = vector.shape_cast %21 : vector<8x8xf32> to vector<1x8x8xf32>
    %23 = vector.broadcast %20 : vector<2x1x8xf32> to vector<2x8x8xf32>
    %24 = vector.broadcast %22 : vector<1x8x8xf32> to vector<2x8x8xf32>
    %25 = arith.addf %23, %24 : vector<2x8x8xf32>
    %26 = arith.truncf %14 : vector<2x8x32xf32> to vector<2x8x32xbf16>
    %27 = arith.truncf %16 : vector<2x8x32xf32> to vector<2x8x32xbf16>
    %28 = arith.truncf %18 : vector<2x8x32xf32> to vector<2x8x32xbf16>
    %29 = vector.extract_strided_slice %26 {offsets = [0, 0, 0], sizes = [2, 8, 8], strides = [1, 1, 1]} : vector<2x8x32xbf16> to vector<2x8x8xbf16>
    %30 = vector.extract_strided_slice %27 {offsets = [0, 0, 0], sizes = [2, 8, 8], strides = [1, 1, 1]} : vector<2x8x32xbf16> to vector<2x8x8xbf16>
    %cst_13 = arith.constant dense<0.000000e+00> : vector<2x8x8xf32>
    %31 = tpu.matmul %29, %30, %cst_13 {dimension_numbers = #tpu.dot_dimension_numbers<[2], [2], [1], [1], [0, 0, 0, 1, 1, 1], [0], [0]>} : vector<2x8x8xbf16>, vector<2x8x8xbf16>, vector<2x8x8xf32> -> vector<2x8x8xf32>
    %cst_14 = arith.constant 0.353553385 : f32
    %32 = vector.broadcast %cst_14 : f32 to vector<2x8x8xf32>
    %33 = arith.mulf %31, %32 : vector<2x8x8xf32>
    %34 = arith.addf %33, %25 : vector<2x8x8xf32>
    %cst_15 = arith.constant dense<0xFF800000> : vector<2x8xf32>
    %35 = vector.multi_reduction <maximumf>, %34, %cst_15 [2] : vector<2x8x8xf32> to vector<2x8xf32>
    %36 = vector.shape_cast %35 : vector<2x8xf32> to vector<2x8x1xf32>
    %37 = vector.broadcast %36 : vector<2x8x1xf32> to vector<2x8x8xf32>
    %38 = arith.subf %34, %37 : vector<2x8x8xf32>
    %39 = math.exp %38 : vector<2x8x8xf32>
    %cst_16 = arith.constant dense<0.000000e+00> : vector<2x8xf32>
    %40 = vector.multi_reduction <add>, %39, %cst_16 [2] : vector<2x8x8xf32> to vector<2x8xf32>
    %41 = vector.shape_cast %40 : vector<2x8xf32> to vector<2x8x1xf32>
    %42 = tpu.reciprocal %41 {approx = true} : vector<2x8x1xf32> -> vector<2x8x1xf32>
    %43 = vector.broadcast %42 : vector<2x8x1xf32> to vector<2x8x8xf32>
    %44 = arith.mulf %39, %43 : vector<2x8x8xf32>
    %45 = arith.truncf %44 : vector<2x8x8xf32> to vector<2x8x8xbf16>
    %46 = vector.extract_strided_slice %28 {offsets = [0, 0, 0], sizes = [2, 8, 8], strides = [1, 1, 1]} : vector<2x8x32xbf16> to vector<2x8x8xbf16>
    %cst_17 = arith.constant dense<0.000000e+00> : vector<2x8x8xf32>
    %47 = tpu.matmul %45, %46, %cst_17 {dimension_numbers = #tpu.dot_dimension_numbers<[2], [1], [1], [2], [0, 0, 0, 1, 1, 2], [0], [0]>} : vector<2x8x8xbf16>, vector<2x8x8xbf16>, vector<2x8x8xf32> -> vector<2x8x8xf32>
    %48 = vector.extract_strided_slice %26 {offsets = [0, 0, 8], sizes = [2, 8, 8], strides = [1, 1, 1]} : vector<2x8x32xbf16> to vector<2x8x8xbf16>
    %49 = vector.extract_strided_slice %27 {offsets = [0, 0, 8], sizes = [2, 8, 8], strides = [1, 1, 1]} : vector<2x8x32xbf16> to vector<2x8x8xbf16>
    %cst_18 = arith.constant dense<0.000000e+00> : vector<2x8x8xf32>
    %50 = tpu.matmul %48, %49, %cst_18 {dimension_numbers = #tpu.dot_dimension_numbers<[2], [2], [1], [1], [0, 0, 0, 1, 1, 1], [0], [0]>} : vector<2x8x8xbf16>, vector<2x8x8xbf16>, vector<2x8x8xf32> -> vector<2x8x8xf32>
    %cst_19 = arith.constant 0.353553385 : f32
    %51 = vector.broadcast %cst_19 : f32 to vector<2x8x8xf32>
    %52 = arith.mulf %50, %51 : vector<2x8x8xf32>
    %53 = arith.addf %52, %25 : vector<2x8x8xf32>
    %cst_20 = arith.constant dense<0xFF800000> : vector<2x8xf32>
    %54 = vector.multi_reduction <maximumf>, %53, %cst_20 [2] : vector<2x8x8xf32> to vector<2x8xf32>
    %55 = vector.shape_cast %54 : vector<2x8xf32> to vector<2x8x1xf32>
    %56 = vector.broadcast %55 : vector<2x8x1xf32> to vector<2x8x8xf32>
    %57 = arith.subf %53, %56 : vector<2x8x8xf32>
    %58 = math.exp %57 : vector<2x8x8xf32>
    %cst_21 = arith.constant dense<0.000000e+00> : vector<2x8xf32>
    %59 = vector.multi_reduction <add>, %58, %cst_21 [2] : vector<2x8x8xf32> to vector<2x8xf32>
    %60 = vector.shape_cast %59 : vector<2x8xf32> to vector<2x8x1xf32>
    %61 = tpu.reciprocal %60 {approx = true} : vector<2x8x1xf32> -> vector<2x8x1xf32>
    %62 = vector.broadcast %61 : vector<2x8x1xf32> to vector<2x8x8xf32>
    %63 = arith.mulf %58, %62 : vector<2x8x8xf32>
    %64 = arith.truncf %63 : vector<2x8x8xf32> to vector<2x8x8xbf16>
    %65 = vector.extract_strided_slice %28 {offsets = [0, 0, 8], sizes = [2, 8, 8], strides = [1, 1, 1]} : vector<2x8x32xbf16> to vector<2x8x8xbf16>
    %cst_22 = arith.constant dense<0.000000e+00> : vector<2x8x8xf32>
    %66 = tpu.matmul %64, %65, %cst_22 {dimension_numbers = #tpu.dot_dimension_numbers<[2], [1], [1], [2], [0, 0, 0, 1, 1, 2], [0], [0]>} : vector<2x8x8xbf16>, vector<2x8x8xbf16>, vector<2x8x8xf32> -> vector<2x8x8xf32>
    %67 = vector.extract_strided_slice %26 {offsets = [0, 0, 16], sizes = [2, 8, 8], strides = [1, 1, 1]} : vector<2x8x32xbf16> to vector<2x8x8xbf16>
    %68 = vector.extract_strided_slice %27 {offsets = [0, 0, 16], sizes = [2, 8, 8], strides = [1, 1, 1]} : vector<2x8x32xbf16> to vector<2x8x8xbf16>
    %cst_23 = arith.constant dense<0.000000e+00> : vector<2x8x8xf32>
    %69 = tpu.matmul %67, %68, %cst_23 {dimension_numbers = #tpu.dot_dimension_numbers<[2], [2], [1], [1], [0, 0, 0, 1, 1, 1], [0], [0]>} : vector<2x8x8xbf16>, vector<2x8x8xbf16>, vector<2x8x8xf32> -> vector<2x8x8xf32>
    %cst_24 = arith.constant 0.353553385 : f32
    %70 = vector.broadcast %cst_24 : f32 to vector<2x8x8xf32>
    %71 = arith.mulf %69, %70 : vector<2x8x8xf32>
    %72 = arith.addf %71, %25 : vector<2x8x8xf32>
    %cst_25 = arith.constant dense<0xFF800000> : vector<2x8xf32>
    %73 = vector.multi_reduction <maximumf>, %72, %cst_25 [2] : vector<2x8x8xf32> to vector<2x8xf32>
    %74 = vector.shape_cast %73 : vector<2x8xf32> to vector<2x8x1xf32>
    %75 = vector.broadcast %74 : vector<2x8x1xf32> to vector<2x8x8xf32>
    %76 = arith.subf %72, %75 : vector<2x8x8xf32>
    %77 = math.exp %76 : vector<2x8x8xf32>
    %cst_26 = arith.constant dense<0.000000e+00> : vector<2x8xf32>
    %78 = vector.multi_reduction <add>, %77, %cst_26 [2] : vector<2x8x8xf32> to vector<2x8xf32>
    %79 = vector.shape_cast %78 : vector<2x8xf32> to vector<2x8x1xf32>
    %80 = tpu.reciprocal %79 {approx = true} : vector<2x8x1xf32> -> vector<2x8x1xf32>
    %81 = vector.broadcast %80 : vector<2x8x1xf32> to vector<2x8x8xf32>
    %82 = arith.mulf %77, %81 : vector<2x8x8xf32>
    %83 = arith.truncf %82 : vector<2x8x8xf32> to vector<2x8x8xbf16>
    %84 = vector.extract_strided_slice %28 {offsets = [0, 0, 16], sizes = [2, 8, 8], strides = [1, 1, 1]} : vector<2x8x32xbf16> to vector<2x8x8xbf16>
    %cst_27 = arith.constant dense<0.000000e+00> : vector<2x8x8xf32>
    %85 = tpu.matmul %83, %84, %cst_27 {dimension_numbers = #tpu.dot_dimension_numbers<[2], [1], [1], [2], [0, 0, 0, 1, 1, 2], [0], [0]>} : vector<2x8x8xbf16>, vector<2x8x8xbf16>, vector<2x8x8xf32> -> vector<2x8x8xf32>
    %86 = vector.extract_strided_slice %26 {offsets = [0, 0, 24], sizes = [2, 8, 8], strides = [1, 1, 1]} : vector<2x8x32xbf16> to vector<2x8x8xbf16>
    %87 = vector.extract_strided_slice %27 {offsets = [0, 0, 24], sizes = [2, 8, 8], strides = [1, 1, 1]} : vector<2x8x32xbf16> to vector<2x8x8xbf16>
    %cst_28 = arith.constant dense<0.000000e+00> : vector<2x8x8xf32>
    %88 = tpu.matmul %86, %87, %cst_28 {dimension_numbers = #tpu.dot_dimension_numbers<[2], [2], [1], [1], [0, 0, 0, 1, 1, 1], [0], [0]>} : vector<2x8x8xbf16>, vector<2x8x8xbf16>, vector<2x8x8xf32> -> vector<2x8x8xf32>
    %cst_29 = arith.constant 0.353553385 : f32
    %89 = vector.broadcast %cst_29 : f32 to vector<2x8x8xf32>
    %90 = arith.mulf %88, %89 : vector<2x8x8xf32>
    %91 = arith.addf %90, %25 : vector<2x8x8xf32>
    %cst_30 = arith.constant dense<0xFF800000> : vector<2x8xf32>
    %92 = vector.multi_reduction <maximumf>, %91, %cst_30 [2] : vector<2x8x8xf32> to vector<2x8xf32>
    %93 = vector.shape_cast %92 : vector<2x8xf32> to vector<2x8x1xf32>
    %94 = vector.broadcast %93 : vector<2x8x1xf32> to vector<2x8x8xf32>
    %95 = arith.subf %91, %94 : vector<2x8x8xf32>
    %96 = math.exp %95 : vector<2x8x8xf32>
    %cst_31 = arith.constant dense<0.000000e+00> : vector<2x8xf32>
    %97 = vector.multi_reduction <add>, %96, %cst_31 [2] : vector<2x8x8xf32> to vector<2x8xf32>
    %98 = vector.shape_cast %97 : vector<2x8xf32> to vector<2x8x1xf32>
    %99 = tpu.reciprocal %98 {approx = true} : vector<2x8x1xf32> -> vector<2x8x1xf32>
    %100 = vector.broadcast %99 : vector<2x8x1xf32> to vector<2x8x8xf32>
    %101 = arith.mulf %96, %100 : vector<2x8x8xf32>
    %102 = arith.truncf %101 : vector<2x8x8xf32> to vector<2x8x8xbf16>
    %103 = vector.extract_strided_slice %28 {offsets = [0, 0, 24], sizes = [2, 8, 8], strides = [1, 1, 1]} : vector<2x8x32xbf16> to vector<2x8x8xbf16>
    %cst_32 = arith.constant dense<0.000000e+00> : vector<2x8x8xf32>
    %104 = tpu.matmul %102, %103, %cst_32 {dimension_numbers = #tpu.dot_dimension_numbers<[2], [1], [1], [2], [0, 0, 0, 1, 1, 2], [0], [0]>} : vector<2x8x8xbf16>, vector<2x8x8xbf16>, vector<2x8x8xf32> -> vector<2x8x8xf32>
    %105 = tpu.concatenate %47, %66, %85, %104 in 2 : vector<2x8x8xf32>, vector<2x8x8xf32>, vector<2x8x8xf32>, vector<2x8x8xf32> -> vector<2x8x32xf32>
    %106 = vector.shape_cast %105 : vector<2x8x32xf32> to vector<16x32xf32>
    %c0_33 = arith.constant 0 : index
    %c0_34 = arith.constant 0 : index
    %c0_35 = arith.constant 0 : index
    %107 = vector.load %arg8[%c0_33, %c0_34, %c0_35] : memref<1x32x32xbf16, #tpu.memory_space<vmem>>, vector<1x32x32xbf16>
    %108 = vector.shape_cast %107 : vector<1x32x32xbf16> to vector<32x32xbf16>
    %c0_36 = arith.constant 0 : index
    %c0_37 = arith.constant 0 : index
    %c0_38 = arith.constant 0 : index
    %109 = vector.load %arg9[%c0_36, %c0_37, %c0_38] : memref<1x1x32xf32, #tpu.memory_space<vmem>>, vector<1x1x32xf32>
    %110 = vector.shape_cast %109 : vector<1x1x32xf32> to vector<1x32xf32>
    %111 = arith.truncf %106 : vector<16x32xf32> to vector<16x32xbf16>
    %cst_39 = arith.constant dense<0.000000e+00> : vector<16x32xf32>
    %112 = tpu.matmul %111, %108, %cst_39 {dimension_numbers = #tpu.dot_dimension_numbers<[1], [1], [0], [0], [0, 0, 1, 0], [], []>} : vector<16x32xbf16>, vector<32x32xbf16>, vector<16x32xf32> -> vector<16x32xf32>
    %113 = vector.broadcast %110 : vector<1x32xf32> to vector<16x32xf32>
    %114 = arith.addf %112, %113 : vector<16x32xf32>
    %115 = arith.addf %114, %4 : vector<16x32xf32>
    %c0_40 = arith.constant 0 : index
    %c0_41 = arith.constant 0 : index
    %c0_42 = arith.constant 0 : index
    %116 = vector.load %arg10[%c0_40, %c0_41, %c0_42] : memref<1x1x32xf32, #tpu.memory_space<vmem>>, vector<1x1x32xf32>
    %117 = vector.shape_cast %116 : vector<1x1x32xf32> to vector<1x32xf32>
    %c0_43 = arith.constant 0 : index
    %c0_44 = arith.constant 0 : index
    %c0_45 = arith.constant 0 : index
    %118 = vector.load %arg11[%c0_43, %c0_44, %c0_45] : memref<1x1x32xf32, #tpu.memory_space<vmem>>, vector<1x1x32xf32>
    %119 = vector.shape_cast %118 : vector<1x1x32xf32> to vector<1x32xf32>
    %cst_46 = arith.constant dense<0.000000e+00> : vector<16xf32>
    %120 = vector.multi_reduction <add>, %115, %cst_46 [1] : vector<16x32xf32> to vector<16xf32>
    %121 = vector.shape_cast %120 : vector<16xf32> to vector<16x1xf32>
    %cst_47 = arith.constant 3.200000e+01 : f32
    %122 = vector.broadcast %cst_47 : f32 to vector<16x1xf32>
    %123 = arith.divf %121, %122 : vector<16x1xf32>
    %124 = vector.broadcast %123 : vector<16x1xf32> to vector<16x32xf32>
    %125 = arith.subf %115, %124 : vector<16x32xf32>
    %126 = arith.mulf %125, %125 : vector<16x32xf32>
    %cst_48 = arith.constant dense<0.000000e+00> : vector<16xf32>
    %127 = vector.multi_reduction <add>, %126, %cst_48 [1] : vector<16x32xf32> to vector<16xf32>
    %128 = vector.shape_cast %127 : vector<16xf32> to vector<16x1xf32>
    %cst_49 = arith.constant 3.200000e+01 : f32
    %129 = vector.broadcast %cst_49 : f32 to vector<16x1xf32>
    %130 = arith.divf %128, %129 : vector<16x1xf32>
    %131 = vector.broadcast %123 : vector<16x1xf32> to vector<16x32xf32>
    %132 = arith.subf %115, %131 : vector<16x32xf32>
    %cst_50 = arith.constant 9.99999974E-6 : f32
    %133 = vector.broadcast %cst_50 : f32 to vector<16x1xf32>
    %134 = arith.addf %130, %133 : vector<16x1xf32>
    %135 = math.rsqrt %134 : vector<16x1xf32>
    %136 = vector.broadcast %135 : vector<16x1xf32> to vector<16x32xf32>
    %137 = arith.mulf %132, %136 : vector<16x32xf32>
    %138 = vector.broadcast %117 : vector<1x32xf32> to vector<16x32xf32>
    %139 = arith.mulf %137, %138 : vector<16x32xf32>
    %140 = vector.broadcast %119 : vector<1x32xf32> to vector<16x32xf32>
    %141 = arith.addf %139, %140 : vector<16x32xf32>
    %c0_51 = arith.constant 0 : index
    %c0_52 = arith.constant 0 : index
    %c0_53 = arith.constant 0 : index
    %142 = vector.load %arg2[%c0_51, %c0_52, %c0_53] : memref<2x8x32xf32, #tpu.memory_space<vmem>>, vector<2x8x32xf32>
    %143 = vector.shape_cast %142 : vector<2x8x32xf32> to vector<16x32xf32>
    %c0_54 = arith.constant 0 : index
    %c0_55 = arith.constant 0 : index
    %c0_56 = arith.constant 0 : index
    %144 = vector.load %arg12[%c0_54, %c0_55, %c0_56] : memref<1x32x32xbf16, #tpu.memory_space<vmem>>, vector<1x32x32xbf16>
    %145 = vector.shape_cast %144 : vector<1x32x32xbf16> to vector<32x32xbf16>
    %c0_57 = arith.constant 0 : index
    %c0_58 = arith.constant 0 : index
    %c0_59 = arith.constant 0 : index
    %146 = vector.load %arg13[%c0_57, %c0_58, %c0_59] : memref<1x1x32xf32, #tpu.memory_space<vmem>>, vector<1x1x32xf32>
    %147 = vector.shape_cast %146 : vector<1x1x32xf32> to vector<1x32xf32>
    %148 = arith.truncf %141 : vector<16x32xf32> to vector<16x32xbf16>
    %cst_60 = arith.constant dense<0.000000e+00> : vector<16x32xf32>
    %149 = tpu.matmul %148, %145, %cst_60 {dimension_numbers = #tpu.dot_dimension_numbers<[1], [1], [0], [0], [0, 0, 1, 0], [], []>} : vector<16x32xbf16>, vector<32x32xbf16>, vector<16x32xf32> -> vector<16x32xf32>
    %150 = vector.broadcast %147 : vector<1x32xf32> to vector<16x32xf32>
    %151 = arith.addf %149, %150 : vector<16x32xf32>
    %152 = vector.shape_cast %151 : vector<16x32xf32> to vector<2x8x32xf32>
    %c0_61 = arith.constant 0 : index
    %c0_62 = arith.constant 0 : index
    %c0_63 = arith.constant 0 : index
    %153 = vector.load %arg14[%c0_61, %c0_62, %c0_63] : memref<1x64x32xbf16, #tpu.memory_space<vmem>>, vector<1x64x32xbf16>
    %154 = vector.shape_cast %153 : vector<1x64x32xbf16> to vector<64x32xbf16>
    %c0_64 = arith.constant 0 : index
    %c0_65 = arith.constant 0 : index
    %c0_66 = arith.constant 0 : index
    %155 = vector.load %arg15[%c0_64, %c0_65, %c0_66] : memref<1x1x64xf32, #tpu.memory_space<vmem>>, vector<1x1x64xf32>
    %156 = vector.shape_cast %155 : vector<1x1x64xf32> to vector<1x64xf32>
    %157 = arith.truncf %143 : vector<16x32xf32> to vector<16x32xbf16>
    %cst_67 = arith.constant dense<0.000000e+00> : vector<16x64xf32>
    %158 = tpu.matmul %157, %154, %cst_67 {dimension_numbers = #tpu.dot_dimension_numbers<[1], [1], [0], [0], [0, 0, 1, 0], [], []>} : vector<16x32xbf16>, vector<64x32xbf16>, vector<16x64xf32> -> vector<16x64xf32>
    %159 = vector.broadcast %156 : vector<1x64xf32> to vector<16x64xf32>
    %160 = arith.addf %158, %159 : vector<16x64xf32>
    %161 = vector.extract_strided_slice %160 {offsets = [0, 0], sizes = [16, 32], strides = [1, 1]} : vector<16x64xf32> to vector<16x32xf32>
    %162 = vector.shape_cast %161 : vector<16x32xf32> to vector<2x8x32xf32>
    %163 = vector.extract_strided_slice %160 {offsets = [0, 32], sizes = [16, 32], strides = [1, 1]} : vector<16x64xf32> to vector<16x32xf32>
    %164 = vector.shape_cast %163 : vector<16x32xf32> to vector<2x8x32xf32>
    %c0_68 = arith.constant 0 : index
    %c0_69 = arith.constant 0 : index
    %165 = vector.load %arg4[%c0_68, %c0_69] : memref<2x8xf32, #tpu.memory_space<vmem>>, vector<2x8xf32>
    %166 = vector.shape_cast %165 : vector<2x8xf32> to vector<2x1x8xf32>
    %167 = arith.truncf %152 : vector<2x8x32xf32> to vector<2x8x32xbf16>
    %168 = arith.truncf %162 : vector<2x8x32xf32> to vector<2x8x32xbf16>
    %169 = arith.truncf %164 : vector<2x8x32xf32> to vector<2x8x32xbf16>
    %170 = vector.extract_strided_slice %167 {offsets = [0, 0, 0], sizes = [2, 8, 8], strides = [1, 1, 1]} : vector<2x8x32xbf16> to vector<2x8x8xbf16>
    %171 = vector.extract_strided_slice %168 {offsets = [0, 0, 0], sizes = [2, 8, 8], strides = [1, 1, 1]} : vector<2x8x32xbf16> to vector<2x8x8xbf16>
    %cst_70 = arith.constant dense<0.000000e+00> : vector<2x8x8xf32>
    %172 = tpu.matmul %170, %171, %cst_70 {dimension_numbers = #tpu.dot_dimension_numbers<[2], [2], [1], [1], [0, 0, 0, 1, 1, 1], [0], [0]>} : vector<2x8x8xbf16>, vector<2x8x8xbf16>, vector<2x8x8xf32> -> vector<2x8x8xf32>
    %cst_71 = arith.constant 0.353553385 : f32
    %173 = vector.broadcast %cst_71 : f32 to vector<2x8x8xf32>
    %174 = arith.mulf %172, %173 : vector<2x8x8xf32>
    %175 = vector.broadcast %166 : vector<2x1x8xf32> to vector<2x8x8xf32>
    %176 = arith.addf %174, %175 : vector<2x8x8xf32>
    %cst_72 = arith.constant dense<0xFF800000> : vector<2x8xf32>
    %177 = vector.multi_reduction <maximumf>, %176, %cst_72 [2] : vector<2x8x8xf32> to vector<2x8xf32>
    %178 = vector.shape_cast %177 : vector<2x8xf32> to vector<2x8x1xf32>
    %179 = vector.broadcast %178 : vector<2x8x1xf32> to vector<2x8x8xf32>
    %180 = arith.subf %176, %179 : vector<2x8x8xf32>
    %181 = math.exp %180 : vector<2x8x8xf32>
    %cst_73 = arith.constant dense<0.000000e+00> : vector<2x8xf32>
    %182 = vector.multi_reduction <add>, %181, %cst_73 [2] : vector<2x8x8xf32> to vector<2x8xf32>
    %183 = vector.shape_cast %182 : vector<2x8xf32> to vector<2x8x1xf32>
    %184 = tpu.reciprocal %183 {approx = true} : vector<2x8x1xf32> -> vector<2x8x1xf32>
    %185 = vector.broadcast %184 : vector<2x8x1xf32> to vector<2x8x8xf32>
    %186 = arith.mulf %181, %185 : vector<2x8x8xf32>
    %187 = arith.truncf %186 : vector<2x8x8xf32> to vector<2x8x8xbf16>
    %188 = vector.extract_strided_slice %169 {offsets = [0, 0, 0], sizes = [2, 8, 8], strides = [1, 1, 1]} : vector<2x8x32xbf16> to vector<2x8x8xbf16>
    %cst_74 = arith.constant dense<0.000000e+00> : vector<2x8x8xf32>
    %189 = tpu.matmul %187, %188, %cst_74 {dimension_numbers = #tpu.dot_dimension_numbers<[2], [1], [1], [2], [0, 0, 0, 1, 1, 2], [0], [0]>} : vector<2x8x8xbf16>, vector<2x8x8xbf16>, vector<2x8x8xf32> -> vector<2x8x8xf32>
    %190 = vector.extract_strided_slice %167 {offsets = [0, 0, 8], sizes = [2, 8, 8], strides = [1, 1, 1]} : vector<2x8x32xbf16> to vector<2x8x8xbf16>
    %191 = vector.extract_strided_slice %168 {offsets = [0, 0, 8], sizes = [2, 8, 8], strides = [1, 1, 1]} : vector<2x8x32xbf16> to vector<2x8x8xbf16>
    %cst_75 = arith.constant dense<0.000000e+00> : vector<2x8x8xf32>
    %192 = tpu.matmul %190, %191, %cst_75 {dimension_numbers = #tpu.dot_dimension_numbers<[2], [2], [1], [1], [0, 0, 0, 1, 1, 1], [0], [0]>} : vector<2x8x8xbf16>, vector<2x8x8xbf16>, vector<2x8x8xf32> -> vector<2x8x8xf32>
    %cst_76 = arith.constant 0.353553385 : f32
    %193 = vector.broadcast %cst_76 : f32 to vector<2x8x8xf32>
    %194 = arith.mulf %192, %193 : vector<2x8x8xf32>
    %195 = vector.broadcast %166 : vector<2x1x8xf32> to vector<2x8x8xf32>
    %196 = arith.addf %194, %195 : vector<2x8x8xf32>
    %cst_77 = arith.constant dense<0xFF800000> : vector<2x8xf32>
    %197 = vector.multi_reduction <maximumf>, %196, %cst_77 [2] : vector<2x8x8xf32> to vector<2x8xf32>
    %198 = vector.shape_cast %197 : vector<2x8xf32> to vector<2x8x1xf32>
    %199 = vector.broadcast %198 : vector<2x8x1xf32> to vector<2x8x8xf32>
    %200 = arith.subf %196, %199 : vector<2x8x8xf32>
    %201 = math.exp %200 : vector<2x8x8xf32>
    %cst_78 = arith.constant dense<0.000000e+00> : vector<2x8xf32>
    %202 = vector.multi_reduction <add>, %201, %cst_78 [2] : vector<2x8x8xf32> to vector<2x8xf32>
    %203 = vector.shape_cast %202 : vector<2x8xf32> to vector<2x8x1xf32>
    %204 = tpu.reciprocal %203 {approx = true} : vector<2x8x1xf32> -> vector<2x8x1xf32>
    %205 = vector.broadcast %204 : vector<2x8x1xf32> to vector<2x8x8xf32>
    %206 = arith.mulf %201, %205 : vector<2x8x8xf32>
    %207 = arith.truncf %206 : vector<2x8x8xf32> to vector<2x8x8xbf16>
    %208 = vector.extract_strided_slice %169 {offsets = [0, 0, 8], sizes = [2, 8, 8], strides = [1, 1, 1]} : vector<2x8x32xbf16> to vector<2x8x8xbf16>
    %cst_79 = arith.constant dense<0.000000e+00> : vector<2x8x8xf32>
    %209 = tpu.matmul %207, %208, %cst_79 {dimension_numbers = #tpu.dot_dimension_numbers<[2], [1], [1], [2], [0, 0, 0, 1, 1, 2], [0], [0]>} : vector<2x8x8xbf16>, vector<2x8x8xbf16>, vector<2x8x8xf32> -> vector<2x8x8xf32>
    %210 = vector.extract_strided_slice %167 {offsets = [0, 0, 16], sizes = [2, 8, 8], strides = [1, 1, 1]} : vector<2x8x32xbf16> to vector<2x8x8xbf16>
    %211 = vector.extract_strided_slice %168 {offsets = [0, 0, 16], sizes = [2, 8, 8], strides = [1, 1, 1]} : vector<2x8x32xbf16> to vector<2x8x8xbf16>
    %cst_80 = arith.constant dense<0.000000e+00> : vector<2x8x8xf32>
    %212 = tpu.matmul %210, %211, %cst_80 {dimension_numbers = #tpu.dot_dimension_numbers<[2], [2], [1], [1], [0, 0, 0, 1, 1, 1], [0], [0]>} : vector<2x8x8xbf16>, vector<2x8x8xbf16>, vector<2x8x8xf32> -> vector<2x8x8xf32>
    %cst_81 = arith.constant 0.353553385 : f32
    %213 = vector.broadcast %cst_81 : f32 to vector<2x8x8xf32>
    %214 = arith.mulf %212, %213 : vector<2x8x8xf32>
    %215 = vector.broadcast %166 : vector<2x1x8xf32> to vector<2x8x8xf32>
    %216 = arith.addf %214, %215 : vector<2x8x8xf32>
    %cst_82 = arith.constant dense<0xFF800000> : vector<2x8xf32>
    %217 = vector.multi_reduction <maximumf>, %216, %cst_82 [2] : vector<2x8x8xf32> to vector<2x8xf32>
    %218 = vector.shape_cast %217 : vector<2x8xf32> to vector<2x8x1xf32>
    %219 = vector.broadcast %218 : vector<2x8x1xf32> to vector<2x8x8xf32>
    %220 = arith.subf %216, %219 : vector<2x8x8xf32>
    %221 = math.exp %220 : vector<2x8x8xf32>
    %cst_83 = arith.constant dense<0.000000e+00> : vector<2x8xf32>
    %222 = vector.multi_reduction <add>, %221, %cst_83 [2] : vector<2x8x8xf32> to vector<2x8xf32>
    %223 = vector.shape_cast %222 : vector<2x8xf32> to vector<2x8x1xf32>
    %224 = tpu.reciprocal %223 {approx = true} : vector<2x8x1xf32> -> vector<2x8x1xf32>
    %225 = vector.broadcast %224 : vector<2x8x1xf32> to vector<2x8x8xf32>
    %226 = arith.mulf %221, %225 : vector<2x8x8xf32>
    %227 = arith.truncf %226 : vector<2x8x8xf32> to vector<2x8x8xbf16>
    %228 = vector.extract_strided_slice %169 {offsets = [0, 0, 16], sizes = [2, 8, 8], strides = [1, 1, 1]} : vector<2x8x32xbf16> to vector<2x8x8xbf16>
    %cst_84 = arith.constant dense<0.000000e+00> : vector<2x8x8xf32>
    %229 = tpu.matmul %227, %228, %cst_84 {dimension_numbers = #tpu.dot_dimension_numbers<[2], [1], [1], [2], [0, 0, 0, 1, 1, 2], [0], [0]>} : vector<2x8x8xbf16>, vector<2x8x8xbf16>, vector<2x8x8xf32> -> vector<2x8x8xf32>
    %230 = vector.extract_strided_slice %167 {offsets = [0, 0, 24], sizes = [2, 8, 8], strides = [1, 1, 1]} : vector<2x8x32xbf16> to vector<2x8x8xbf16>
    %231 = vector.extract_strided_slice %168 {offsets = [0, 0, 24], sizes = [2, 8, 8], strides = [1, 1, 1]} : vector<2x8x32xbf16> to vector<2x8x8xbf16>
    %cst_85 = arith.constant dense<0.000000e+00> : vector<2x8x8xf32>
    %232 = tpu.matmul %230, %231, %cst_85 {dimension_numbers = #tpu.dot_dimension_numbers<[2], [2], [1], [1], [0, 0, 0, 1, 1, 1], [0], [0]>} : vector<2x8x8xbf16>, vector<2x8x8xbf16>, vector<2x8x8xf32> -> vector<2x8x8xf32>
    %cst_86 = arith.constant 0.353553385 : f32
    %233 = vector.broadcast %cst_86 : f32 to vector<2x8x8xf32>
    %234 = arith.mulf %232, %233 : vector<2x8x8xf32>
    %235 = vector.broadcast %166 : vector<2x1x8xf32> to vector<2x8x8xf32>
    %236 = arith.addf %234, %235 : vector<2x8x8xf32>
    %cst_87 = arith.constant dense<0xFF800000> : vector<2x8xf32>
    %237 = vector.multi_reduction <maximumf>, %236, %cst_87 [2] : vector<2x8x8xf32> to vector<2x8xf32>
    %238 = vector.shape_cast %237 : vector<2x8xf32> to vector<2x8x1xf32>
    %239 = vector.broadcast %238 : vector<2x8x1xf32> to vector<2x8x8xf32>
    %240 = arith.subf %236, %239 : vector<2x8x8xf32>
    %241 = math.exp %240 : vector<2x8x8xf32>
    %cst_88 = arith.constant dense<0.000000e+00> : vector<2x8xf32>
    %242 = vector.multi_reduction <add>, %241, %cst_88 [2] : vector<2x8x8xf32> to vector<2x8xf32>
    %243 = vector.shape_cast %242 : vector<2x8xf32> to vector<2x8x1xf32>
    %244 = tpu.reciprocal %243 {approx = true} : vector<2x8x1xf32> -> vector<2x8x1xf32>
    %245 = vector.broadcast %244 : vector<2x8x1xf32> to vector<2x8x8xf32>
    %246 = arith.mulf %241, %245 : vector<2x8x8xf32>
    %247 = arith.truncf %246 : vector<2x8x8xf32> to vector<2x8x8xbf16>
    %248 = vector.extract_strided_slice %169 {offsets = [0, 0, 24], sizes = [2, 8, 8], strides = [1, 1, 1]} : vector<2x8x32xbf16> to vector<2x8x8xbf16>
    %cst_89 = arith.constant dense<0.000000e+00> : vector<2x8x8xf32>
    %249 = tpu.matmul %247, %248, %cst_89 {dimension_numbers = #tpu.dot_dimension_numbers<[2], [1], [1], [2], [0, 0, 0, 1, 1, 2], [0], [0]>} : vector<2x8x8xbf16>, vector<2x8x8xbf16>, vector<2x8x8xf32> -> vector<2x8x8xf32>
    %250 = tpu.concatenate %189, %209, %229, %249 in 2 : vector<2x8x8xf32>, vector<2x8x8xf32>, vector<2x8x8xf32>, vector<2x8x8xf32> -> vector<2x8x32xf32>
    %251 = vector.shape_cast %250 : vector<2x8x32xf32> to vector<16x32xf32>
    %c0_90 = arith.constant 0 : index
    %c0_91 = arith.constant 0 : index
    %c0_92 = arith.constant 0 : index
    %252 = vector.load %arg16[%c0_90, %c0_91, %c0_92] : memref<1x32x32xbf16, #tpu.memory_space<vmem>>, vector<1x32x32xbf16>
    %253 = vector.shape_cast %252 : vector<1x32x32xbf16> to vector<32x32xbf16>
    %c0_93 = arith.constant 0 : index
    %c0_94 = arith.constant 0 : index
    %c0_95 = arith.constant 0 : index
    %254 = vector.load %arg17[%c0_93, %c0_94, %c0_95] : memref<1x1x32xf32, #tpu.memory_space<vmem>>, vector<1x1x32xf32>
    %255 = vector.shape_cast %254 : vector<1x1x32xf32> to vector<1x32xf32>
    %256 = arith.truncf %251 : vector<16x32xf32> to vector<16x32xbf16>
    %cst_96 = arith.constant dense<0.000000e+00> : vector<16x32xf32>
    %257 = tpu.matmul %256, %253, %cst_96 {dimension_numbers = #tpu.dot_dimension_numbers<[1], [1], [0], [0], [0, 0, 1, 0], [], []>} : vector<16x32xbf16>, vector<32x32xbf16>, vector<16x32xf32> -> vector<16x32xf32>
    %258 = vector.broadcast %255 : vector<1x32xf32> to vector<16x32xf32>
    %259 = arith.addf %257, %258 : vector<16x32xf32>
    %260 = arith.addf %141, %259 : vector<16x32xf32>
    %c0_97 = arith.constant 0 : index
    %c0_98 = arith.constant 0 : index
    %c0_99 = arith.constant 0 : index
    %261 = vector.load %arg18[%c0_97, %c0_98, %c0_99] : memref<1x1x32xf32, #tpu.memory_space<vmem>>, vector<1x1x32xf32>
    %262 = vector.shape_cast %261 : vector<1x1x32xf32> to vector<1x32xf32>
    %c0_100 = arith.constant 0 : index
    %c0_101 = arith.constant 0 : index
    %c0_102 = arith.constant 0 : index
    %263 = vector.load %arg19[%c0_100, %c0_101, %c0_102] : memref<1x1x32xf32, #tpu.memory_space<vmem>>, vector<1x1x32xf32>
    %264 = vector.shape_cast %263 : vector<1x1x32xf32> to vector<1x32xf32>
    %cst_103 = arith.constant dense<0.000000e+00> : vector<16xf32>
    %265 = vector.multi_reduction <add>, %260, %cst_103 [1] : vector<16x32xf32> to vector<16xf32>
    %266 = vector.shape_cast %265 : vector<16xf32> to vector<16x1xf32>
    %cst_104 = arith.constant 3.200000e+01 : f32
    %267 = vector.broadcast %cst_104 : f32 to vector<16x1xf32>
    %268 = arith.divf %266, %267 : vector<16x1xf32>
    %269 = vector.broadcast %268 : vector<16x1xf32> to vector<16x32xf32>
    %270 = arith.subf %260, %269 : vector<16x32xf32>
    %271 = arith.mulf %270, %270 : vector<16x32xf32>
    %cst_105 = arith.constant dense<0.000000e+00> : vector<16xf32>
    %272 = vector.multi_reduction <add>, %271, %cst_105 [1] : vector<16x32xf32> to vector<16xf32>
    %273 = vector.shape_cast %272 : vector<16xf32> to vector<16x1xf32>
    %cst_106 = arith.constant 3.200000e+01 : f32
    %274 = vector.broadcast %cst_106 : f32 to vector<16x1xf32>
    %275 = arith.divf %273, %274 : vector<16x1xf32>
    %276 = vector.broadcast %268 : vector<16x1xf32> to vector<16x32xf32>
    %277 = arith.subf %260, %276 : vector<16x32xf32>
    %cst_107 = arith.constant 9.99999974E-6 : f32
    %278 = vector.broadcast %cst_107 : f32 to vector<16x1xf32>
    %279 = arith.addf %275, %278 : vector<16x1xf32>
    %280 = math.rsqrt %279 : vector<16x1xf32>
    %281 = vector.broadcast %280 : vector<16x1xf32> to vector<16x32xf32>
    %282 = arith.mulf %277, %281 : vector<16x32xf32>
    %283 = vector.broadcast %262 : vector<1x32xf32> to vector<16x32xf32>
    %284 = arith.mulf %282, %283 : vector<16x32xf32>
    %285 = vector.broadcast %264 : vector<1x32xf32> to vector<16x32xf32>
    %286 = arith.addf %284, %285 : vector<16x32xf32>
    %c0_108 = arith.constant 0 : index
    %c0_109 = arith.constant 0 : index
    %c0_110 = arith.constant 0 : index
    %287 = vector.load %arg20[%c0_108, %c0_109, %c0_110] : memref<1x64x32xbf16, #tpu.memory_space<vmem>>, vector<1x64x32xbf16>
    %288 = vector.shape_cast %287 : vector<1x64x32xbf16> to vector<64x32xbf16>
    %c0_111 = arith.constant 0 : index
    %c0_112 = arith.constant 0 : index
    %c0_113 = arith.constant 0 : index
    %289 = vector.load %arg21[%c0_111, %c0_112, %c0_113] : memref<1x1x64xf32, #tpu.memory_space<vmem>>, vector<1x1x64xf32>
    %290 = vector.shape_cast %289 : vector<1x1x64xf32> to vector<1x64xf32>
    %291 = arith.truncf %286 : vector<16x32xf32> to vector<16x32xbf16>
    %cst_114 = arith.constant dense<0.000000e+00> : vector<16x64xf32>
    %292 = tpu.matmul %291, %288, %cst_114 {dimension_numbers = #tpu.dot_dimension_numbers<[1], [1], [0], [0], [0, 0, 1, 0], [], []>} : vector<16x32xbf16>, vector<64x32xbf16>, vector<16x64xf32> -> vector<16x64xf32>
    %293 = vector.broadcast %290 : vector<1x64xf32> to vector<16x64xf32>
    %294 = arith.addf %292, %293 : vector<16x64xf32>
    %cst_115 = arith.constant 0.000000e+00 : f32
    %295 = vector.broadcast %cst_115 : f32 to vector<16x64xf32>
    %296 = arith.maximumf %294, %295 : vector<16x64xf32>
    %c0_116 = arith.constant 0 : index
    %c0_117 = arith.constant 0 : index
    %c0_118 = arith.constant 0 : index
    %297 = vector.load %arg22[%c0_116, %c0_117, %c0_118] : memref<1x32x64xbf16, #tpu.memory_space<vmem>>, vector<1x32x64xbf16>
    %298 = vector.shape_cast %297 : vector<1x32x64xbf16> to vector<32x64xbf16>
    %c0_119 = arith.constant 0 : index
    %c0_120 = arith.constant 0 : index
    %c0_121 = arith.constant 0 : index
    %299 = vector.load %arg23[%c0_119, %c0_120, %c0_121] : memref<1x1x32xf32, #tpu.memory_space<vmem>>, vector<1x1x32xf32>
    %300 = vector.shape_cast %299 : vector<1x1x32xf32> to vector<1x32xf32>
    %301 = arith.truncf %296 : vector<16x64xf32> to vector<16x64xbf16>
    %cst_122 = arith.constant dense<0.000000e+00> : vector<16x32xf32>
    %302 = tpu.matmul %301, %298, %cst_122 {dimension_numbers = #tpu.dot_dimension_numbers<[1], [1], [0], [0], [0, 0, 1, 0], [], []>} : vector<16x64xbf16>, vector<32x64xbf16>, vector<16x32xf32> -> vector<16x32xf32>
    %303 = vector.broadcast %300 : vector<1x32xf32> to vector<16x32xf32>
    %304 = arith.addf %302, %303 : vector<16x32xf32>
    %305 = arith.addf %304, %286 : vector<16x32xf32>
    %c0_123 = arith.constant 0 : index
    %c0_124 = arith.constant 0 : index
    %c0_125 = arith.constant 0 : index
    %306 = vector.load %arg24[%c0_123, %c0_124, %c0_125] : memref<1x1x32xf32, #tpu.memory_space<vmem>>, vector<1x1x32xf32>
    %307 = vector.shape_cast %306 : vector<1x1x32xf32> to vector<1x32xf32>
    %c0_126 = arith.constant 0 : index
    %c0_127 = arith.constant 0 : index
    %c0_128 = arith.constant 0 : index
    %308 = vector.load %arg25[%c0_126, %c0_127, %c0_128] : memref<1x1x32xf32, #tpu.memory_space<vmem>>, vector<1x1x32xf32>
    %309 = vector.shape_cast %308 : vector<1x1x32xf32> to vector<1x32xf32>
    %cst_129 = arith.constant dense<0.000000e+00> : vector<16xf32>
    %310 = vector.multi_reduction <add>, %305, %cst_129 [1] : vector<16x32xf32> to vector<16xf32>
    %311 = vector.shape_cast %310 : vector<16xf32> to vector<16x1xf32>
    %cst_130 = arith.constant 3.200000e+01 : f32
    %312 = vector.broadcast %cst_130 : f32 to vector<16x1xf32>
    %313 = arith.divf %311, %312 : vector<16x1xf32>
    %314 = vector.broadcast %313 : vector<16x1xf32> to vector<16x32xf32>
    %315 = arith.subf %305, %314 : vector<16x32xf32>
    %316 = arith.mulf %315, %315 : vector<16x32xf32>
    %cst_131 = arith.constant dense<0.000000e+00> : vector<16xf32>
    %317 = vector.multi_reduction <add>, %316, %cst_131 [1] : vector<16x32xf32> to vector<16xf32>
    %318 = vector.shape_cast %317 : vector<16xf32> to vector<16x1xf32>
    %cst_132 = arith.constant 3.200000e+01 : f32
    %319 = vector.broadcast %cst_132 : f32 to vector<16x1xf32>
    %320 = arith.divf %318, %319 : vector<16x1xf32>
    %321 = vector.broadcast %313 : vector<16x1xf32> to vector<16x32xf32>
    %322 = arith.subf %305, %321 : vector<16x32xf32>
    %cst_133 = arith.constant 9.99999974E-6 : f32
    %323 = vector.broadcast %cst_133 : f32 to vector<16x1xf32>
    %324 = arith.addf %320, %323 : vector<16x1xf32>
    %325 = math.rsqrt %324 : vector<16x1xf32>
    %326 = vector.broadcast %325 : vector<16x1xf32> to vector<16x32xf32>
    %327 = arith.mulf %322, %326 : vector<16x32xf32>
    %328 = vector.broadcast %307 : vector<1x32xf32> to vector<16x32xf32>
    %329 = arith.mulf %327, %328 : vector<16x32xf32>
    %330 = vector.broadcast %309 : vector<1x32xf32> to vector<16x32xf32>
    %331 = arith.addf %329, %330 : vector<16x32xf32>
    %332 = vector.shape_cast %331 : vector<16x32xf32> to vector<2x8x32xf32>
    %c0_134 = arith.constant 0 : index
    %c0_135 = arith.constant 0 : index
    %c0_136 = arith.constant 0 : index
    %333 = vector.load %arg29[%c0_134, %c0_135, %c0_136] : memref<2x8x32xf32, #tpu.memory_space<vmem>>, vector<2x8x32xf32>
    tpu.vector_store %arg29[%c0_134, %c0_135, %c0_136], %332 {strides = array<i32>} : memref<2x8x32xf32, #tpu.memory_space<vmem>>, vector<2x8x32xf32>,
    %c1_i32 = arith.constant 1 : i32
    %334 = arith.cmpi eq, %arg0, %c1_i32 : i32
    %335 = arith.extui %334 : i1 to i32
    %c0_i32_137 = arith.constant 0 : i32
    %336 = arith.cmpi ne, %335, %c0_i32_137 : i32
    scf.if %336 {
      %c0_138 = arith.constant 0 : index
      %c0_139 = arith.constant 0 : index
      %337 = vector.load %arg26[%c0_138, %c0_139] : memref<128x32xbf16, #tpu.memory_space<vmem>>, vector<128x32xbf16>
      %c0_140 = arith.constant 0 : index
      %c0_141 = arith.constant 0 : index
      %338 = vector.load %arg27[%c0_140, %c0_141] : memref<1x128xf32, #tpu.memory_space<vmem>>, vector<1x128xf32>
      %339 = arith.truncf %331 : vector<16x32xf32> to vector<16x32xbf16>
      %cst_142 = arith.constant dense<0.000000e+00> : vector<16x128xf32>
      %340 = tpu.matmul %339, %337, %cst_142 {dimension_numbers = #tpu.dot_dimension_numbers<[1], [1], [0], [0], [0, 0, 1, 0], [], []>} : vector<16x32xbf16>, vector<128x32xbf16>, vector<16x128xf32> -> vector<16x128xf32>
      %341 = vector.broadcast %338 : vector<1x128xf32> to vector<16x128xf32>
      %342 = arith.addf %340, %341 : vector<16x128xf32>
      %cst_143 = arith.constant dense<0xFF800000> : vector<16xf32>
      %343 = vector.multi_reduction <maximumf>, %342, %cst_143 [1] : vector<16x128xf32> to vector<16xf32>
      %344 = vector.shape_cast %343 : vector<16xf32> to vector<16x1xf32>
      %345 = vector.broadcast %344 : vector<16x1xf32> to vector<16x128xf32>
      %346 = arith.subf %342, %345 : vector<16x128xf32>
      %347 = math.exp %346 : vector<16x128xf32>
      %cst_144 = arith.constant dense<0.000000e+00> : vector<16xf32>
      %348 = vector.multi_reduction <add>, %347, %cst_144 [1] : vector<16x128xf32> to vector<16xf32>
      %349 = vector.shape_cast %348 : vector<16xf32> to vector<16x1xf32>
      %350 = vector.broadcast %349 : vector<16x1xf32> to vector<16x128xf32>
      %351 = arith.divf %347, %350 : vector<16x128xf32>
      %352 = vector.shape_cast %351 : vector<16x128xf32> to vector<2x8x128xf32>
      %c0_145 = arith.constant 0 : index
      %c0_146 = arith.constant 0 : index
      %c0_147 = arith.constant 0 : index
      %353 = vector.load %arg28[%c0_145, %c0_146, %c0_147] : memref<2x8x128xf32, #tpu.memory_space<vmem>>, vector<2x8x128xf32>
      tpu.vector_store %arg28[%c0_145, %c0_146, %c0_147], %352 {strides = array<i32>} : memref<2x8x128xf32, #tpu.memory_space<vmem>>, vector<2x8x128xf32>,
    } else {
    }
    return
  }
  func.func @transform_0(%arg0: i32) -> (i32, i32, i32) {
    %c0_i32 = arith.constant 0 : i32
    %c0_i32_0 = arith.constant 0 : i32
    %c0_i32_1 = arith.constant 0 : i32
    %c0_i32_2 = arith.constant 0 : i32
    return %c0_i32, %c0_i32_0, %c0_i32_1 : i32, i32, i32
  }
  func.func @transform_1(%arg0: i32) -> (i32, i32, i32) {
    %c0_i32 = arith.constant 0 : i32
    %c0_i32_0 = arith.constant 0 : i32
    %c0_i32_1 = arith.constant 0 : i32
    %c0_i32_2 = arith.constant 0 : i32
    return %c0_i32, %c0_i32_0, %c0_i32_1 : i32, i32, i32
  }
  func.func @transform_2(%arg0: i32) -> (i32, i32) {
    %c0_i32 = arith.constant 0 : i32
    %c0_i32_0 = arith.constant 0 : i32
    %c0_i32_1 = arith.constant 0 : i32
    return %c0_i32, %c0_i32_0 : i32, i32
  }
  func.func @transform_3(%arg0: i32) -> (i32, i32) {
    %c0_i32 = arith.constant 0 : i32
    %c0_i32_0 = arith.constant 0 : i32
    %c0_i32_1 = arith.constant 0 : i32
    return %c0_i32, %c0_i32_0 : i32, i32
  }
  func.func @transform_4(%arg0: i32) -> (i32, i32) {
    %c0_i32 = arith.constant 0 : i32
    %c0_i32_0 = arith.constant 0 : i32
    %c0_i32_1 = arith.constant 0 : i32
    return %c0_i32, %c0_i32_0 : i32, i32
  }
  func.func @transform_5(%arg0: i32) -> (i32, i32, i32) {
    %c0_i32 = arith.constant 0 : i32
    %c0_i32_0 = arith.constant 0 : i32
    %c0_i32_1 = arith.constant 0 : i32
    return %arg0, %c0_i32, %c0_i32_0 : i32, i32, i32
  }
  func.func @transform_6(%arg0: i32) -> (i32, i32, i32) {
    %c0_i32 = arith.constant 0 : i32
    %c0_i32_0 = arith.constant 0 : i32
    %c0_i32_1 = arith.constant 0 : i32
    return %arg0, %c0_i32, %c0_i32_0 : i32, i32, i32
  }
  func.func @transform_7(%arg0: i32) -> (i32, i32, i32) {
    %c0_i32 = arith.constant 0 : i32
    %c0_i32_0 = arith.constant 0 : i32
    %c0_i32_1 = arith.constant 0 : i32
    return %arg0, %c0_i32, %c0_i32_0 : i32, i32, i32
  }
  func.func @transform_8(%arg0: i32) -> (i32, i32, i32) {
    %c0_i32 = arith.constant 0 : i32
    %c0_i32_0 = arith.constant 0 : i32
    %c0_i32_1 = arith.constant 0 : i32
    return %arg0, %c0_i32, %c0_i32_0 : i32, i32, i32
  }
  func.func @transform_9(%arg0: i32) -> (i32, i32, i32) {
    %c0_i32 = arith.constant 0 : i32
    %c0_i32_0 = arith.constant 0 : i32
    %c0_i32_1 = arith.constant 0 : i32
    return %arg0, %c0_i32, %c0_i32_0 : i32, i32, i32
  }
  func.func @transform_10(%arg0: i32) -> (i32, i32, i32) {
    %c0_i32 = arith.constant 0 : i32
    %c0_i32_0 = arith.constant 0 : i32
    %c0_i32_1 = arith.constant 0 : i32
    return %arg0, %c0_i32, %c0_i32_0 : i32, i32, i32
  }
  func.func @transform_11(%arg0: i32) -> (i32, i32, i32) {
    %c0_i32 = arith.constant 0 : i32
    %c0_i32_0 = arith.constant 0 : i32
    %c0_i32_1 = arith.constant 0 : i32
    return %arg0, %c0_i32, %c0_i32_0 : i32, i32, i32
  }
  func.func @transform_12(%arg0: i32) -> (i32, i32, i32) {
    %c0_i32 = arith.constant 0 : i32
    %c0_i32_0 = arith.constant 0 : i32
    %c0_i32_1 = arith.constant 0 : i32
    return %arg0, %c0_i32, %c0_i32_0 : i32, i32, i32
  }
  func.func @transform_13(%arg0: i32) -> (i32, i32, i32) {
    %c0_i32 = arith.constant 0 : i32
    %c0_i32_0 = arith.constant 0 : i32
    %c0_i32_1 = arith.constant 0 : i32
    return %arg0, %c0_i32, %c0_i32_0 : i32, i32, i32
  }
  func.func @transform_14(%arg0: i32) -> (i32, i32, i32) {
    %c0_i32 = arith.constant 0 : i32
    %c0_i32_0 = arith.constant 0 : i32
    %c0_i32_1 = arith.constant 0 : i32
    return %arg0, %c0_i32, %c0_i32_0 : i32, i32, i32
  }
  func.func @transform_15(%arg0: i32) -> (i32, i32, i32) {
    %c0_i32 = arith.constant 0 : i32
    %c0_i32_0 = arith.constant 0 : i32
    %c0_i32_1 = arith.constant 0 : i32
    return %arg0, %c0_i32, %c0_i32_0 : i32, i32, i32
  }
  func.func @transform_16(%arg0: i32) -> (i32, i32, i32) {
    %c0_i32 = arith.constant 0 : i32
    %c0_i32_0 = arith.constant 0 : i32
    %c0_i32_1 = arith.constant 0 : i32
    return %arg0, %c0_i32, %c0_i32_0 : i32, i32, i32
  }
  func.func @transform_17(%arg0: i32) -> (i32, i32, i32) {
    %c0_i32 = arith.constant 0 : i32
    %c0_i32_0 = arith.constant 0 : i32
    %c0_i32_1 = arith.constant 0 : i32
    return %arg0, %c0_i32, %c0_i32_0 : i32, i32, i32
  }
  func.func @transform_18(%arg0: i32) -> (i32, i32, i32) {
    %c0_i32 = arith.constant 0 : i32
    %c0_i32_0 = arith.constant 0 : i32
    %c0_i32_1 = arith.constant 0 : i32
    return %arg0, %c0_i32, %c0_i32_0 : i32, i32, i32
  }
  func.func @transform_19(%arg0: i32) -> (i32, i32, i32) {
    %c0_i32 = arith.constant 0 : i32
    %c0_i32_0 = arith.constant 0 : i32
    %c0_i32_1 = arith.constant 0 : i32
    return %arg0, %c0_i32, %c0_i32_0 : i32, i32, i32
  }
  func.func @transform_20(%arg0: i32) -> (i32, i32, i32) {
    %c0_i32 = arith.constant 0 : i32
    %c0_i32_0 = arith.constant 0 : i32
    %c0_i32_1 = arith.constant 0 : i32
    return %arg0, %c0_i32, %c0_i32_0 : i32, i32, i32
  }
  func.func @transform_21(%arg0: i32) -> (i32, i32, i32) {
    %c0_i32 = arith.constant 0 : i32
    %c0_i32_0 = arith.constant 0 : i32
    %c0_i32_1 = arith.constant 0 : i32
    return %arg0, %c0_i32, %c0_i32_0 : i32, i32, i32
  }
  func.func @transform_22(%arg0: i32) -> (i32, i32, i32) {
    %c0_i32 = arith.constant 0 : i32
    %c0_i32_0 = arith.constant 0 : i32
    %c0_i32_1 = arith.constant 0 : i32
    return %arg0, %c0_i32, %c0_i32_0 : i32, i32, i32
  }
  func.func @transform_23(%arg0: i32) -> (i32, i32, i32) {
    %c0_i32 = arith.constant 0 : i32
    %c0_i32_0 = arith.constant 0 : i32
    %c0_i32_1 = arith.constant 0 : i32
    return %arg0, %c0_i32, %c0_i32_0 : i32, i32, i32
  }
  func.func @transform_24(%arg0: i32) -> (i32, i32, i32) {
    %c0_i32 = arith.constant 0 : i32
    %c0_i32_0 = arith.constant 0 : i32
    %c0_i32_1 = arith.constant 0 : i32
    return %arg0, %c0_i32, %c0_i32_0 : i32, i32, i32
  }
  func.func @transform_25(%arg0: i32) -> (i32, i32) {
    %c0_i32 = arith.constant 0 : i32
    %c0_i32_0 = arith.constant 0 : i32
    %c0_i32_1 = arith.constant 0 : i32
    return %c0_i32, %c0_i32_0 : i32, i32
  }
  func.func @transform_26(%arg0: i32) -> (i32, i32) {
    %c0_i32 = arith.constant 0 : i32
    %c0_i32_0 = arith.constant 0 : i32
    %c0_i32_1 = arith.constant 0 : i32
    return %c0_i32, %c0_i32_0 : i32, i32
  }
  func.func @transform_27(%arg0: i32) -> (i32, i32, i32) {
    %c0_i32 = arith.constant 0 : i32
    %c0_i32_0 = arith.constant 0 : i32
    %c0_i32_1 = arith.constant 0 : i32
    %c0_i32_2 = arith.constant 0 : i32
    return %c0_i32, %c0_i32_0, %c0_i32_1 : i32, i32, i32
  }
}

</mosaic_0001>

<bundles_post_ra>
// kernel: transformer_forward.2
= control target key start
LH: loop header
LB: loop body
LE: loop exit
PB: predicated region body
PF: predicated region fallthrough
CT: control target
= control target key end

     0   :  { %s2638_s29 = smov 0   ;;  %s2994_s0 = inlined_call_operand.vmem [shape: f32[2,8,32], index: 0, kind: input, shape index: {}]   ;;  %s2995_s1 = inlined_call_operand.vmem [shape: f32[2,8], index: 1, kind: input, shape index: {}]   ;;  %s2996_s2 = inlined_call_operand.vmem [shape: bf16[2,96,32], index: 2, kind: input, shape index: {}]   ;;  %s2997_s3 = inlined_call_operand.vmem [shape: f32[2,1,96], index: 3, kind: input, shape index: {}]   ;;  %s2998_s4 = inlined_call_operand.vmem [shape: bf16[2,32,32], index: 4, kind: input, shape index: {}]   ;;  %s2999_s5 = inlined_call_operand.vmem [shape: f32[2,1,32], index: 5, kind: input, shape index: {}]   ;;  %s3000_s6 = inlined_call_operand.vmem [shape: f32[2,1,32], index: 6, kind: input, shape index: {}]   ;;  %s3001_s7 = inlined_call_operand.vmem [shape: f32[2,1,32], index: 7, kind: input, shape index: {}]   ;;  %s3002_s8 = inlined_call_operand.vmem [shape: bf16[2,64,32], index: 8, kind: input, shape index: {}]   ;;  %s3003_s9 = inlined_call_operand.vmem [shape: f32[2,1,64], index: 9, kind: input, shape index: {}]   ;;  %s3004_s10 = inlined_call_operand.vmem [shape: bf16[2,32,64], index: 10, kind: input, shape index: {}]   ;;  %s3005_s11 = inlined_call_operand.vmem [shape: f32[2,1,32], index: 11, kind: input, shape index: {}]   ;;  %s3006_s12 = inlined_call_operand.vmem [shape: f32[2,1,32], index: 12, kind: input, shape index: {}]   ;;  %s3007_s13 = inlined_call_operand.vmem [shape: f32[2,1,32], index: 13, kind: input, shape index: {}]   ;;  %s3008_s14 = inlined_call_operand.vmem [shape: f32[2,8,32], index: 14, kind: output, shape index: {}]  }
   0x1   :  { %3011 = sst [smem:[#allocation4_spill]] %s2995_s1 }
   0x2   :  { %3012 = sst [smem:[#allocation5_spill]] %s2996_s2 }
   0x3   :  { %3013 = sst [smem:[#allocation6_spill]] %s2997_s3 }
   0x4   :  { %3014 = sst [smem:[#allocation7_spill]] %s2998_s4 }
   0x5   :  { %3015 = sst [smem:[#allocation8_spill]] %s3008_s14 }
   0x6 LB: > { %3016 = sst [smem:[#allocation3_spill]] %s2544_s29  ;;  %s2644_s30 = sadd.s32 4294967295, %s2544_s29   ;;  %s2544_s29 = sphi %s2638_s29, %s24_s29  }
   0x7   : > { %p2195_p0 = scmp.ge.s32.totalorder %s2544_s29, 1  ;;  %p501_p1 = scmp.lt.s32.totalorder %s2544_s29, 3 }
   0x9   : > { %p502_p2 = pnand %p2195_p0, %p501_p1 }
   0xa   : > { %p581_p3 = scmp.lt.s32.totalorder (!%p502_p2), %s2644_s30, 1  ;;  %s3018_s2 = sld [smem:[#allocation5_spill]] (!%p502_p2) }
   0xb   : > { %505 = sbr.rel (%p502_p2) target bundleno = 4210 (0x1072), region = 76  ;;  %s3019_s4 = sld [smem:[#allocation7_spill]] (!%p502_p2) }
   0xc   : > { %p2203_p4 = scmp.ne.s32.totalorder (!%p502_p2), %s2644_s30, 0 }
  0x12   : > { %s2650_s15 = scalar_select %p581_p3, %s2644_s30, 1 }
  0x13   : > { %629 = sbr.rel (%p2203_p4) target bundleno = 26 (0x1a), region = 80  ;;  %v630_v0 = vld [vmem:[%s2994_s0] sm:$0xff] (!%p2203_p4)  ;;  %vm632_vm0 = vcmask (!%p2203_p4), 261120   ;;  %v631_v1 = vld [vmem:[%s2994_s0 + $0x8] sm:$0xff] (!%p2203_p4) }
  0x14   : > { %s2443_s16 = smul.u32 48, %s2650_s15  ;;  %s2250_s20 = sshll.u32 %s2650_s15, 4  ;;  %633 = vst.msk [vmem:[#allocation2] sm:$0xff] (!%p2203_p4), %vm632_vm0, %v630_v0  ;;  %634 = vst.msk [vmem:[#allocation2 + $0x8] sm:$0xff] (!%p2203_p4), %vm632_vm0, %v631_v1 }
  0x15   : > { %s2670_s29 = scalar_lea.vmem %s3019_s4, %s2250_s20  ;;  %s2251_s21 = sshll.u32 %s2650_s15, 5 }
  0x16   : > { %s2665_s26 = scalar_lea.vmem %s3018_s2, %s2443_s16  ;;  %s2688_s2 = scalar_lea.vmem %s3002_s8, %s2251_s21 }
  0x17   : > { %s2693_s4 = scalar_lea.vmem %s3004_s10, %s2250_s20  ;;  %s618_s19 = scalar_lea.vmem %s3005_s11, %s2650_s15 }
  0x18   : > { %s621_s17 = scalar_lea.vmem %s3006_s12, %s2650_s15  ;;  %s624_s24 = scalar_lea.vmem %s3007_s13, %s2650_s15 }
  0x1a PF: > { %v2484_v2 = vld [vmem:[%s2665_s26] sm:$0xff]   ;;  %v2546_v3 = vmov 0.0   ;;  %vm687_vm1 = vcmask 261120   ;;  %v2485_v5 = vld [vmem:[%s2665_s26 + $0x8] sm:$0xff]   ;;  %vm2547_vm2 = vmmov 0   ;;  %v2486_v7 = vld [vmem:[%s2665_s26 + $0x10] sm:$0xff]   ;;  %v763_v33 = vlaneseq }
  0x1b   : > { %2303 = vmatprep.subr.bf16.mxu0 %v2546_v3  ;;  %2319 = vmatprep.subr.bf16.mxu1 %v2546_v3  ;;  %v692_v4 = vsel %vm687_vm1, %v2484_v2, 0  ;;  %v695_v6 = vsel %vm687_vm1, %v2485_v5, 0  ;;  %v698_v8 = vsel %vm687_vm1, %v2486_v7, 0  ;;  %v2487_v9 = vld [vmem:[%s2665_s26 + $0x18] sm:$0xff]   ;;  %v2488_v11 = vld [vmem:[%s2665_s26 + $0x20] sm:$0xff]   ;;  %v2489_v13 = vld [vmem:[%s2665_s26 + $0x28] sm:$0xff]  }
  0x1c   : > { %2304 = vmatpush3.bf16.xpose.msra.mxu0 %v692_v4  ;;  %2315 = vmatprep.mubr.msk.bf16.mxu0 %vm2547_vm2, %v2546_v3  ;;  %v701_v10 = vsel %vm687_vm1, %v2487_v9, 0  ;;  %v704_v12 = vsel %vm687_vm1, %v2488_v11, 0  ;;  %v707_v14 = vsel %vm687_vm1, %v2489_v13, 0  ;;  %v2737_v15 = vld [vmem:[#allocation2] sm:$0xff]  ;;  %v2739_v16 = vld [vmem:[#allocation2 + $0x8] sm:$0xff]  ;;  %s3020_s26 = sld [smem:[#allocation6_spill]] }
  0x1d   : > { %2305 = vmatprep.subr.bf16.mxu0 %v2546_v3  ;;  %2321 = vmatprep.mubr.msk.bf16.mxu1 %vm2547_vm2, %v2546_v3  ;;  %v650_v17 = vpack.c.bf16 %v2739_v16, %v2737_v15  ;;  %s2548_s1 = smov 96   ;;  %vm779_vm3 = vcmask 64512   ;;  %v2549_v31 = vmov 1966171168   ;;  %v764_v35 = vshrl.u32 %v763_v33, 7  ;;  %s3022_s23 = sld [smem:[#allocation4_spill]] }
  0x1e   : > { %v761_v32 = vunpack.c.l.s4 %v2549_v31  ;;  %s2550_s22 = smov 64   ;;  %vm918_vm4 = vcmask 1043456   ;;  %s2551_s21 = smov 88   ;;  %vm1708_vm5 = vcmask 130048   ;;  %vm1711_vm6 = vcmask 195584  }
  0x1f   : > { %v879_v39 = vsub.s32 0, %v764_v35  ;;  %s2552_s16 = smov 120   ;;  %s2553_s20 = smov 56   ;;  %vm1949_vm7 = vcmask 523264  }
  0x20   : > { %v762_v34 = vunpack.c.0.s8 %v761_v32  ;;  %s2554_s25 = smov 80   ;;  %s2555_s3 = smov 112  }
  0x21   : > { %s2556_s27 = smov 48   ;;  %s2560_s14 = smov 8  }
  0x22   : > { %s3021_s28 = scalar_lea.vmem %s3020_s26, %s2650_s15  ;;  %v765_v36 = vsub.s32 %v762_v34, %v764_v35  ;;  %s2557_s26 = smov 72  }
  0x23   : > { %v2204_v18 = vld [vmem:[%s3021_s28] ss:$0 sm:$0xff]  ;;  %s2558_s28 = smov 104   ;;  %s2561_s18 = smov 16  }
  0x24   : > { %2306 = vmatpush3.bf16.xpose.msra.mxu0 %v695_v6  ;;  %v2212_v37 = vld.sshfl [vmem:[%s3022_s23] sm:$0x11 pattern:$0x75316420]  ;;  %s2562_s23 = smov 24   ;;  %p2247_p5 = scmp.ne.s32.totalorder %s2644_s30, 1 }
  0x25   : > { %2307 = vmatprep.subr.bf16.mxu0 %v2546_v3  ;;  %v766_v38 = vrot.slane %v2212_v37, %v765_v36  ;;  %v759_v40 = vcombine.high %v2212_v37, %v2212_v37 }
  0x27   : > { %v2773_v41 = vrot.slane %v766_v38, %v879_v39  ;;  %v773_v48 = vrot.slane %v759_v40, %v765_v36 }
  0x29   : > { %v2777_v50 = vrot.slane %v773_v48, %v879_v39 }
  0x2c   : > { %2308 = vmatpush3.bf16.xpose.msra.mxu0 %v698_v8 }
  0x2d   : > { %2309 = vmatprep.subr.bf16.mxu0 %v2546_v3 }
  0x34   : > { %2310 = vmatpush3.bf16.xpose.msra.mxu0 %v701_v10 }
  0x35   : > { %2311 = vmatprep.subr.bf16.mxu0 %v2546_v3 }
  0x3c   : > { %2312 = vmatpush3.bf16.xpose.msra.mxu0 %v704_v12 }
  0x3d   : > { %2313 = vmatprep.subr.bf16.mxu0 %v2546_v3 }
  0x44   : > { %2314 = vmatpush3.bf16.xpose.msra.mxu0 %v707_v14 }
  0x45   : > { %2355 = vmatprep.subr.bf16.mxu0 %v2546_v3 }
  0x4b   : > { %2316 = vmatmul.mubr.msk.bf16.vlgmr.msra.gmra.mrb[0].mxu0 %vm687_vm1, %v650_v17 }
  0x4c   : > { %2357 = vmatprep.mubr.msk.bf16.mxu0 %vm2547_vm2, %v2546_v3 }
 0x11e   : > { %v743_v19 = vpop.f32.mrb[0].mxu0 }
 0x11f   : > { %v744_v20 = vadd.f32 %v2204_v18, %v743_v19  ;;  %v2317_v21 = vpop.f32.mrb[1].mxu0 }
 0x120   : > { %v746_v22 = vpop.f32.mrb[2].mxu0 }
 0x121   : > { %v2752_v23 = vpack.c.bf16 %v744_v20, %v744_v20  ;;  %v747_v24 = vadd.f32 %v2204_v18, %v746_v22  ;;  %v2318_v25 = vpop.f32.mrb[3].mxu0 }
 0x123   : > { %777 = vrot.lane.b32.xlu0 %v2752_v23, %s2548_s1  ;;  %v2755_v26 = vpack.c.bf16 %v747_v24, %v747_v24 }
 0x127   : > { %827 = vrot.lane.b32.xlu0 %v2755_v26, %s2548_s1  ;;  %s2559_s1 = smov 40  }
 0x195   : > { %v778_v27 = vpop.permute.xlu0 %777 }
 0x196   : > { %v784_v28 = vsel %vm779_vm3, %v778_v27, 0 }
 0x197   : > { %2320 = vmatpush3.bf16.xpose.msra.mxu1 %v784_v28 }
 0x198   : > { %2325 = vmatprep.subr.bf16.mxu1 %v2546_v3 }
 0x199   : > { %v828_v29 = vpop.permute.xlu0 %827 }
 0x19a   : > { %v833_v30 = vsel %vm779_vm3, %v828_v29, 0 }
 0x19e   : > { %2322 = vmatmul.mubr.msk.bf16.vlgmr.msra.gmra.mrb[0].mxu1 %vm779_vm3, %v2752_v23 }
 0x19f   : > { %2326 = vmatpush3.bf16.xpose.msra.mxu1 %v833_v30  ;;  %2327 = vmatprep.mubr.msk.bf16.mxu1 %vm2547_vm2, %v2546_v3 }
 0x1a0   : > { %2331 = vmatprep.subr.bf16.mxu1 %v2546_v3 }
 0x1a6   : > { %2328 = vmatmul.mubr.msk.bf16.vlgmr.msra.gmra.mrb[4].mxu1 %vm779_vm3, %v2755_v26 }
 0x1a7   : > { %2333 = vmatprep.mubr.msk.bf16.mxu1 %vm2547_vm2, %v2546_v3 }
 0x271   : > { %v820_v42 = vpop.f32.mrb[0].mxu1 }
 0x272   : > { %v875_v43 = vmul.f32 0.35355338, %v820_v42  ;;  %v2323_v44 = vpop.f32.mrb[1].mxu1 }
 0x273   : > { %v823_v45 = vpop.f32.mrb[2].mxu1 }
 0x274   : > { %v2324_v46 = vpop.f32.mrb[3].mxu1  ;;  %v887_v47 = vadd.f32 %v2773_v41, %v875_v43 }
 0x276   : > { %v889_v49 = vsel %vm779_vm3, %v887_v47, -inf }
 0x277   : > { %890 = vmax.xlane.f32.xlu1 %v889_v49 }
 0x279   : > { %v869_v51 = vpop.f32.mrb[4].mxu1 }
 0x27a   : > { %v876_v52 = vmul.f32 0.35355338, %v869_v51  ;;  %v2329_v53 = vpop.f32.mrb[5].mxu1 }
 0x27b   : > { %v872_v54 = vpop.f32.mrb[6].mxu1 }
 0x27c   : > { %v2330_v55 = vpop.f32.mrb[7].mxu1  ;;  %v888_v56 = vadd.f32 %v2777_v50, %v876_v52 }
 0x27e   : > { %v892_v57 = vsel %vm779_vm3, %v888_v56, -inf }
 0x27f   : > { %893 = vmax.xlane.f32.xlu1 %v892_v57 }
 0x290   : > { %913 = vrot.lane.b32.xlu1 %v2752_v23, %s2550_s22 }
 0x294   : > { %962 = vrot.lane.b32.xlu1 %v2755_v26, %s2550_s22 }
 0x304   : > { %v891_v58 = vpop.xlane.xlu1 %890 }
 0x305   : > { %v895_v59 = vsub.f32 %v887_v47, %v891_v58 }
 0x307   : > { %v897_v60 = vmul.f32 1.442695, %v895_v59 }
 0x309   : > { %2498 = vpow2.f32 %v897_v60 }
 0x30c   : > { %v894_v61 = vpop.xlane.xlu1 %893 }
 0x30d   : > { %v896_v62 = vsub.f32 %v888_v56, %v894_v61 }
 0x30f   : > { %v899_v63 = vmul.f32 1.442695, %v896_v62 }
 0x310   : > { %v914_v0 = vpop.permute.xlu1 %913 }
 0x311   : > { %2500 = vpow2.f32 %v899_v63  ;;  %v920_v1 = vsel %vm918_vm4, %v914_v0, 0 }
 0x312   : > { %2332 = vmatpush3.bf16.msra.mxu1 %v920_v1 }
 0x313   : > { %v2499_v2 = vpop.eup %2498  ;;  %2337 = vmatprep.subr.bf16.mxu1 %v2546_v3 }
 0x314   : > { %v901_v4 = vsel %vm779_vm3, %v2499_v2, 0.0  ;;  %v963_v8 = vpop.permute.xlu1 %962 }
 0x315   : > { %902 = vadd.xlane.f32.xlu0 %v901_v4  ;;  %v968_v13 = vsel %vm918_vm4, %v963_v8, 0 }
 0x31b   : > { %v2501_v5 = vpop.eup %2500 }
 0x31c   : > { %v904_v6 = vsel %vm779_vm3, %v2501_v5, 0.0 }
 0x31d   : > { %905 = vadd.xlane.f32.xlu1 %v904_v6 }
 0x32b   : > { %1062 = vrot.lane.b32.xlu0 %v2755_v26, %s2551_s21 }
 0x32e   : > { %1012 = vrot.lane.b32.xlu1 %v2752_v23, %s2551_s21  ;;  %s3023_s21 = scalar_lea.vmem %s2999_s5, %s2650_s15 }
 0x332   : > { %1010 = vrot.lane.b32.xlu1 %v2752_v23, %s2552_s16 }
 0x336   : > { %1060 = vrot.lane.b32.xlu1 %v2755_v26, %s2552_s16 }
 0x3a2   : > { %v903_v7 = vpop.xlane.xlu0 %902 }
 0x3a3   : > { %2502 = vrcp.f32 %v903_v7 }
 0x3a6   : > { %v1063_v21 = vpop.permute.xlu0 %1062 }
 0x3a7   : > { %v1068_v24 = vsel %vm779_vm3, %v1063_v21, 0 }
 0x3aa   : > { %v906_v9 = vpop.xlane.xlu1 %905 }
 0x3ab   : > { %2504 = vrcp.f32 %v906_v9 }
 0x3ad   : > { %v2503_v10 = vpop.eup %2502 }
 0x3ae   : > { %v909_v11 = vmul.f32 %v2503_v10, %v2499_v2  ;;  %v1013_v18 = vpop.permute.xlu1 %1012 }
 0x3af   : > { %v1018_v20 = vsel %vm779_vm3, %v1013_v18, 0 }
 0x3b0   : > { %v911_v12 = vpack.c.bf16 %v909_v11, %v909_v11 }
 0x3b2   : > { %2334 = vmatmul.mubr.msk.bf16.vlgmr.msra.gmra.mrb[8].mxu1 %vm779_vm3, %v911_v12  ;;  %v1011_v22 = vpop.permute.xlu1 %1010 }
 0x3b3   : > { %2338 = vmatpush3.bf16.msra.mxu1 %v968_v13  ;;  %2339 = vmatprep.mubr.msk.bf16.mxu1 %vm2547_vm2, %v2546_v3 }
 0x3b4   : > { %2343 = vmatprep.subr.bf16.mxu1 %v2546_v3 }
 0x3b5   : > { %v2505_v14 = vpop.eup %2504 }
 0x3b6   : > { %v910_v17 = vmul.f32 %v2505_v14, %v2501_v5  ;;  %v1061_v25 = vpop.permute.xlu1 %1060 }
 0x3b8   : > { %v912_v19 = vpack.c.bf16 %v910_v17, %v910_v17 }
 0x3ba   : > { %2340 = vmatmul.mubr.msk.bf16.vlgmr.msra.gmra.mrb[12].mxu1 %vm779_vm3, %v912_v19 }
 0x3bb   : > { %2345 = vmatprep.mubr.msk.bf16.mxu1 %vm2547_vm2, %v2546_v3 }
 0x3bc   : > { %2344 = vmatpush3.bf16.xpose.msra.mxu1 %v1018_v20 }
 0x3bd   : > { %2349 = vmatprep.subr.bf16.mxu1 %v2546_v3 }
 0x3c3   : > { %2346 = vmatmul.mubr.msk.bf16.vlgmr.msra.gmra.mrb[16].mxu1 %vm779_vm3, %v1011_v22 }
 0x3c4   : > { %2350 = vmatpush3.bf16.xpose.msra.mxu1 %v1068_v24  ;;  %2351 = vmatprep.mubr.msk.bf16.mxu1 %vm2547_vm2, %v2546_v3 }
 0x3c5   : > { %2361 = vmatprep.subr.bf16.mxu1 %v2546_v3 }
 0x3cb   : > { %2352 = vmatmul.mubr.msk.bf16.vlgmr.msra.gmra.mrb[20].mxu1 %vm779_vm3, %v1061_v25 }
 0x3cc   : > { %2363 = vmatprep.mubr.msk.bf16.mxu1 %vm2547_vm2, %v2546_v3 }
 0x485   : > { %v2809_v27 = vpop.f32.mrb[8].mxu1 }
 0x486   : > { %v2335_v28 = vpop.f32.mrb[9].mxu1 }
 0x487   : > { %v959_v29 = vpop.f32.mrb[10].mxu1 }
 0x488   : > { %v2336_v30 = vpop.f32.mrb[11].mxu1 }
 0x48d   : > { %v2811_v31 = vpop.f32.mrb[12].mxu1 }
 0x48e   : > { %v2341_v32 = vpop.f32.mrb[13].mxu1 }
 0x48f   : > { %v1007_v33 = vpop.f32.mrb[14].mxu1 }
 0x490   : > { %v2342_v34 = vpop.f32.mrb[15].mxu1 }
 0x496   : > { %v1054_v35 = vpop.f32.mrb[16].mxu1 }
 0x497   : > { %v1110_v36 = vmul.f32 0.35355338, %v1054_v35  ;;  %v2347_v37 = vpop.f32.mrb[17].mxu1 }
 0x498   : > { %v1057_v38 = vpop.f32.mrb[18].mxu1 }
 0x499   : > { %v2348_v39 = vpop.f32.mrb[19].mxu1  ;;  %v1112_v40 = vadd.f32 %v1110_v36, %v2773_v41 }
 0x49b   : > { %v1114_v42 = vsel %vm779_vm3, %v1112_v40, -inf }
 0x49c   : > { %1115 = vmax.xlane.f32.xlu1 %v1114_v42 }
 0x49e   : > { %v1104_v43 = vpop.f32.mrb[20].mxu1 }
 0x49f   : > { %v1111_v44 = vmul.f32 0.35355338, %v1104_v43  ;;  %v2353_v45 = vpop.f32.mrb[21].mxu1 }
 0x4a0   : > { %v1107_v46 = vpop.f32.mrb[22].mxu1 }
 0x4a1   : > { %v2354_v47 = vpop.f32.mrb[23].mxu1  ;;  %v1113_v48 = vadd.f32 %v1111_v44, %v2777_v50 }
 0x4a3   : > { %v1117_v49 = vsel %vm779_vm3, %v1113_v48, -inf }
 0x4a4   : > { %1118 = vmax.xlane.f32.xlu0 %v1117_v49 }
 0x4ad   : > { %1138 = vrot.lane.b32.xlu1 %v2752_v23, %s2553_s20 }
 0x4b1   : > { %1236 = vrot.lane.b32.xlu1 %v2752_v23, %s2554_s25 }
 0x4ba   : > { %1186 = vrot.lane.b32.xlu0 %v2755_v26, %s2553_s20  ;;  %s3024_s20 = scalar_lea.vmem %s3000_s6, %s2650_s15 }
 0x4be   : > { %1234 = vrot.lane.b32.xlu0 %v2752_v23, %s2555_s3 }
 0x529   : > { %v1116_v51 = vpop.xlane.xlu1 %1115 }
 0x52a   : > { %v1120_v52 = vsub.f32 %v1112_v40, %v1116_v51 }
 0x52c   : > { %v1122_v53 = vmul.f32 1.442695, %v1120_v52 }
 0x52d   : > { %v1139_v54 = vpop.permute.xlu1 %1138 }
 0x52e   : > { %2506 = vpow2.f32 %v1122_v53  ;;  %v1144_v55 = vsel %vm918_vm4, %v1139_v54, 0 }
 0x52f   : > { %2356 = vmatpush3.bf16.msra.mxu0 %v1144_v55 }
 0x530   : > { %2367 = vmatprep.subr.bf16.mxu0 %v2546_v3 }
 0x531   : > { %v1119_v56 = vpop.xlane.xlu0 %1118  ;;  %v1237_v1 = vpop.permute.xlu1 %1236 }
 0x532   : > { %v1121_v57 = vsub.f32 %v1113_v48, %v1119_v56  ;;  %v1242_v8 = vsel %vm779_vm3, %v1237_v1, 0 }
 0x534   : > { %v1124_v58 = vmul.f32 1.442695, %v1121_v57 }
 0x535   : > { %v1187_v59 = vpop.permute.xlu0 %1186 }
 0x536   : > { %2508 = vpow2.f32 %v1124_v58  ;;  %v1192_v60 = vsel %vm918_vm4, %v1187_v59, 0 }
 0x537   : > { %2362 = vmatpush3.bf16.msra.mxu1 %v1192_v60 }
 0x538   : > { %v2507_v61 = vpop.eup %2506  ;;  %2373 = vmatprep.subr.bf16.mxu1 %v2546_v3 }
 0x539   : > { %v1126_v62 = vsel %vm779_vm3, %v2507_v61, 0.0  ;;  %v1235_v13 = vpop.permute.xlu0 %1234 }
 0x53a   : > { %1127 = vadd.xlane.f32.xlu1 %v1126_v62 }
 0x540   : > { %v2509_v63 = vpop.eup %2508 }
 0x541   : > { %v1129_v0 = vsel %vm779_vm3, %v2509_v63, 0.0 }
 0x542   : > { %1130 = vadd.xlane.f32.xlu1 %v1129_v0 }
 0x553   : > { %1286 = vrot.lane.b32.xlu1 %v2755_v26, %s2554_s25 }
 0x557   : > { %1284 = vrot.lane.b32.xlu1 %v2755_v26, %s2555_s3 }
 0x5c7   : > { %v1128_v2 = vpop.xlane.xlu1 %1127 }
 0x5c8   : > { %2510 = vrcp.f32 %v1128_v2 }
 0x5cf   : > { %v1131_v4 = vpop.xlane.xlu1 %1130 }
 0x5d0   : > { %2512 = vrcp.f32 %v1131_v4 }
 0x5d2   : > { %v2511_v5 = vpop.eup %2510 }
 0x5d3   : > { %v1134_v6 = vmul.f32 %v2511_v5, %v2507_v61  ;;  %v1287_v11 = vpop.permute.xlu1 %1286 }
 0x5d4   : > { %v1292_v14 = vsel %vm779_vm3, %v1287_v11, 0 }
 0x5d5   : > { %v1136_v7 = vpack.c.bf16 %v1134_v6, %v1134_v6 }
 0x5d7   : > { %2358 = vmatmul.mubr.msk.bf16.vlgmr.msra.gmra.mrb[4].mxu0 %vm779_vm3, %v1136_v7  ;;  %v1285_v17 = vpop.permute.xlu1 %1284 }
 0x5d8   : > { %2368 = vmatpush3.bf16.xpose.msra.mxu0 %v1242_v8  ;;  %2369 = vmatprep.mubr.msk.bf16.mxu0 %vm2547_vm2, %v2546_v3 }
 0x5d9   : > { %2379 = vmatprep.subr.bf16.mxu0 %v2546_v3 }
 0x5da   : > { %v2513_v9 = vpop.eup %2512 }
 0x5db   : > { %v1135_v10 = vmul.f32 %v2513_v9, %v2509_v63 }
 0x5dd   : > { %v1137_v12 = vpack.c.bf16 %v1135_v10, %v1135_v10 }
 0x5df   : > { %2364 = vmatmul.mubr.msk.bf16.vlgmr.msra.gmra.mrb[24].mxu1 %vm779_vm3, %v1137_v12  ;;  %2370 = vmatmul.mubr.msk.bf16.vlgmr.msra.gmra.mrb[8].mxu0 %vm779_vm3, %v1235_v13 }
 0x5e0   : > { %2374 = vmatpush3.bf16.xpose.msra.mxu1 %v1292_v14  ;;  %2375 = vmatprep.mubr.msk.bf16.mxu1 %vm2547_vm2, %v2546_v3 }
 0x5e1   : > { %2385 = vmatprep.subr.bf16.mxu1 %v2546_v3  ;;  %2381 = vmatprep.mubr.msk.bf16.mxu0 %vm2547_vm2, %v2546_v3 }
 0x5e7   : > { %2376 = vmatmul.mubr.msk.bf16.vlgmr.msra.gmra.mrb[28].mxu1 %vm779_vm3, %v1285_v17 }
 0x5e8   : > { %2387 = vmatprep.mubr.msk.bf16.mxu1 %vm2547_vm2, %v2546_v3 }
 0x6aa   : > { %v2845_v18 = vpop.f32.mrb[4].mxu0 }
 0x6ab   : > { %v2359_v19 = vpop.f32.mrb[5].mxu0 }
 0x6ac   : > { %v1183_v20 = vpop.f32.mrb[6].mxu0 }
 0x6ad   : > { %v2360_v21 = vpop.f32.mrb[7].mxu0 }
 0x6b2   : > { %v2847_v22 = vpop.f32.mrb[24].mxu1  ;;  %v1278_v24 = vpop.f32.mrb[8].mxu0 }
 0x6b3   : > { %v2469_v25 = vpack.i.bf16 %v2847_v22, %v2845_v18  ;;  %v1334_v28 = vmul.f32 0.35355338, %v1278_v24  ;;  %v2365_v29 = vpop.f32.mrb[25].mxu1  ;;  %v2371_v30 = vpop.f32.mrb[9].mxu0 }
 0x6b4   : > { %v1231_v32 = vpop.f32.mrb[26].mxu1  ;;  %v1281_v33 = vpop.f32.mrb[10].mxu0 }
 0x6b5   : > { %v2366_v34 = vpop.f32.mrb[27].mxu1  ;;  %v2372_v35 = vpop.f32.mrb[11].mxu0  ;;  %v1336_v36 = vadd.f32 %v1334_v28, %v2773_v41 }
 0x6b7   : > { %v1338_v37 = vsel %vm779_vm3, %v1336_v36, -inf }
 0x6b8   : > { %1339 = vmax.xlane.f32.xlu0 %v1338_v37 }
 0x6ba   : > { %v1328_v38 = vpop.f32.mrb[28].mxu1 }
 0x6bb   : > { %v1335_v39 = vmul.f32 0.35355338, %v1328_v38  ;;  %v2377_v40 = vpop.f32.mrb[29].mxu1 }
 0x6bc   : > { %v1331_v42 = vpop.f32.mrb[30].mxu1 }
 0x6bd   : > { %v2378_v43 = vpop.f32.mrb[31].mxu1  ;;  %v1337_v44 = vadd.f32 %v1335_v39, %v2777_v50 }
 0x6bf   : > { %v1341_v45 = vsel %vm779_vm3, %v1337_v44, -inf }
 0x6c0   : > { %1342 = vmax.xlane.f32.xlu1 %v1341_v45 }
 0x6d1   : > { %1362 = vrot.lane.b32.xlu1 %v2752_v23, %s2556_s27 }
 0x6d5   : > { %1460 = vrot.lane.b32.xlu1 %v2752_v23, %s2557_s26 }
 0x6d9   : > { %1510 = vrot.lane.b32.xlu1 %v2755_v26, %s2557_s26 }
 0x6dd   : > { %1508 = vrot.lane.b32.xlu1 %v2755_v26, %s2558_s28 }
 0x745   : > { %v1340_v46 = vpop.xlane.xlu0 %1339 }
 0x746   : > { %v1344_v47 = vsub.f32 %v1336_v36, %v1340_v46 }
 0x748   : > { %v1346_v48 = vmul.f32 1.442695, %v1344_v47 }
 0x74a   : > { %2514 = vpow2.f32 %v1346_v48 }
 0x74d   : > { %v1343_v49 = vpop.xlane.xlu1 %1342 }
 0x74e   : > { %v1345_v51 = vsub.f32 %v1337_v44, %v1343_v49 }
 0x750   : > { %v1348_v52 = vmul.f32 1.442695, %v1345_v51 }
 0x751   : > { %v1363_v53 = vpop.permute.xlu1 %1362 }
 0x752   : > { %2516 = vpow2.f32 %v1348_v52  ;;  %v1368_v54 = vsel %vm918_vm4, %v1363_v53, 0 }
 0x753   : > { %2380 = vmatpush3.bf16.msra.mxu0 %v1368_v54 }
 0x754   : > { %v2515_v55 = vpop.eup %2514  ;;  %2391 = vmatprep.subr.bf16.mxu0 %v2546_v3 }
 0x755   : > { %v1350_v56 = vsel %vm779_vm3, %v2515_v55, 0.0  ;;  %v1461_v0 = vpop.permute.xlu1 %1460 }
 0x756   : > { %1351 = vadd.xlane.f32.xlu0 %v1350_v56  ;;  %v1466_v4 = vsel %vm779_vm3, %v1461_v0, 0 }
 0x759   : > { %v1511_v7 = vpop.permute.xlu1 %1510 }
 0x75a   : > { %v1516_v10 = vsel %vm779_vm3, %v1511_v7, 0 }
 0x75c   : > { %v2517_v57 = vpop.eup %2516 }
 0x75d   : > { %v1353_v58 = vsel %vm779_vm3, %v2517_v57, 0.0  ;;  %v1509_v11 = vpop.permute.xlu1 %1508 }
 0x75e   : > { %1354 = vadd.xlane.f32.xlu0 %v1353_v58 }
 0x774   : > { %1410 = vrot.lane.b32.xlu0 %v2755_v26, %s2556_s27  ;;  %s3025_s27 = scalar_lea.vmem %s3001_s7, %s2650_s15 }
 0x778   : > { %1458 = vrot.lane.b32.xlu0 %v2752_v23, %s2558_s28 }
 0x7e3   : > { %v1352_v59 = vpop.xlane.xlu0 %1351 }
 0x7e4   : > { %2518 = vrcp.f32 %v1352_v59 }
 0x7eb   : > { %v1355_v60 = vpop.xlane.xlu0 %1354 }
 0x7ec   : > { %2520 = vrcp.f32 %v1355_v60 }
 0x7ee   : > { %v2519_v61 = vpop.eup %2518 }
 0x7ef   : > { %v1358_v62 = vmul.f32 %v2519_v61, %v2515_v55  ;;  %v1411_v63 = vpop.permute.xlu0 %1410  ;;  %v2490_v61 = vld [vmem:[%s2670_s29] sm:$0xff]  }
 0x7f0   : > { %v1416_v1 = vsel %vm918_vm4, %v1411_v63, 0  ;;  %v2491_v63 = vld [vmem:[%s2670_s29 + $0x8] sm:$0xff]  }
 0x7f1   : > { %2386 = vmatpush3.bf16.msra.mxu1 %v1416_v1  ;;  %v1360_v2 = vpack.c.bf16 %v1358_v62, %v1358_v62  ;;  %v1740_v62 = vsel %vm687_vm1, %v2490_v61, 0  ;;  %v1743_v0 = vsel %vm687_vm1, %v2491_v63, 0 }
 0x7f2   : > { %2397 = vmatprep.subr.bf16.mxu1 %v2546_v3 }
 0x7f3   : > { %2382 = vmatmul.mubr.msk.bf16.vlgmr.msra.gmra.mrb[12].mxu0 %vm779_vm3, %v1360_v2  ;;  %v1459_v9 = vpop.permute.xlu0 %1458 }
 0x7f4   : > { %2392 = vmatpush3.bf16.xpose.msra.mxu0 %v1466_v4  ;;  %2393 = vmatprep.mubr.msk.bf16.mxu0 %vm2547_vm2, %v2546_v3 }
 0x7f5   : > { %2403 = vmatprep.subr.bf16.mxu0 %v2546_v3 }
 0x7f6   : > { %v2521_v5 = vpop.eup %2520 }
 0x7f7   : > { %v1359_v6 = vmul.f32 %v2521_v5, %v2517_v57 }
 0x7f9   : > { %v1361_v8 = vpack.c.bf16 %v1359_v6, %v1359_v6 }
 0x7fb   : > { %2388 = vmatmul.mubr.msk.bf16.vlgmr.msra.gmra.mrb[32].mxu1 %vm779_vm3, %v1361_v8  ;;  %2394 = vmatmul.mubr.msk.bf16.vlgmr.msra.gmra.mrb[16].mxu0 %vm779_vm3, %v1459_v9 }
 0x7fc   : > { %2398 = vmatpush3.bf16.xpose.msra.mxu1 %v1516_v10  ;;  %2399 = vmatprep.mubr.msk.bf16.mxu1 %vm2547_vm2, %v2546_v3 }
 0x7fd   : > { %2409 = vmatprep.subr.bf16.mxu1 %v2546_v3  ;;  %2405 = vmatprep.mubr.msk.bf16.mxu0 %vm2547_vm2, %v2546_v3 }
 0x803   : > { %2400 = vmatmul.mubr.msk.bf16.vlgmr.msra.gmra.mrb[36].mxu1 %vm779_vm3, %v1509_v11 }
 0x804   : > { %2411 = vmatprep.mubr.msk.bf16.mxu1 %vm2547_vm2, %v2546_v3 }
 0x8c6   : > { %v1404_v12 = vpop.f32.mrb[12].mxu0 }
 0x8c7   : > { %v2383_v13 = vpop.f32.mrb[13].mxu0 }
 0x8c8   : > { %v1407_v14 = vpop.f32.mrb[14].mxu0 }
 0x8c9   : > { %v2384_v17 = vpop.f32.mrb[15].mxu0 }
 0x8ce   : > { %v1452_v19 = vpop.f32.mrb[32].mxu1  ;;  %v1502_v20 = vpop.f32.mrb[16].mxu0 }
 0x8cf   : > { %v2474_v21 = vpack.i.bf16 %v1452_v19, %v1404_v12  ;;  %v1558_v24 = vmul.f32 0.35355338, %v1502_v20  ;;  %v2389_v28 = vpop.f32.mrb[33].mxu1  ;;  %v2395_v29 = vpop.f32.mrb[17].mxu0 }
 0x8d0   : > { %v1455_v30 = vpop.f32.mrb[34].mxu1  ;;  %v1505_v32 = vpop.f32.mrb[18].mxu0 }
 0x8d1   : > { %v2390_v33 = vpop.f32.mrb[35].mxu1  ;;  %v2396_v34 = vpop.f32.mrb[19].mxu0  ;;  %v1560_v35 = vadd.f32 %v1558_v24, %v2773_v41 }
 0x8d3   : > { %v1562_v36 = vsel %vm779_vm3, %v1560_v35, -inf }
 0x8d4   : > { %1563 = vmax.xlane.f32.xlu0 %v1562_v36 }
 0x8d6   : > { %v1552_v37 = vpop.f32.mrb[36].mxu1 }
 0x8d7   : > { %v1559_v38 = vmul.f32 0.35355338, %v1552_v37  ;;  %v2401_v39 = vpop.f32.mrb[37].mxu1 }
 0x8d8   : > { %v1555_v40 = vpop.f32.mrb[38].mxu1 }
 0x8d9   : > { %v2402_v42 = vpop.f32.mrb[39].mxu1  ;;  %v1561_v43 = vadd.f32 %v1559_v38, %v2777_v50 }
 0x8db   : > { %v1565_v44 = vsel %vm779_vm3, %v1561_v43, -inf }
 0x8dc   : > { %1566 = vmax.xlane.f32.xlu1 %v1565_v44 }
 0x8ed   : > { %1586 = vrot.lane.b32.xlu1 %v2752_v23, %s2559_s1 }
 0x8f1   : > { %2470 = vrot.lane.b32.xlu1 %v2469_v25, %s2560_s14 }
 0x8f5   : > { %2475 = vrot.lane.b32.xlu1 %v2474_v21, %s2561_s18 }
 0x961   : > { %v1564_v41 = vpop.xlane.xlu0 %1563 }
 0x962   : > { %v1568_v45 = vsub.f32 %v1560_v35, %v1564_v41 }
 0x964   : > { %v1570_v46 = vmul.f32 1.442695, %v1568_v45  ;;  %v2492_v45 = vld [vmem:[%s2688_s2] sm:$0xff]  }
 0x966   : > { %2522 = vpow2.f32 %v1570_v46  ;;  %v1873_v46 = vsel %vm687_vm1, %v2492_v45, 0 }
 0x969   : > { %v1567_v47 = vpop.xlane.xlu1 %1566 }
 0x96a   : > { %v1569_v48 = vsub.f32 %v1561_v43, %v1567_v47 }
 0x96c   : > { %v1572_v50 = vmul.f32 1.442695, %v1569_v48 }
 0x96d   : > { %v1587_v49 = vpop.permute.xlu1 %1586 }
 0x96e   : > { %2524 = vpow2.f32 %v1572_v50  ;;  %v1592_v51 = vsel %vm918_vm4, %v1587_v49, 0 }
 0x96f   : > { %2404 = vmatpush3.bf16.msra.mxu0 %v1592_v51 }
 0x970   : > { %v2523_v23 = vpop.eup %2522  ;;  %2415 = vmatprep.subr.bf16.mxu0 %v2546_v3 }
 0x971   : > { %v1574_v18 = vsel %vm779_vm3, %v2523_v23, 0.0  ;;  %v2471_v11 = vpop.permute.xlu1 %2470 }
 0x972   : > { %1575 = vadd.xlane.f32.xlu0 %v1574_v18  ;;  %v2473_v13 = vunpack.i.h.bf16 %v2471_v11  ;;  %v2472_v14 = vunpack.i.l.bf16 %v2471_v11  ;;  %v2497_v11 = vld [vmem:[%s2693_s4 + $0x8] sm:$0xff]  }
 0x974   : > { %v1707_v21 = vsel %vm779_vm3, %v2811_v31, %v2473_v13  ;;  %v1706_v24 = vsel %vm779_vm3, %v2809_v27, %v2472_v14  ;;  %v2229_v31 = vld [vmem:[%s3023_s21] ss:$0 sm:$0xff]  ;;  %s3027_s21 = sld [smem:[#allocation8_spill]] (!%p2247_p5) }
 0x975   : > { %v2476_v12 = vpop.permute.xlu1 %2475 }
 0x976   : > { %v2478_v17 = vunpack.i.h.bf16 %v2476_v12  ;;  %v2477_v19 = vunpack.i.l.bf16 %v2476_v12  ;;  %v1957_v12 = vsel %vm1949_vm7, %v2497_v11, 0 }
 0x978   : > { %v2525_v22 = vpop.eup %2524  ;;  %v1710_v30 = vsel %vm1708_vm5, %v1707_v21, %v2478_v17  ;;  %v1709_v32 = vsel %vm1708_vm5, %v1706_v24, %v2477_v19 }
 0x979   : > { %v1577_v25 = vsel %vm779_vm3, %v2525_v22, 0.0 }
 0x97a   : > { %1578 = vadd.xlane.f32.xlu0 %v1577_v25  ;;  %v2493_v25 = vld [vmem:[%s2688_s2 + $0x8] sm:$0xff]  }
 0x990   : > { %1634 = vrot.lane.b32.xlu0 %v2755_v26, %s2559_s1  ;;  %s3026_s1 = scalar_lea.vmem %s3003_s9, %s2650_s15 }
 0x991   : > { %v2235_v13 = vld [vmem:[%s3026_s1] ss:$0 sm:$0xff] }
 0x9ff   : > { %v1576_v52 = vpop.xlane.xlu0 %1575 }
 0xa00   : > { %2526 = vrcp.f32 %v1576_v52  ;;  %v1876_v52 = vsel %vm687_vm1, %v2493_v25, 0 }
 0xa07   : > { %v1579_v53 = vpop.xlane.xlu0 %1578 }
 0xa08   : > { %2528 = vrcp.f32 %v1579_v53  ;;  %v2494_v53 = vld [vmem:[%s2688_s2 + $0x10] sm:$0xff]  }
 0xa0a   : > { %v2527_v54 = vpop.eup %2526 }
 0xa0b   : > { %v1582_v55 = vmul.f32 %v2527_v54, %v2523_v23  ;;  %v1635_v56 = vpop.permute.xlu0 %1634  ;;  %v1879_v54 = vsel %vm687_vm1, %v2494_v53, 0 }
 0xa0c   : > { %v1640_v57 = vsel %vm918_vm4, %v1635_v56, 0 }
 0xa0d   : > { %2410 = vmatpush3.bf16.msra.mxu1 %v1640_v57  ;;  %v1584_v58 = vpack.c.bf16 %v1582_v55, %v1582_v55  ;;  %v2495_v55 = vld [vmem:[%s2688_s2 + $0x18] sm:$0xff]   ;;  %v2496_v57 = vld [vmem:[%s2693_s4] sm:$0xff]  }
 0xa0e   : > { %2423 = vmatprep.subr.bf16.mxu1 %v2546_v3  ;;  %v1882_v56 = vsel %vm687_vm1, %v2495_v55, 0  ;;  %v2246_v55 = vld [vmem:[%s624_s24] ss:$0 sm:$0xff] }
 0xa0f   : > { %2406 = vmatmul.mubr.msk.bf16.vlgmr.msra.gmra.mrb[20].mxu0 %vm779_vm3, %v1584_v58  ;;  %v1954_v58 = vsel %vm1949_vm7, %v2496_v57, 0 }
 0xa10   : > { %2419 = vmatprep.mubr.msk.bf16.mxu0 %vm2547_vm2, %v2546_v3  ;;  %2416 = vmatpush3.bf16.xpose.msra.mxu0 %v1740_v62 }
 0xa11   : > { %2417 = vmatprep.subr.bf16.mxu0 %v2546_v3 }
 0xa12   : > { %v2529_v26 = vpop.eup %2528 }
 0xa13   : > { %v1583_v59 = vmul.f32 %v2529_v26, %v2525_v22 }
 0xa15   : > { %v1585_v60 = vpack.c.bf16 %v1583_v59, %v1583_v59 }
 0xa17   : > { %2412 = vmatmul.mubr.msk.bf16.vlgmr.msra.gmra.mrb[40].mxu1 %vm779_vm3, %v1585_v60 }
 0xa18   : > { %2431 = vmatprep.mubr.msk.bf16.mxu1 %vm2547_vm2, %v2546_v3  ;;  %2418 = vmatpush3.bf16.xpose.msra.mxu0 %v1743_v0 }
 0xa19   : > { %2435 = vmatprep.subr.bf16.mxu0 %v2546_v3  ;;  %2424 = vmatpush3.bf16.xpose.msra.mxu1 %v1873_v46 }
 0xa1a   : > { %2425 = vmatprep.subr.bf16.mxu1 %v2546_v3 }
 0xa21   : > { %2426 = vmatpush3.bf16.xpose.msra.mxu1 %v1876_v52  ;;  %v2245_v52 = vld [vmem:[%s621_s17] ss:$0 sm:$0xff] }
 0xa22   : > { %2427 = vmatprep.subr.bf16.mxu1 %v2546_v3 }
 0xa29   : > { %2428 = vmatpush3.bf16.xpose.msra.mxu1 %v1879_v54 }
 0xa2a   : > { %2429 = vmatprep.subr.bf16.mxu1 %v2546_v3 }
 0xa31   : > { %2430 = vmatpush3.bf16.xpose.msra.mxu1 %v1882_v56 }
 0xae2   : > { %v1628_v1 = vpop.f32.mrb[20].mxu0 }
 0xae3   : > { %v2407_v2 = vpop.f32.mrb[21].mxu0 }
 0xae4   : > { %v1631_v4 = vpop.f32.mrb[22].mxu0 }
 0xae5   : > { %v2408_v5 = vpop.f32.mrb[23].mxu0 }
 0xaea   : > { %v1676_v6 = vpop.f32.mrb[40].mxu1 }
 0xaeb   : > { %v2479_v7 = vpack.i.bf16 %v1676_v6, %v1628_v1  ;;  %v2413_v8 = vpop.f32.mrb[41].mxu1  ;;  %v2233_v1 = vld [vmem:[%s3024_s20] ss:$0 sm:$0xff] }
 0xaec   : > { %v1679_v9 = vpop.f32.mrb[42].mxu1  ;;  %v2234_v6 = vld [vmem:[%s3025_s27] ss:$0 sm:$0xff] }
 0xaed   : > { %v2414_v10 = vpop.f32.mrb[43].mxu1  ;;  %2480 = vrot.lane.b32.xlu0 %v2479_v7, %s2562_s23 }
 0xb5f   : > { %v2481_v20 = vpop.permute.xlu0 %2480 }
 0xb60   : > { %v2483_v28 = vunpack.i.h.bf16 %v2481_v20  ;;  %v2482_v29 = vunpack.i.l.bf16 %v2481_v20 }
 0xb62   : > { %v1713_v33 = vsel %vm1711_vm6, %v1710_v30, %v2483_v28  ;;  %v1712_v34 = vsel %vm1711_vm6, %v1709_v32, %v2482_v29  ;;  %v2241_v32 = vld [vmem:[%s618_s19] ss:$0 sm:$0xff] }
 0xb63   : > { %v1719_v35 = vpack.c.bf16 %v1713_v33, %v1712_v34 }
 0xb65   : > { %2420 = vmatmul.mubr.msk.bf16.vlgmr.msra.gmra.mrb[24].mxu0 %vm687_vm1, %v1719_v35 }
 0xb66   : > { %2439 = vmatprep.mubr.msk.bf16.mxu0 %vm2547_vm2, %v2546_v3  ;;  %2436 = vmatpush3.bf16.xpose.msra.mxu0 %v1954_v58 }
 0xb67   : > { %2437 = vmatprep.subr.bf16.mxu0 %v2546_v3 }
 0xb6e   : > { %2438 = vmatpush3.bf16.xpose.msra.mxu0 %v1957_v12 }
 0xc38   : > { %v1779_v36 = vpop.f32.mrb[24].mxu0 }
 0xc39   : > { %v1780_v27 = vadd.f32 %v2229_v31, %v1779_v36  ;;  %v2421_v37 = vpop.f32.mrb[25].mxu0 }
 0xc3a   : > { %v1782_v38 = vpop.f32.mrb[26].mxu0 }
 0xc3b   : > { %v1783_v39 = vadd.f32 %v2229_v31, %v1782_v38  ;;  %v2422_v40 = vpop.f32.mrb[27].mxu0  ;;  %v1786_v42 = vadd.f32 %v1780_v27, %v2737_v15 }
 0xc3d   : > { %v1790_v43 = vsel %vm687_vm1, %v1786_v42, 0.0  ;;  %v1787_v44 = vadd.f32 %v1783_v39, %v2739_v16 }
 0xc3e   : > { %1791 = vadd.xlane.f32.xlu1 %v1790_v43 }
 0xc3f   : > { %v1793_v41 = vsel %vm687_vm1, %v1787_v44, 0.0 }
 0xc40   : > { %1794 = vadd.xlane.f32.xlu0 %v1793_v41 }
 0xccb   : > { %v1792_v47 = vpop.xlane.xlu1 %1791 }
 0xccc   : > { %v1797_v48 = vmul.f32 0.03125, %v1792_v47 }
 0xccd   : > { %v1795_v50 = vpop.xlane.xlu0 %1794 }
 0xcce   : > { %v1799_v15 = vsub.f32 %v1786_v42, %v1797_v48  ;;  %v1798_v49 = vmul.f32 0.03125, %v1795_v50 }
 0xcd0   : > { %v1800_v51 = vsub.f32 %v1787_v44, %v1798_v49  ;;  %v1801_v16 = vmul.f32 %v1799_v15, %v1799_v15 }
 0xcd2   : > { %v1803_v23 = vsel %vm687_vm1, %v1801_v16, 0.0  ;;  %v1802_v18 = vmul.f32 %v1800_v51, %v1800_v51 }
 0xcd3   : > { %1804 = vadd.xlane.f32.xlu0 %v1803_v23 }
 0xcd4   : > { %v1806_v22 = vsel %vm687_vm1, %v1802_v18, 0.0 }
 0xcd5   : > { %1807 = vadd.xlane.f32.xlu1 %v1806_v22 }
 0xd60   : > { %v1805_v26 = vpop.xlane.xlu0 %1804 }
 0xd61   : > { %v1809_v59 = vmul.f32 0.03125, %v1805_v26 }
 0xd62   : > { %v1808_v60 = vpop.xlane.xlu1 %1807 }
 0xd63   : > { %v1811_v61 = vadd.f32 1e-05, %v1809_v59  ;;  %v1810_v62 = vmul.f32 0.03125, %v1808_v60 }
 0xd65   : > { %2530 = vrsqrt.f32 %v1811_v61  ;;  %v1812_v63 = vadd.f32 1e-05, %v1810_v62 }
 0xd67   : > { %2532 = vrsqrt.f32 %v1812_v63 }
 0xd6f   : > { %v2531_v0 = vpop.eup %2530 }
 0xd70   : > { %v1815_v2 = vmul.f32 %v2531_v0, %v1799_v15 }
 0xd71   : > { %v2533_v4 = vpop.eup %2532 }
 0xd72   : > { %v1823_v5 = vmul.f32 %v2233_v1, %v1815_v2  ;;  %v1816_v3 = vmul.f32 %v2533_v4, %v1800_v51 }
 0xd74   : > { %v1824_v7 = vmul.f32 %v2233_v1, %v1816_v3  ;;  %v1831_v8 = vadd.f32 %v2234_v6, %v1823_v5 }
 0xd76   : > { %v1832_v9 = vadd.f32 %v2234_v6, %v1824_v7 }
 0xd78   : > { %v1842_v10 = vpack.c.bf16 %v1832_v9, %v1831_v8 }
 0xd7a   : > { %2432 = vmatmul.mubr.msk.bf16.vlgmr.msra.gmra.mrb[44].mxu1 %vm687_vm1, %v1842_v10 }
 0xe4d   : > { %v1918_v14 = vpop.f32.mrb[44].mxu1 }
 0xe4e   : > { %v1919_v17 = vadd.f32 %v2235_v13, %v1918_v14  ;;  %v2433_v19 = vpop.f32.mrb[45].mxu1 }
 0xe4f   : > { %v1921_v20 = vpop.f32.mrb[46].mxu1 }
 0xe50   : > { %v1922_v21 = vadd.f32 %v2235_v13, %v1921_v20  ;;  %v2434_v24 = vpop.f32.mrb[47].mxu1  ;;  %v1925_v28 = vmax.f32 %v1919_v17, 0.0 }
 0xe52   : > { %v1926_v29 = vmax.f32 %v1922_v21, 0.0 }
 0xe54   : > { %v1932_v30 = vpack.c.bf16 %v1926_v29, %v1925_v28 }
 0xe56   : > { %2440 = vmatmul.mubr.msk.bf16.vlgmr.msra.gmra.mrb[28].mxu0 %vm1949_vm7, %v1932_v30 }
 0xf29   : > { %v1993_v33 = vpop.f32.mrb[28].mxu0 }
 0xf2a   : > { %v1994_v34 = vadd.f32 %v2241_v32, %v1993_v33  ;;  %v2441_v35 = vpop.f32.mrb[29].mxu0 }
 0xf2b   : > { %v1996_v31 = vpop.f32.mrb[30].mxu0 }
 0xf2c   : > { %v1997_v36 = vadd.f32 %v2241_v32, %v1996_v31  ;;  %v2442_v27 = vpop.f32.mrb[31].mxu0  ;;  %v2000_v37 = vadd.f32 %v1994_v34, %v1831_v8 }
 0xf2e   : > { %v2004_v38 = vsel %vm687_vm1, %v2000_v37, 0.0  ;;  %v2001_v39 = vadd.f32 %v1997_v36, %v1832_v9 }
 0xf2f   : > { %2005 = vadd.xlane.f32.xlu0 %v2004_v38 }
 0xf30   : > { %v2007_v40 = vsel %vm687_vm1, %v2001_v39, 0.0 }
 0xf31   : > { %2008 = vadd.xlane.f32.xlu1 %v2007_v40 }
 0xfbc   : > { %v2006_v42 = vpop.xlane.xlu0 %2005 }
 0xfbd   : > { %v2010_v43 = vmul.f32 0.03125, %v2006_v42 }
 0xfbe   : > { %v2009_v44 = vpop.xlane.xlu1 %2008 }
 0xfbf   : > { %v2012_v41 = vsub.f32 %v2000_v37, %v2010_v43  ;;  %v2011_v45 = vmul.f32 0.03125, %v2009_v44 }
 0xfc1   : > { %v2013_v46 = vsub.f32 %v2001_v39, %v2011_v45  ;;  %v2014_v47 = vmul.f32 %v2012_v41, %v2012_v41 }
 0xfc3   : > { %v2016_v48 = vsel %vm687_vm1, %v2014_v47, 0.0  ;;  %v2015_v50 = vmul.f32 %v2013_v46, %v2013_v46 }
 0xfc4   : > { %2017 = vadd.xlane.f32.xlu0 %v2016_v48 }
 0xfc5   : > { %v2019_v15 = vsel %vm687_vm1, %v2015_v50, 0.0 }
 0xfc6   : > { %2020 = vadd.xlane.f32.xlu1 %v2019_v15 }
0x1051   : > { %v2018_v49 = vpop.xlane.xlu0 %2017 }
0x1052   : > { %v2022_v51 = vmul.f32 0.03125, %v2018_v49 }
0x1053   : > { %v2021_v16 = vpop.xlane.xlu1 %2020 }
0x1054   : > { %v2024_v23 = vadd.f32 1e-05, %v2022_v51  ;;  %v2023_v18 = vmul.f32 0.03125, %v2021_v16 }
0x1056   : > { %2534 = vrsqrt.f32 %v2024_v23  ;;  %v2025_v22 = vadd.f32 1e-05, %v2023_v18 }
0x1058   : > { %2536 = vrsqrt.f32 %v2025_v22 }
0x1060   : > { %v2535_v25 = vpop.eup %2534 }
0x1061   : > { %v2028_v53 = vmul.f32 %v2535_v25, %v2012_v41 }
0x1062   : > { %v2537_v54 = vpop.eup %2536 }
0x1063   : > { %v2036_v56 = vmul.f32 %v2245_v52, %v2028_v53  ;;  %v2029_v57 = vmul.f32 %v2537_v54, %v2013_v46  ;;  %2051 = sbr.rel (%p2247_p5) target bundleno = 4210 (0x1072), region = 84 }
0x1065   : > { %v2044_v58 = vadd.f32 %v2246_v55, %v2036_v56  ;;  %v2037_v26 = vmul.f32 %v2245_v52, %v2029_v57 }
0x1067   : > { %2046 = vst.msk [vmem:[#allocation2] sm:$0xff] %vm687_vm1, %v2044_v58  ;;  %v2045_v59 = vadd.f32 %v2246_v55, %v2037_v26 }
0x1069   : > { %2047 = vst.msk [vmem:[#allocation2 + $0x8] sm:$0xff] %vm687_vm1, %v2045_v59 }
0x106e   : > { %v2052_v60 = vld [vmem:[#allocation2] sm:$0xff] }
0x106f   : > { %2054 = vst.msk [vmem:[%s3027_s21] sm:$0xff] %vm687_vm1, %v2052_v60 }
0x1070   : > { %v2053_v61 = vld [vmem:[#allocation2 + $0x8] sm:$0xff] }
0x1071   : > { %2055 = vst.msk [vmem:[%s3027_s21 + $0x8] sm:$0xff] %vm687_vm1, %v2053_v61 }
0x1072 PF: > { %s3028_s2 = sld [smem:[#allocation3_spill]] }
0x1078   : > { %s24_s29 = sadd.s32 1, %s3028_s2  }
0x1079   : > { %p21_p6 = scmp.ge.s32.totalorder %s24_s29, 4  }
0x107b   :  { %23 = sbr.rel (!%p21_p6) target bundleno = 6 (0x6), region = 143 }

// kernel: transformer_forward.3
= control target key start
LH: loop header
LB: loop body
LE: loop exit
PB: predicated region body
PF: predicated region fallthrough
CT: control target
= control target key end

     0   :  { %s5792_s0 = inlined_call_operand.vmem [shape: f32[2,8,32], index: 0, kind: input, shape index: {}]   ;;  %s5793_s1 = inlined_call_operand.vmem [shape: f32[2,8,32], index: 1, kind: input, shape index: {}]   ;;  %s5794_s2 = inlined_call_operand.vmem [shape: f32[2,8], index: 2, kind: input, shape index: {}]   ;;  %s5795_s3 = inlined_call_operand.vmem [shape: f32[2,8], index: 3, kind: input, shape index: {}]   ;;  %s5796_s4 = inlined_call_operand.vmem [shape: f32[8,8], index: 4, kind: input, shape index: {}]   ;;  %s5797_s5 = inlined_call_operand.vmem [shape: bf16[2,96,32], index: 5, kind: input, shape index: {}]   ;;  %s5798_s6 = inlined_call_operand.vmem [shape: f32[2,1,96], index: 6, kind: input, shape index: {}]   ;;  %s5799_s7 = inlined_call_operand.vmem [shape: bf16[2,32,32], index: 7, kind: input, shape index: {}]   ;;  %s5800_s8 = inlined_call_operand.vmem [shape: f32[2,1,32], index: 8, kind: input, shape index: {}]   ;;  %s5801_s9 = inlined_call_operand.vmem [shape: f32[2,1,32], index: 9, kind: input, shape index: {}]   ;;  %s5802_s10 = inlined_call_operand.vmem [shape: f32[2,1,32], index: 10, kind: input, shape index: {}]   ;;  %s5803_s11 = inlined_call_operand.vmem [shape: bf16[2,32,32], index: 11, kind: input, shape index: {}]   ;;  %s5804_s12 = inlined_call_operand.vmem [shape: f32[2,1,32], index: 12, kind: input, shape index: {}]   ;;  %s5805_s13 = inlined_call_operand.vmem [shape: bf16[2,64,32], index: 13, kind: input, shape index: {}]   ;;  %s5806_s14 = inlined_call_operand.vmem [shape: f32[2,1,64], index: 14, kind: input, shape index: {}]   ;;  %s5807_s15 = inlined_call_operand.vmem [shape: bf16[2,32,32], index: 15, kind: input, shape index: {}]   ;;  %s5808_s16 = inlined_call_operand.vmem [shape: f32[2,1,32], index: 16, kind: input, shape index: {}]   ;;  %s5809_s17 = inlined_call_operand.vmem [shape: f32[2,1,32], index: 17, kind: input, shape index: {}]   ;;  %s5810_s18 = inlined_call_operand.vmem [shape: f32[2,1,32], index: 18, kind: input, shape index: {}]   ;;  %s5811_s19 = inlined_call_operand.vmem [shape: bf16[2,64,32], index: 19, kind: input, shape index: {}]   ;;  %s5812_s20 = inlined_call_operand.vmem [shape: f32[2,1,64], index: 20, kind: input, shape index: {}]   ;;  %s5813_s21 = inlined_call_operand.vmem [shape: bf16[2,32,64], index: 21, kind: input, shape index: {}]   ;;  %s5814_s22 = inlined_call_operand.vmem [shape: f32[2,1,32], index: 22, kind: input, shape index: {}]   ;;  %s5815_s23 = inlined_call_operand.vmem [shape: f32[2,1,32], index: 23, kind: input, shape index: {}]   ;;  %s5816_s24 = inlined_call_operand.vmem [shape: f32[2,1,32], index: 24, kind: input, shape index: {}]   ;;  %s5817_s25 = inlined_call_operand.vmem [shape: bf16[128,32], index: 25, kind: input, shape index: {}]   ;;  %s5818_s26 = inlined_call_operand.vmem [shape: f32[1,128], index: 26, kind: input, shape index: {}]   ;;  %s5819_s27 = inlined_call_operand.hbm [shape: f32[2,8,128], index: 27, kind: output, shape index: {}]  }
   0x1   :  { %5829 = sst [smem:[#allocation10_spill]] %s5792_s0 }
   0x2   :  { %5830 = sst [smem:[#allocation11_spill]] %s5793_s1 }
   0x3   :  { %5831 = sst [smem:[#allocation12_spill]] %s5794_s2 }
   0x4   :  { %5832 = sst [smem:[#allocation13_spill]] %s5795_s3 }
   0x5   :  { %5833 = sst [smem:[#allocation14_spill]] %s5796_s4 }
   0x6   :  { %5834 = sst [smem:[#allocation15_spill]] %s5797_s5 }
   0x7   :  { %5835 = sst [smem:[#allocation16_spill]] %s5798_s6 }
   0x8   :  { %5836 = sst [smem:[#allocation17_spill]] %s5799_s7 }
   0x9   :  { %5837 = sst [smem:[#allocation18_spill]] %s5800_s8 }
   0xa   :  { %5838 = sst [smem:[#allocation19_spill]] %s5801_s9 }
   0xb   :  { %5839 = sst [smem:[#allocation20_spill]] %s5802_s10 }
   0xc   :  { %5840 = sst [smem:[#allocation21_spill]] %s5803_s11 }
   0xd   :  { %5841 = sst [smem:[#allocation22_spill]] %s5805_s13 }
   0xe   :  { %5842 = sst [smem:[#allocation23_spill]] %s5807_s15 }
   0xf   :  { %5843 = sst [smem:[#allocation24_spill]] %s5810_s18 }
  0x10   :  { %5844 = sst [smem:[#allocation25_spill]] %s5811_s19 }
  0x11   :  { %5845 = sst [smem:[#allocation26_spill]] %s5815_s23 }
  0x12   :  { %5846 = sst [smem:[#allocation27_spill]] %s5816_s24 }
  0x13   :  { %5847 = sst [smem:[#allocation28_spill]] %s5817_s25 }
  0x14   :  { %5848 = sst [smem:[#allocation29_spill]] %s5818_s26 }
  0x15   :  { %5849 = sst [smem:[#allocation30_spill]] %s5819_s27 }
  0x16   :  { %32 = vsyncpa [#allocation4], 0  ;;  %s5050_s7 = smov 0  }
  0x17 LB: > { %5850 = sst [smem:[#allocation6_spill]] %s4887_s7  ;;  %s5056_s4 = sadd.s32 4294967295, %s4887_s7   ;;  %s4887_s7 = sphi %s5050_s7, %s38_s7  }
  0x18   : > { %5851 = sst [smem:[#allocation7_spill]] %s5056_s4  ;;  %p4173_p0 = scmp.ge.s32.totalorder %s4887_s7, 1 }
  0x19   : > { %p897_p1 = scmp.lt.s32.totalorder %s4887_s7, 3 }
  0x1b   : > { %p898_p2 = pnand %p4173_p0, %p897_p1 }
  0x1d   : > { %901 = sbr.rel (%p898_p2) target bundleno = 8052 (0x1f74), region = 128 }
  0x24   : > { %p1033_p3 = scmp.lt.s32.totalorder %s5056_s4, 1  ;;  %s5854_s7 = sld [smem:[#allocation15_spill]] }
  0x25   : > { %s5861_s13 = sld [smem:[#allocation22_spill]]  ;;  %s5862_s15 = sld [smem:[#allocation23_spill]] }
  0x26   : > { %s5062_s8 = scalar_select %p1033_p3, %s5056_s4, 1 }
  0x27   : > { %s5856_s4 = sld [smem:[#allocation17_spill]]  ;;  %s5867_s18 = sld [smem:[#allocation7_spill]] }
  0x28   : > { %s4671_s30 = smul.u32 48, %s5062_s8  ;;  %s4279_s10 = sshll.u32 %s5062_s8, 4 }
  0x29   : > { %s5864_s19 = sld [smem:[#allocation25_spill]] }
  0x2a   : > { %s5077_s27 = scalar_lea.vmem %s5854_s7, %s4671_s30  ;;  %s5860_s7 = sld [smem:[#allocation21_spill]] }
  0x2b   : > { %5855 = sst [smem:[#allocation8_spill]] %s5077_s27  ;;  %s5114_s11 = scalar_lea.vmem %s5862_s15, %s4279_s10 }
  0x2d   : > { %s5082_s24 = scalar_lea.vmem %s5856_s4, %s4279_s10  ;;  %s4281_s4 = sshll.u32 %s5062_s8, 5 }
  0x2e   : > { %5857 = sst [smem:[#allocation9_spill]] %s5082_s24  ;;  %s5109_s23 = scalar_lea.vmem %s5861_s13, %s4281_s4 }
  0x2f   : > { %s5131_s0 = scalar_lea.vmem %s5864_s19, %s4281_s4  ;;  %p4187_p4 = scmp.ne.s32.totalorder %s5867_s18, 0 }
  0x30   : > { %s5095_s30 = scalar_lea.vmem %s5860_s7, %s4279_s10  ;;  %s5140_s7 = scalar_lea.vmem %s5813_s21, %s4279_s10  ;;  %vm1114_vm0 = vcmask (!%p4187_p4), 261120  }
  0x31   : > { %1111 = sbr.rel (%p4187_p4) target bundleno = 57 (0x39), region = 132  ;;  %s5868_s15 = sld [smem:[#allocation10_spill]] (!%p4187_p4) }
  0x37   : > { %v1112_v0 = vld [vmem:[%s5868_s15] sm:$0xff] (!%p4187_p4)  ;;  %v1113_v1 = vld [vmem:[%s5868_s15 + $0x8] sm:$0xff] (!%p4187_p4) }
  0x38   : > { %1115 = vst.msk [vmem:[#allocation2] sm:$0xff] %vm1114_vm0, %v1112_v0  ;;  %1116 = vst.msk [vmem:[#allocation2 + $0x8] sm:$0xff] %vm1114_vm0, %v1113_v1 }
  0x39 PF: > { %s5869_s9 = sld [smem:[#allocation8_spill]]  ;;  %v4889_v3 = vmov 0.0   ;;  %vm1169_vm1 = vcmask 261120   ;;  %vm4890_vm2 = vmmov 0   ;;  %s5870_s25 = sld [smem:[#allocation16_spill]]  ;;  %vm1274_vm3 = vcmask 64512  }
  0x3a   : > { %4387 = vmatprep.subr.bf16.mxu0 %v4889_v3  ;;  %4403 = vmatprep.subr.bf16.mxu1 %v4889_v3  ;;  %s4891_s27 = smov 96   ;;  %v4892_v31 = vmov 1966171168   ;;  %v1245_v33 = vlaneseq  ;;  %s5872_s28 = sld [smem:[#allocation12_spill]]  ;;  %vm1403_vm4 = vcmask 1043456   ;;  %vm2193_vm5 = vcmask 130048  }
  0x3b   : > { %4399 = vmatprep.mubr.msk.bf16.mxu0 %vm4890_vm2, %v4889_v3  ;;  %4405 = vmatprep.mubr.msk.bf16.mxu1 %vm4890_vm2, %v4889_v3  ;;  %v1243_v32 = vunpack.c.l.s4 %v4892_v31  ;;  %s5873_s10 = sld [smem:[#allocation14_spill]]  ;;  %s4893_s2 = smov 64   ;;  %vm2196_vm6 = vcmask 195584   ;;  %vm3678_vm7 = vcmask 523264  }
  0x3c   : > { %v1246_v35 = vshrl.u32 %v1245_v33, 7  ;;  %s4895_s18 = smov 120   ;;  %s4896_s26 = smov 56  }
  0x3d   : > { %v1244_v34 = vunpack.c.0.s8 %v1243_v32  ;;  %s4899_s5 = smov 48   ;;  %s4900_s4 = smov 72  }
  0x3e   : > { %v5225_v39 = vsub.s32 0, %v1246_v35  ;;  %s4902_s29 = smov 40   ;;  %s4903_s1 = smov 8  }
  0x3f   : > { %v4737_v2 = vld [vmem:[%s5869_s9] sm:$0xff]   ;;  %v4738_v5 = vld [vmem:[%s5869_s9 + $0x8] sm:$0xff]   ;;  %v4739_v6 = vld [vmem:[%s5869_s9 + $0x10] sm:$0xff]   ;;  %s5871_s24 = scalar_lea.vmem %s5870_s25, %s5062_s8  ;;  %v5219_v36 = vsub.s32 %v1244_v34, %v1246_v35  ;;  %s4897_s25 = smov 80  }
  0x40   : > { %v1174_v4 = vsel %vm1169_vm1, %v4737_v2, 0  ;;  %v1177_v7 = vsel %vm1169_vm1, %v4738_v5, 0  ;;  %v1180_v8 = vsel %vm1169_vm1, %v4739_v6, 0  ;;  %v4740_v9 = vld [vmem:[%s5869_s9 + $0x18] sm:$0xff]   ;;  %v4741_v11 = vld [vmem:[%s5869_s9 + $0x20] sm:$0xff]   ;;  %v4742_v13 = vld [vmem:[%s5869_s9 + $0x28] sm:$0xff]  }
  0x41   : > { %4388 = vmatpush3.bf16.xpose.msra.mxu0 %v1174_v4  ;;  %v1183_v10 = vsel %vm1169_vm1, %v4740_v9, 0  ;;  %v1186_v12 = vsel %vm1169_vm1, %v4741_v11, 0  ;;  %v1189_v14 = vsel %vm1169_vm1, %v4742_v13, 0  ;;  %v5184_v15 = vld [vmem:[#allocation2] sm:$0xff]  ;;  %v5186_v16 = vld [vmem:[#allocation2 + $0x8] sm:$0xff]  ;;  %s4894_s9 = smov 88  }
  0x42   : > { %4389 = vmatprep.subr.bf16.mxu0 %v4889_v3  ;;  %v1132_v17 = vpack.c.bf16 %v5186_v16, %v5184_v15  ;;  %v4188_v18 = vld [vmem:[%s5871_s24] ss:$0 sm:$0xff]  ;;  %s4898_s24 = smov 112   ;;  %s5878_s3 = sld [smem:[#allocation19_spill]] }
  0x43   : > { %v4196_v37 = vld.sshfl [vmem:[%s5872_s28] sm:$0x11 pattern:$0x75316420]  ;;  %s4901_s28 = smov 104   ;;  %s5880_s6 = sld [smem:[#allocation20_spill]] }
  0x44   : > { %v1248_v38 = vrot.slane %v4196_v37, %v5219_v36  ;;  %v1241_v40 = vcombine.high %v4196_v37, %v4196_v37  ;;  %v1256_v42 = vld [vmem:[%s5873_s10] sm:$0xff]  ;;  %s4904_s10 = smov 16  }
  0x46   : > { %v1260_v41 = vrot.slane %v1248_v38, %v5225_v39  ;;  %v1255_v44 = vrot.slane %v1241_v40, %v5219_v36 }
  0x48   : > { %v5231_v43 = vadd.f32 %v1260_v41, %v1256_v42  ;;  %v1264_v51 = vrot.slane %v1255_v44, %v5225_v39 }
  0x49   : > { %4390 = vmatpush3.bf16.xpose.msra.mxu0 %v1177_v7  ;;  %s5881_s13 = scalar_lea.vmem %s5880_s6, %s5062_s8  ;;  %s5890_s6 = scalar_lea.vmem %s5814_s22, %s5062_s8 }
  0x4a   : > { %4391 = vmatprep.subr.bf16.mxu0 %v4889_v3  ;;  %v5237_v53 = vadd.f32 %v1264_v51, %v1256_v42 }
  0x51   : > { %4392 = vmatpush3.bf16.xpose.msra.mxu0 %v1180_v8 }
  0x52   : > { %4393 = vmatprep.subr.bf16.mxu0 %v4889_v3 }
  0x59   : > { %4394 = vmatpush3.bf16.xpose.msra.mxu0 %v1183_v10 }
  0x5a   : > { %4395 = vmatprep.subr.bf16.mxu0 %v4889_v3 }
  0x61   : > { %4396 = vmatpush3.bf16.xpose.msra.mxu0 %v1186_v12 }
  0x62   : > { %4397 = vmatprep.subr.bf16.mxu0 %v4889_v3 }
  0x69   : > { %4398 = vmatpush3.bf16.xpose.msra.mxu0 %v1189_v14 }
  0x6a   : > { %4439 = vmatprep.subr.bf16.mxu0 %v4889_v3 }
  0x70   : > { %4400 = vmatmul.mubr.msk.bf16.vlgmr.msra.gmra.mrb[0].mxu0 %vm1169_vm1, %v1132_v17 }
  0x71   : > { %4441 = vmatprep.mubr.msk.bf16.mxu0 %vm4890_vm2, %v4889_v3 }
 0x143   : > { %v1225_v19 = vpop.f32.mrb[0].mxu0 }
 0x144   : > { %v1226_v20 = vadd.f32 %v4188_v18, %v1225_v19  ;;  %v4401_v21 = vpop.f32.mrb[1].mxu0 }
 0x145   : > { %v1228_v22 = vpop.f32.mrb[2].mxu0 }
 0x146   : > { %v5199_v23 = vpack.c.bf16 %v1226_v20, %v1226_v20  ;;  %v1229_v24 = vadd.f32 %v4188_v18, %v1228_v22  ;;  %v4402_v25 = vpop.f32.mrb[3].mxu0 }
 0x148   : > { %1272 = vrot.lane.b32.xlu0 %v5199_v23, %s4891_s27  ;;  %v5203_v26 = vpack.c.bf16 %v1229_v24, %v1229_v24 }
 0x14c   : > { %1322 = vrot.lane.b32.xlu0 %v5203_v26, %s4891_s27 }
 0x1ba   : > { %v1273_v27 = vpop.permute.xlu0 %1272 }
 0x1bb   : > { %v1279_v28 = vsel %vm1274_vm3, %v1273_v27, 0 }
 0x1bc   : > { %4404 = vmatpush3.bf16.xpose.msra.mxu1 %v1279_v28 }
 0x1bd   : > { %4409 = vmatprep.subr.bf16.mxu1 %v4889_v3 }
 0x1be   : > { %v1323_v29 = vpop.permute.xlu0 %1322 }
 0x1bf   : > { %v1328_v30 = vsel %vm1274_vm3, %v1323_v29, 0 }
 0x1c3   : > { %4406 = vmatmul.mubr.msk.bf16.vlgmr.msra.gmra.mrb[0].mxu1 %vm1274_vm3, %v5199_v23 }
 0x1c4   : > { %4410 = vmatpush3.bf16.xpose.msra.mxu1 %v1328_v30  ;;  %4411 = vmatprep.mubr.msk.bf16.mxu1 %vm4890_vm2, %v4889_v3 }
 0x1c5   : > { %4415 = vmatprep.subr.bf16.mxu1 %v4889_v3 }
 0x1cb   : > { %4412 = vmatmul.mubr.msk.bf16.vlgmr.msra.gmra.mrb[4].mxu1 %vm1274_vm3, %v5203_v26 }
 0x1cc   : > { %4417 = vmatprep.mubr.msk.bf16.mxu1 %vm4890_vm2, %v4889_v3 }
 0x296   : > { %v1315_v45 = vpop.f32.mrb[0].mxu1 }
 0x297   : > { %v1370_v46 = vmul.f32 0.35355338, %v1315_v45  ;;  %v4407_v47 = vpop.f32.mrb[1].mxu1 }
 0x298   : > { %v1318_v48 = vpop.f32.mrb[2].mxu1 }
 0x299   : > { %v4408_v49 = vpop.f32.mrb[3].mxu1  ;;  %v1372_v50 = vadd.f32 %v1370_v46, %v5231_v43 }
 0x29b   : > { %v1374_v52 = vsel %vm1274_vm3, %v1372_v50, -inf }
 0x29c   : > { %1375 = vmax.xlane.f32.xlu1 %v1374_v52 }
 0x29e   : > { %v1364_v54 = vpop.f32.mrb[4].mxu1 }
 0x29f   : > { %v1371_v55 = vmul.f32 0.35355338, %v1364_v54  ;;  %v4413_v56 = vpop.f32.mrb[5].mxu1 }
 0x2a0   : > { %v1367_v57 = vpop.f32.mrb[6].mxu1 }
 0x2a1   : > { %v4414_v58 = vpop.f32.mrb[7].mxu1  ;;  %v1373_v59 = vadd.f32 %v1371_v55, %v5237_v53 }
 0x2a3   : > { %v1377_v60 = vsel %vm1274_vm3, %v1373_v59, -inf }
 0x2a4   : > { %1378 = vmax.xlane.f32.xlu1 %v1377_v60 }
 0x2b5   : > { %1398 = vrot.lane.b32.xlu1 %v5199_v23, %s4893_s2 }
 0x2b9   : > { %1447 = vrot.lane.b32.xlu1 %v5203_v26, %s4893_s2  ;;  %s5874_s2 = sld [smem:[#allocation9_spill]] }
 0x329   : > { %v1376_v61 = vpop.xlane.xlu1 %1375 }
 0x32a   : > { %v1380_v62 = vsub.f32 %v1372_v50, %v1376_v61 }
 0x32c   : > { %v1382_v63 = vmul.f32 1.442695, %v1380_v62 }
 0x32e   : > { %4759 = vpow2.f32 %v1382_v63 }
 0x331   : > { %v1379_v0 = vpop.xlane.xlu1 %1378 }
 0x332   : > { %v1381_v1 = vsub.f32 %v1373_v59, %v1379_v0 }
 0x334   : > { %v1384_v2 = vmul.f32 1.442695, %v1381_v1 }
 0x335   : > { %v1399_v4 = vpop.permute.xlu1 %1398 }
 0x336   : > { %4761 = vpow2.f32 %v1384_v2  ;;  %v1405_v5 = vsel %vm1403_vm4, %v1399_v4, 0 }
 0x337   : > { %4416 = vmatpush3.bf16.msra.mxu1 %v1405_v5 }
 0x338   : > { %v4760_v6 = vpop.eup %4759  ;;  %4421 = vmatprep.subr.bf16.mxu1 %v4889_v3 }
 0x339   : > { %v1386_v7 = vsel %vm1274_vm3, %v4760_v6, 0.0  ;;  %v1448_v11 = vpop.permute.xlu1 %1447 }
 0x33a   : > { %1387 = vadd.xlane.f32.xlu0 %v1386_v7  ;;  %v1453_v18 = vsel %vm1403_vm4, %v1448_v11, 0 }
 0x340   : > { %v4762_v8 = vpop.eup %4761 }
 0x341   : > { %v1389_v9 = vsel %vm1274_vm3, %v4762_v8, 0.0 }
 0x342   : > { %1390 = vadd.xlane.f32.xlu1 %v1389_v9 }
 0x350   : > { %1547 = vrot.lane.b32.xlu0 %v5203_v26, %s4894_s9 }
 0x353   : > { %1497 = vrot.lane.b32.xlu1 %v5199_v23, %s4894_s9 }
 0x357   : > { %1495 = vrot.lane.b32.xlu1 %v5199_v23, %s4895_s18 }
 0x35b   : > { %1545 = vrot.lane.b32.xlu1 %v5203_v26, %s4895_s18 }
 0x3c7   : > { %v1388_v10 = vpop.xlane.xlu0 %1387 }
 0x3c8   : > { %4763 = vrcp.f32 %v1388_v10 }
 0x3cb   : > { %v1548_v25 = vpop.permute.xlu0 %1547 }
 0x3cc   : > { %v1553_v28 = vsel %vm1274_vm3, %v1548_v25, 0 }
 0x3cf   : > { %v1391_v12 = vpop.xlane.xlu1 %1390 }
 0x3d0   : > { %4765 = vrcp.f32 %v1391_v12 }
 0x3d2   : > { %v4764_v13 = vpop.eup %4763 }
 0x3d3   : > { %v1394_v14 = vmul.f32 %v4764_v13, %v4760_v6  ;;  %v1498_v21 = vpop.permute.xlu1 %1497 }
 0x3d4   : > { %v1503_v24 = vsel %vm1274_vm3, %v1498_v21, 0 }
 0x3d5   : > { %v1396_v17 = vpack.c.bf16 %v1394_v14, %v1394_v14 }
 0x3d7   : > { %4418 = vmatmul.mubr.msk.bf16.vlgmr.msra.gmra.mrb[8].mxu1 %vm1274_vm3, %v1396_v17  ;;  %v1496_v27 = vpop.permute.xlu1 %1495 }
 0x3d8   : > { %4422 = vmatpush3.bf16.msra.mxu1 %v1453_v18  ;;  %4423 = vmatprep.mubr.msk.bf16.mxu1 %vm4890_vm2, %v4889_v3 }
 0x3d9   : > { %4427 = vmatprep.subr.bf16.mxu1 %v4889_v3 }
 0x3da   : > { %v4766_v19 = vpop.eup %4765 }
 0x3db   : > { %v1395_v20 = vmul.f32 %v4766_v19, %v4762_v8  ;;  %v1546_v29 = vpop.permute.xlu1 %1545 }
 0x3dd   : > { %v1397_v22 = vpack.c.bf16 %v1395_v20, %v1395_v20 }
 0x3df   : > { %4424 = vmatmul.mubr.msk.bf16.vlgmr.msra.gmra.mrb[12].mxu1 %vm1274_vm3, %v1397_v22 }
 0x3e0   : > { %4429 = vmatprep.mubr.msk.bf16.mxu1 %vm4890_vm2, %v4889_v3 }
 0x3e1   : > { %4428 = vmatpush3.bf16.xpose.msra.mxu1 %v1503_v24 }
 0x3e2   : > { %4433 = vmatprep.subr.bf16.mxu1 %v4889_v3 }
 0x3e8   : > { %4430 = vmatmul.mubr.msk.bf16.vlgmr.msra.gmra.mrb[16].mxu1 %vm1274_vm3, %v1496_v27 }
 0x3e9   : > { %4434 = vmatpush3.bf16.xpose.msra.mxu1 %v1553_v28  ;;  %4435 = vmatprep.mubr.msk.bf16.mxu1 %vm4890_vm2, %v4889_v3 }
 0x3ea   : > { %4445 = vmatprep.subr.bf16.mxu1 %v4889_v3 }
 0x3f0   : > { %4436 = vmatmul.mubr.msk.bf16.vlgmr.msra.gmra.mrb[20].mxu1 %vm1274_vm3, %v1546_v29 }
 0x3f1   : > { %4447 = vmatprep.mubr.msk.bf16.mxu1 %vm4890_vm2, %v4889_v3 }
 0x4aa   : > { %v5273_v30 = vpop.f32.mrb[8].mxu1 }
 0x4ab   : > { %v4419_v31 = vpop.f32.mrb[9].mxu1 }
 0x4ac   : > { %v1444_v32 = vpop.f32.mrb[10].mxu1 }
 0x4ad   : > { %v4420_v33 = vpop.f32.mrb[11].mxu1 }
 0x4b2   : > { %v5275_v34 = vpop.f32.mrb[12].mxu1 }
 0x4b3   : > { %v4425_v35 = vpop.f32.mrb[13].mxu1 }
 0x4b4   : > { %v1492_v37 = vpop.f32.mrb[14].mxu1 }
 0x4b5   : > { %v4426_v38 = vpop.f32.mrb[15].mxu1 }
 0x4bb   : > { %v1539_v40 = vpop.f32.mrb[16].mxu1 }
 0x4bc   : > { %v1595_v41 = vmul.f32 0.35355338, %v1539_v40  ;;  %v4431_v42 = vpop.f32.mrb[17].mxu1 }
 0x4bd   : > { %v1542_v44 = vpop.f32.mrb[18].mxu1 }
 0x4be   : > { %v4432_v45 = vpop.f32.mrb[19].mxu1  ;;  %v1597_v46 = vadd.f32 %v1595_v41, %v5231_v43 }
 0x4c0   : > { %v1599_v47 = vsel %vm1274_vm3, %v1597_v46, -inf }
 0x4c1   : > { %1600 = vmax.xlane.f32.xlu1 %v1599_v47 }
 0x4c3   : > { %v1589_v48 = vpop.f32.mrb[20].mxu1 }
 0x4c4   : > { %v1596_v49 = vmul.f32 0.35355338, %v1589_v48  ;;  %v4437_v50 = vpop.f32.mrb[21].mxu1 }
 0x4c5   : > { %v1592_v51 = vpop.f32.mrb[22].mxu1 }
 0x4c6   : > { %v4438_v52 = vpop.f32.mrb[23].mxu1  ;;  %v1598_v54 = vadd.f32 %v1596_v49, %v5237_v53 }
 0x4c8   : > { %v1602_v55 = vsel %vm1274_vm3, %v1598_v54, -inf }
 0x4c9   : > { %1603 = vmax.xlane.f32.xlu0 %v1602_v55 }
 0x4d2   : > { %1623 = vrot.lane.b32.xlu1 %v5199_v23, %s4896_s26 }
 0x4d6   : > { %1721 = vrot.lane.b32.xlu1 %v5199_v23, %s4897_s25 }
 0x4df   : > { %1671 = vrot.lane.b32.xlu0 %v5203_v26, %s4896_s26  ;;  %s4905_s26 = smov 24  }
 0x4e3   : > { %1719 = vrot.lane.b32.xlu0 %v5199_v23, %s4898_s24 }
 0x54e   : > { %v1601_v56 = vpop.xlane.xlu1 %1600 }
 0x54f   : > { %v1605_v57 = vsub.f32 %v1597_v46, %v1601_v56 }
 0x551   : > { %v1607_v58 = vmul.f32 1.442695, %v1605_v57 }
 0x552   : > { %v1624_v59 = vpop.permute.xlu1 %1623 }
 0x553   : > { %4767 = vpow2.f32 %v1607_v58  ;;  %v1629_v60 = vsel %vm1403_vm4, %v1624_v59, 0 }
 0x554   : > { %4440 = vmatpush3.bf16.msra.mxu0 %v1629_v60 }
 0x555   : > { %4451 = vmatprep.subr.bf16.mxu0 %v4889_v3 }
 0x556   : > { %v1604_v61 = vpop.xlane.xlu0 %1603  ;;  %v1722_v7 = vpop.permute.xlu1 %1721 }
 0x557   : > { %v1606_v62 = vsub.f32 %v1598_v54, %v1604_v61  ;;  %v1727_v13 = vsel %vm1274_vm3, %v1722_v7, 0 }
 0x559   : > { %v1609_v63 = vmul.f32 1.442695, %v1606_v62 }
 0x55a   : > { %v1672_v0 = vpop.permute.xlu0 %1671 }
 0x55b   : > { %4769 = vpow2.f32 %v1609_v63  ;;  %v1677_v1 = vsel %vm1403_vm4, %v1672_v0, 0 }
 0x55c   : > { %4446 = vmatpush3.bf16.msra.mxu1 %v1677_v1 }
 0x55d   : > { %v4768_v2 = vpop.eup %4767  ;;  %4457 = vmatprep.subr.bf16.mxu1 %v4889_v3 }
 0x55e   : > { %v1611_v4 = vsel %vm1274_vm3, %v4768_v2, 0.0  ;;  %v1720_v20 = vpop.permute.xlu0 %1719 }
 0x55f   : > { %1612 = vadd.xlane.f32.xlu1 %v1611_v4 }
 0x565   : > { %v4770_v5 = vpop.eup %4769 }
 0x566   : > { %v1614_v6 = vsel %vm1274_vm3, %v4770_v5, 0.0 }
 0x567   : > { %1615 = vadd.xlane.f32.xlu1 %v1614_v6 }
 0x578   : > { %1771 = vrot.lane.b32.xlu1 %v5203_v26, %s4897_s25 }
 0x57c   : > { %1769 = vrot.lane.b32.xlu1 %v5203_v26, %s4898_s24 }
 0x5ec   : > { %v1613_v8 = vpop.xlane.xlu1 %1612 }
 0x5ed   : > { %4771 = vrcp.f32 %v1613_v8 }
 0x5f4   : > { %v1616_v9 = vpop.xlane.xlu1 %1615 }
 0x5f5   : > { %4773 = vrcp.f32 %v1616_v9 }
 0x5f7   : > { %v4772_v10 = vpop.eup %4771 }
 0x5f8   : > { %v1619_v11 = vmul.f32 %v4772_v10, %v4768_v2  ;;  %v1772_v18 = vpop.permute.xlu1 %1771 }
 0x5f9   : > { %v1777_v21 = vsel %vm1274_vm3, %v1772_v18, 0 }
 0x5fa   : > { %v1621_v12 = vpack.c.bf16 %v1619_v11, %v1619_v11 }
 0x5fc   : > { %4442 = vmatmul.mubr.msk.bf16.vlgmr.msra.gmra.mrb[4].mxu0 %vm1274_vm3, %v1621_v12  ;;  %v1770_v22 = vpop.permute.xlu1 %1769 }
 0x5fd   : > { %4452 = vmatpush3.bf16.xpose.msra.mxu0 %v1727_v13  ;;  %4453 = vmatprep.mubr.msk.bf16.mxu0 %vm4890_vm2, %v4889_v3 }
 0x5fe   : > { %4463 = vmatprep.subr.bf16.mxu0 %v4889_v3 }
 0x5ff   : > { %v4774_v14 = vpop.eup %4773 }
 0x600   : > { %v1620_v17 = vmul.f32 %v4774_v14, %v4770_v5 }
 0x602   : > { %v1622_v19 = vpack.c.bf16 %v1620_v17, %v1620_v17 }
 0x604   : > { %4448 = vmatmul.mubr.msk.bf16.vlgmr.msra.gmra.mrb[24].mxu1 %vm1274_vm3, %v1622_v19  ;;  %4454 = vmatmul.mubr.msk.bf16.vlgmr.msra.gmra.mrb[8].mxu0 %vm1274_vm3, %v1720_v20 }
 0x605   : > { %4458 = vmatpush3.bf16.xpose.msra.mxu1 %v1777_v21  ;;  %4459 = vmatprep.mubr.msk.bf16.mxu1 %vm4890_vm2, %v4889_v3 }
 0x606   : > { %4469 = vmatprep.subr.bf16.mxu1 %v4889_v3  ;;  %4465 = vmatprep.mubr.msk.bf16.mxu0 %vm4890_vm2, %v4889_v3 }
 0x60c   : > { %4460 = vmatmul.mubr.msk.bf16.vlgmr.msra.gmra.mrb[28].mxu1 %vm1274_vm3, %v1770_v22 }
 0x60d   : > { %4471 = vmatprep.mubr.msk.bf16.mxu1 %vm4890_vm2, %v4889_v3 }
 0x6cf   : > { %v5313_v24 = vpop.f32.mrb[4].mxu0 }
 0x6d0   : > { %v4443_v25 = vpop.f32.mrb[5].mxu0 }
 0x6d1   : > { %v1668_v27 = vpop.f32.mrb[6].mxu0 }
 0x6d2   : > { %v4444_v28 = vpop.f32.mrb[7].mxu0 }
 0x6d7   : > { %v5315_v29 = vpop.f32.mrb[24].mxu1  ;;  %v1763_v31 = vpop.f32.mrb[8].mxu0 }
 0x6d8   : > { %v4707_v32 = vpack.i.bf16 %v5315_v29, %v5313_v24  ;;  %v1819_v33 = vmul.f32 0.35355338, %v1763_v31  ;;  %v4449_v35 = vpop.f32.mrb[25].mxu1  ;;  %v4455_v37 = vpop.f32.mrb[9].mxu0 }
 0x6d9   : > { %v1716_v38 = vpop.f32.mrb[26].mxu1  ;;  %v1766_v40 = vpop.f32.mrb[10].mxu0 }
 0x6da   : > { %v4450_v41 = vpop.f32.mrb[27].mxu1  ;;  %v4456_v42 = vpop.f32.mrb[11].mxu0  ;;  %v1821_v44 = vadd.f32 %v1819_v33, %v5231_v43 }
 0x6dc   : > { %v1823_v45 = vsel %vm1274_vm3, %v1821_v44, -inf }
 0x6dd   : > { %1824 = vmax.xlane.f32.xlu0 %v1823_v45 }
 0x6df   : > { %v1813_v46 = vpop.f32.mrb[28].mxu1 }
 0x6e0   : > { %v1820_v47 = vmul.f32 0.35355338, %v1813_v46  ;;  %v4461_v48 = vpop.f32.mrb[29].mxu1 }
 0x6e1   : > { %v1816_v49 = vpop.f32.mrb[30].mxu1 }
 0x6e2   : > { %v4462_v50 = vpop.f32.mrb[31].mxu1  ;;  %v1822_v51 = vadd.f32 %v1820_v47, %v5237_v53 }
 0x6e4   : > { %v1826_v52 = vsel %vm1274_vm3, %v1822_v51, -inf }
 0x6e5   : > { %1827 = vmax.xlane.f32.xlu1 %v1826_v52 }
 0x6f6   : > { %1847 = vrot.lane.b32.xlu1 %v5199_v23, %s4899_s5 }
 0x6fa   : > { %1945 = vrot.lane.b32.xlu1 %v5199_v23, %s4900_s4 }
 0x6fe   : > { %1995 = vrot.lane.b32.xlu1 %v5203_v26, %s4900_s4 }
 0x702   : > { %1993 = vrot.lane.b32.xlu1 %v5203_v26, %s4901_s28 }
 0x76a   : > { %v1825_v54 = vpop.xlane.xlu0 %1824 }
 0x76b   : > { %v1829_v55 = vsub.f32 %v1821_v44, %v1825_v54 }
 0x76d   : > { %v1831_v56 = vmul.f32 1.442695, %v1829_v55 }
 0x76f   : > { %4775 = vpow2.f32 %v1831_v56 }
 0x772   : > { %v1828_v57 = vpop.xlane.xlu1 %1827 }
 0x773   : > { %v1830_v58 = vsub.f32 %v1822_v51, %v1828_v57 }
 0x775   : > { %v1833_v59 = vmul.f32 1.442695, %v1830_v58 }
 0x776   : > { %v1848_v60 = vpop.permute.xlu1 %1847 }
 0x777   : > { %4777 = vpow2.f32 %v1833_v59  ;;  %v1853_v61 = vsel %vm1403_vm4, %v1848_v60, 0 }
 0x778   : > { %4464 = vmatpush3.bf16.msra.mxu0 %v1853_v61 }
 0x779   : > { %v4776_v62 = vpop.eup %4775  ;;  %4475 = vmatprep.subr.bf16.mxu0 %v4889_v3 }
 0x77a   : > { %v1835_v63 = vsel %vm1274_vm3, %v4776_v62, 0.0  ;;  %v1946_v8 = vpop.permute.xlu1 %1945 }
 0x77b   : > { %1836 = vadd.xlane.f32.xlu0 %v1835_v63  ;;  %v1951_v11 = vsel %vm1274_vm3, %v1946_v8, 0 }
 0x77e   : > { %v1996_v14 = vpop.permute.xlu1 %1995 }
 0x77f   : > { %v2001_v19 = vsel %vm1274_vm3, %v1996_v14, 0 }
 0x781   : > { %v4778_v0 = vpop.eup %4777 }
 0x782   : > { %v1838_v1 = vsel %vm1274_vm3, %v4778_v0, 0.0  ;;  %v1994_v20 = vpop.permute.xlu1 %1993 }
 0x783   : > { %1839 = vadd.xlane.f32.xlu0 %v1838_v1 }
 0x799   : > { %1895 = vrot.lane.b32.xlu0 %v5203_v26, %s4899_s5 }
 0x79d   : > { %1943 = vrot.lane.b32.xlu0 %v5199_v23, %s4901_s28 }
 0x808   : > { %v1837_v2 = vpop.xlane.xlu0 %1836 }
 0x809   : > { %4779 = vrcp.f32 %v1837_v2 }
 0x810   : > { %v1840_v4 = vpop.xlane.xlu0 %1839 }
 0x811   : > { %4781 = vrcp.f32 %v1840_v4 }
 0x813   : > { %v4780_v5 = vpop.eup %4779 }
 0x814   : > { %v1843_v6 = vmul.f32 %v4780_v5, %v4776_v62  ;;  %v1896_v7 = vpop.permute.xlu0 %1895 }
 0x815   : > { %v1901_v9 = vsel %vm1403_vm4, %v1896_v7, 0  ;;  %v4743_v7 = vld [vmem:[%s5874_s2] sm:$0xff]  }
 0x816   : > { %4470 = vmatpush3.bf16.msra.mxu1 %v1901_v9  ;;  %v1845_v10 = vpack.c.bf16 %v1843_v6, %v1843_v6  ;;  %v2225_v8 = vsel %vm1169_vm1, %v4743_v7, 0  ;;  %v4744_v9 = vld [vmem:[%s5874_s2 + $0x8] sm:$0xff]   ;;  %s5875_s2 = sld [smem:[#allocation18_spill]] }
 0x817   : > { %4481 = vmatprep.subr.bf16.mxu1 %v4889_v3 }
 0x818   : > { %4466 = vmatmul.mubr.msk.bf16.vlgmr.msra.gmra.mrb[12].mxu0 %vm1274_vm3, %v1845_v10  ;;  %v1944_v18 = vpop.permute.xlu0 %1943  ;;  %v2228_v10 = vsel %vm1169_vm1, %v4744_v9, 0  ;;  %v4750_v9 = vld [vmem:[%s5095_s30 + $0x8] sm:$0xff]  }
 0x819   : > { %4476 = vmatpush3.bf16.xpose.msra.mxu0 %v1951_v11  ;;  %4477 = vmatprep.mubr.msk.bf16.mxu0 %vm4890_vm2, %v4889_v3 }
 0x81a   : > { %4487 = vmatprep.subr.bf16.mxu0 %v4889_v3 }
 0x81b   : > { %v4782_v12 = vpop.eup %4781 }
 0x81c   : > { %v1844_v13 = vmul.f32 %v4782_v12, %v4778_v0  ;;  %s5876_s19 = scalar_lea.vmem %s5875_s2, %s5062_s8  ;;  %s5891_s2 = sld [smem:[#allocation26_spill]] }
 0x81e   : > { %v1846_v17 = vpack.c.bf16 %v1844_v13, %v1844_v13 }
 0x820   : > { %4472 = vmatmul.mubr.msk.bf16.vlgmr.msra.gmra.mrb[32].mxu1 %vm1274_vm3, %v1846_v17  ;;  %4478 = vmatmul.mubr.msk.bf16.vlgmr.msra.gmra.mrb[16].mxu0 %vm1274_vm3, %v1944_v18 }
 0x821   : > { %4482 = vmatpush3.bf16.xpose.msra.mxu1 %v2001_v19  ;;  %4483 = vmatprep.mubr.msk.bf16.mxu1 %vm4890_vm2, %v4889_v3 }
 0x822   : > { %4493 = vmatprep.subr.bf16.mxu1 %v4889_v3  ;;  %4489 = vmatprep.mubr.msk.bf16.mxu0 %vm4890_vm2, %v4889_v3 }
 0x828   : > { %4484 = vmatmul.mubr.msk.bf16.vlgmr.msra.gmra.mrb[36].mxu1 %vm1274_vm3, %v1994_v20 }
 0x829   : > { %4495 = vmatprep.mubr.msk.bf16.mxu1 %vm4890_vm2, %v4889_v3 }
 0x8eb   : > { %v1889_v21 = vpop.f32.mrb[12].mxu0 }
 0x8ec   : > { %v4467_v22 = vpop.f32.mrb[13].mxu0 }
 0x8ed   : > { %v1892_v25 = vpop.f32.mrb[14].mxu0 }
 0x8ee   : > { %v4468_v27 = vpop.f32.mrb[15].mxu0 }
 0x8f3   : > { %v1937_v28 = vpop.f32.mrb[32].mxu1  ;;  %v1987_v31 = vpop.f32.mrb[16].mxu0 }
 0x8f4   : > { %v4712_v33 = vpack.i.bf16 %v1937_v28, %v1889_v21  ;;  %v2043_v35 = vmul.f32 0.35355338, %v1987_v31  ;;  %v4473_v37 = vpop.f32.mrb[33].mxu1  ;;  %v4479_v38 = vpop.f32.mrb[17].mxu0 }
 0x8f5   : > { %v1940_v40 = vpop.f32.mrb[34].mxu1  ;;  %v1990_v41 = vpop.f32.mrb[18].mxu0 }
 0x8f6   : > { %v4474_v42 = vpop.f32.mrb[35].mxu1  ;;  %v4480_v44 = vpop.f32.mrb[19].mxu0  ;;  %v2045_v45 = vadd.f32 %v2043_v35, %v5231_v43 }
 0x8f8   : > { %v2047_v46 = vsel %vm1274_vm3, %v2045_v45, -inf }
 0x8f9   : > { %2048 = vmax.xlane.f32.xlu0 %v2047_v46 }
 0x8fb   : > { %v2037_v47 = vpop.f32.mrb[36].mxu1 }
 0x8fc   : > { %v2044_v48 = vmul.f32 0.35355338, %v2037_v47  ;;  %v4485_v49 = vpop.f32.mrb[37].mxu1 }
 0x8fd   : > { %v2040_v50 = vpop.f32.mrb[38].mxu1 }
 0x8fe   : > { %v4486_v51 = vpop.f32.mrb[39].mxu1  ;;  %v2046_v52 = vadd.f32 %v2044_v48, %v5237_v53 }
 0x900   : > { %v2050_v54 = vsel %vm1274_vm3, %v2046_v52, -inf }
 0x901   : > { %2051 = vmax.xlane.f32.xlu1 %v2050_v54 }
 0x912   : > { %2071 = vrot.lane.b32.xlu1 %v5199_v23, %s4902_s29 }
 0x916   : > { %4708 = vrot.lane.b32.xlu1 %v4707_v32, %s4903_s1 }
 0x91a   : > { %4713 = vrot.lane.b32.xlu1 %v4712_v33, %s4904_s10 }
 0x986   : > { %v2049_v43 = vpop.xlane.xlu0 %2048 }
 0x987   : > { %v2053_v55 = vsub.f32 %v2045_v45, %v2049_v43 }
 0x989   : > { %v2055_v56 = vmul.f32 1.442695, %v2053_v55 }
 0x98b   : > { %4783 = vpow2.f32 %v2055_v56 }
 0x98e   : > { %v2052_v53 = vpop.xlane.xlu1 %2051 }
 0x98f   : > { %v2054_v57 = vsub.f32 %v2046_v52, %v2052_v53  ;;  %v4745_v53 = vld [vmem:[%s5109_s23] sm:$0xff]  }
 0x991   : > { %v2057_v58 = vmul.f32 1.442695, %v2054_v57  ;;  %v2432_v57 = vsel %vm1169_vm1, %v4745_v53, 0 }
 0x992   : > { %v2072_v59 = vpop.permute.xlu1 %2071 }
 0x993   : > { %4785 = vpow2.f32 %v2057_v58  ;;  %v2077_v23 = vsel %vm1403_vm4, %v2072_v59, 0  ;;  %v4746_v58 = vld [vmem:[%s5109_s23 + $0x8] sm:$0xff]  }
 0x994   : > { %4488 = vmatpush3.bf16.msra.mxu0 %v2077_v23  ;;  %v2435_v59 = vsel %vm1169_vm1, %v4746_v58, 0 }
 0x995   : > { %v4784_v60 = vpop.eup %4783  ;;  %4499 = vmatprep.subr.bf16.mxu0 %v4889_v3 }
 0x996   : > { %v2059_v24 = vsel %vm1274_vm3, %v4784_v60, 0.0  ;;  %v4709_v22 = vpop.permute.xlu1 %4708 }
 0x997   : > { %2060 = vadd.xlane.f32.xlu0 %v2059_v24  ;;  %v4711_v27 = vunpack.i.h.bf16 %v4709_v22  ;;  %v4710_v28 = vunpack.i.l.bf16 %v4709_v22 }
 0x999   : > { %v2192_v37 = vsel %vm1274_vm3, %v5275_v34, %v4711_v27  ;;  %v2191_v38 = vsel %vm1274_vm3, %v5273_v30, %v4710_v28  ;;  %v4213_v30 = vld [vmem:[%s5876_s19] ss:$0 sm:$0xff]  ;;  %s5879_s19 = scalar_lea.vmem %s5878_s3, %s5062_s8  ;;  %s5882_s3 = scalar_lea.vmem %s5806_s14, %s5062_s8 }
 0x99a   : > { %v4714_v25 = vpop.permute.xlu1 %4713  ;;  %v4218_v28 = vld [vmem:[%s5881_s13] ss:$0 sm:$0xff] }
 0x99b   : > { %v4716_v31 = vunpack.i.h.bf16 %v4714_v25  ;;  %v4715_v33 = vunpack.i.l.bf16 %v4714_v25 }
 0x99d   : > { %v4786_v29 = vpop.eup %4785  ;;  %v2195_v42 = vsel %vm2193_vm5, %v2192_v37, %v4716_v31  ;;  %v2194_v44 = vsel %vm2193_vm5, %v2191_v38, %v4715_v33  ;;  %v4223_v38 = vld [vmem:[%s5882_s3] ss:$0 sm:$0xff]  ;;  %s5889_s3 = scalar_lea.vmem %s5812_s20, %s5062_s8 }
 0x99e   : > { %v2062_v32 = vsel %vm1274_vm3, %v4786_v29, 0.0 }
 0x99f   : > { %2063 = vadd.xlane.f32.xlu0 %v2062_v32 }
 0x9b5   : > { %2119 = vrot.lane.b32.xlu0 %v5203_v26, %s4902_s29  ;;  %s5877_s29 = sld [smem:[#allocation11_spill]] }
 0x9bb   : > { %v2319_v7 = vld [vmem:[%s5877_s29 + $0x8] sm:$0xff] }
 0xa24   : > { %v2061_v61 = vpop.xlane.xlu0 %2060 }
 0xa25   : > { %4787 = vrcp.f32 %v2061_v61 }
 0xa2c   : > { %v2064_v62 = vpop.xlane.xlu0 %2063 }
 0xa2d   : > { %4789 = vrcp.f32 %v2064_v62 }
 0xa2f   : > { %v4788_v63 = vpop.eup %4787 }
 0xa30   : > { %v2067_v0 = vmul.f32 %v4788_v63, %v4784_v60  ;;  %v2120_v1 = vpop.permute.xlu0 %2119 }
 0xa31   : > { %v2125_v2 = vsel %vm1403_vm4, %v2120_v1, 0 }
 0xa32   : > { %4494 = vmatpush3.bf16.msra.mxu1 %v2125_v2  ;;  %v2069_v4 = vpack.c.bf16 %v2067_v0, %v2067_v0  ;;  %v4748_v2 = vld [vmem:[%s5109_s23 + $0x18] sm:$0xff]  }
 0xa33   : > { %4507 = vmatprep.subr.bf16.mxu1 %v4889_v3 }
 0xa34   : > { %4490 = vmatmul.mubr.msk.bf16.vlgmr.msra.gmra.mrb[20].mxu0 %vm1274_vm3, %v2069_v4  ;;  %v2441_v4 = vsel %vm1169_vm1, %v4748_v2, 0 }
 0xa35   : > { %4503 = vmatprep.mubr.msk.bf16.mxu0 %vm4890_vm2, %v4889_v3  ;;  %4500 = vmatpush3.bf16.xpose.msra.mxu0 %v2225_v8 }
 0xa36   : > { %4501 = vmatprep.subr.bf16.mxu0 %v4889_v3 }
 0xa37   : > { %v4790_v26 = vpop.eup %4789 }
 0xa38   : > { %v2068_v5 = vmul.f32 %v4790_v26, %v4786_v29  ;;  %v4749_v26 = vld [vmem:[%s5095_s30] sm:$0xff]   ;;  %s5884_s30 = sld [smem:[#allocation13_spill]] }
 0xa3a   : > { %v2070_v6 = vpack.c.bf16 %v2068_v5, %v2068_v5  ;;  %v2346_v5 = vsel %vm1169_vm1, %v4749_v26, 0 }
 0xa3c   : > { %4496 = vmatmul.mubr.msk.bf16.vlgmr.msra.gmra.mrb[40].mxu1 %vm1274_vm3, %v2070_v6  ;;  %v2318_v6 = vld [vmem:[%s5877_s29] sm:$0xff] }
 0xa3d   : > { %4511 = vmatprep.mubr.msk.bf16.mxu1 %vm4890_vm2, %v4889_v3  ;;  %4502 = vmatpush3.bf16.xpose.msra.mxu0 %v2228_v10  ;;  %v2401_v8 = vpack.c.bf16 %v2319_v7, %v2318_v6  ;;  %v2349_v10 = vsel %vm1169_vm1, %v4750_v9, 0 }
 0xa3e   : > { %4515 = vmatprep.subr.bf16.mxu0 %v4889_v3  ;;  %4508 = vmatpush3.bf16.xpose.msra.mxu1 %v2346_v5 }
 0xa3f   : > { %4509 = vmatprep.subr.bf16.mxu1 %v4889_v3 }
 0xa46   : > { %4510 = vmatpush3.bf16.xpose.msra.mxu1 %v2349_v10 }
 0xa47   : > { %4527 = vmatprep.subr.bf16.mxu1 %v4889_v3 }
 0xb07   : > { %v2113_v11 = vpop.f32.mrb[20].mxu0 }
 0xb08   : > { %v4491_v12 = vpop.f32.mrb[21].mxu0 }
 0xb09   : > { %v2116_v13 = vpop.f32.mrb[22].mxu0 }
 0xb0a   : > { %v4492_v14 = vpop.f32.mrb[23].mxu0 }
 0xb0f   : > { %v2161_v17 = vpop.f32.mrb[40].mxu1 }
 0xb10   : > { %v4717_v18 = vpack.i.bf16 %v2161_v17, %v2113_v11  ;;  %v4497_v19 = vpop.f32.mrb[41].mxu1 }
 0xb11   : > { %v2164_v20 = vpop.f32.mrb[42].mxu1 }
 0xb12   : > { %v4498_v21 = vpop.f32.mrb[43].mxu1  ;;  %4718 = vrot.lane.b32.xlu0 %v4717_v18, %s4905_s26  ;;  %v4217_v20 = vld [vmem:[%s5879_s19] ss:$0 sm:$0xff]  ;;  %s5883_s19 = scalar_lea.vmem %s5804_s12, %s5062_s8 }
 0xb84   : > { %v4719_v35 = vpop.permute.xlu0 %4718 }
 0xb85   : > { %v4721_v40 = vunpack.i.h.bf16 %v4719_v35  ;;  %v4720_v41 = vunpack.i.l.bf16 %v4719_v35 }
 0xb87   : > { %v2198_v45 = vsel %vm2196_vm6, %v2195_v42, %v4721_v40  ;;  %v2197_v46 = vsel %vm2196_vm6, %v2194_v44, %v4720_v41 }
 0xb88   : > { %v2204_v47 = vpack.c.bf16 %v2198_v45, %v2197_v46 }
 0xb8a   : > { %4504 = vmatmul.mubr.msk.bf16.vlgmr.msra.gmra.mrb[24].mxu0 %vm1169_vm1, %v2204_v47 }
 0xb8b   : > { %4523 = vmatprep.mubr.msk.bf16.mxu0 %vm4890_vm2, %v4889_v3  ;;  %4516 = vmatpush3.bf16.xpose.msra.mxu0 %v2432_v57  ;;  %v4229_v57 = vld.sshfl [vmem:[%s5884_s30] sm:$0x11 pattern:$0x75316420]  ;;  %s5892_s30 = scalar_lea.vmem %s5891_s2, %s5062_s8 }
 0xb8c   : > { %4517 = vmatprep.subr.bf16.mxu0 %v4889_v3  ;;  %v2500_v58 = vrot.slane %v4229_v57, %v5219_v36 }
 0xb93   : > { %4518 = vmatpush3.bf16.xpose.msra.mxu0 %v2435_v59  ;;  %v5490_v59 = vrot.slane %v2500_v58, %v5225_v39 }
 0xb94   : > { %4519 = vmatprep.subr.bf16.mxu0 %v4889_v3 }
 0xc5d   : > { %v2264_v34 = vpop.f32.mrb[24].mxu0 }
 0xc5e   : > { %v2265_v48 = vadd.f32 %v4213_v30, %v2264_v34  ;;  %v4505_v49 = vpop.f32.mrb[25].mxu0  ;;  %v4219_v34 = vld [vmem:[%s5883_s19] ss:$0 sm:$0xff] }
 0xc5f   : > { %v2267_v50 = vpop.f32.mrb[26].mxu0 }
 0xc60   : > { %v2268_v51 = vadd.f32 %v4213_v30, %v2267_v50  ;;  %v4506_v52 = vpop.f32.mrb[27].mxu0  ;;  %v2271_v54 = vadd.f32 %v2265_v48, %v5184_v15  ;;  %v4747_v15 = vld [vmem:[%s5109_s23 + $0x10] sm:$0xff]  }
 0xc62   : > { %v2275_v43 = vsel %vm1169_vm1, %v2271_v54, 0.0  ;;  %v2272_v55 = vadd.f32 %v2268_v51, %v5186_v16  ;;  %v2438_v16 = vsel %vm1169_vm1, %v4747_v15, 0  ;;  %v2493_v15 = vcombine.high %v4229_v57, %v4229_v57 }
 0xc63   : > { %2276 = vadd.xlane.f32.xlu1 %v2275_v43  ;;  %4520 = vmatpush3.bf16.xpose.msra.mxu0 %v2438_v16 }
 0xc64   : > { %v2278_v56 = vsel %vm1169_vm1, %v2272_v55, 0.0  ;;  %4521 = vmatprep.subr.bf16.mxu0 %v4889_v3 }
 0xc65   : > { %2279 = vadd.xlane.f32.xlu0 %v2278_v56 }
 0xc6b   : > { %4522 = vmatpush3.bf16.xpose.msra.mxu0 %v2441_v4 }
 0xc6c   : > { %4551 = vmatprep.subr.bf16.mxu0 %v4889_v3 }
 0xc72   : > { %4524 = vmatmul.mubr.msk.bf16.vlgmr.msra.gmra.mrb[28].mxu0 %vm1169_vm1, %v2401_v8 }
 0xc73   : > { %4553 = vmatprep.mubr.msk.bf16.mxu0 %vm4890_vm2, %v4889_v3 }
 0xcf0   : > { %v2277_v23 = vpop.xlane.xlu1 %2276 }
 0xcf1   : > { %v2282_v60 = vmul.f32 0.03125, %v2277_v23 }
 0xcf2   : > { %v2280_v24 = vpop.xlane.xlu0 %2279 }
 0xcf3   : > { %v2284_v29 = vsub.f32 %v2271_v54, %v2282_v60  ;;  %v2283_v32 = vmul.f32 0.03125, %v2280_v24 }
 0xcf5   : > { %v2285_v61 = vsub.f32 %v2272_v55, %v2283_v32  ;;  %v2286_v62 = vmul.f32 %v2284_v29, %v2284_v29 }
 0xcf7   : > { %v2288_v63 = vsel %vm1169_vm1, %v2286_v62, 0.0  ;;  %v2287_v0 = vmul.f32 %v2285_v61, %v2285_v61 }
 0xcf8   : > { %2289 = vadd.xlane.f32.xlu0 %v2288_v63 }
 0xcf9   : > { %v2291_v1 = vsel %vm1169_vm1, %v2287_v0, 0.0 }
 0xcfa   : > { %2292 = vadd.xlane.f32.xlu1 %v2291_v1 }
 0xd45   : > { %v2477_v40 = vpop.f32.mrb[28].mxu0 }
 0xd46   : > { %v2478_v41 = vadd.f32 %v4223_v38, %v2477_v40  ;;  %v4525_v42 = vpop.f32.mrb[29].mxu0 }
 0xd47   : > { %v2480_v44 = vpop.f32.mrb[30].mxu0 }
 0xd48   : > { %v5458_v45 = vpack.c.bf16 %v2478_v41, %v2478_v41  ;;  %v2481_v46 = vadd.f32 %v4223_v38, %v2480_v44  ;;  %v4526_v47 = vpop.f32.mrb[31].mxu0 }
 0xd4a   : > { %v2516_v30 = vsel %vm1274_vm3, %v5458_v45, 0  ;;  %v5468_v49 = vpack.c.bf16 %v2481_v46, %v2481_v46 }
 0xd4c   : > { %v2562_v55 = vsel %vm1274_vm3, %v5468_v49, 0 }
 0xd85   : > { %v2290_v11 = vpop.xlane.xlu0 %2289 }
 0xd86   : > { %v2294_v12 = vmul.f32 0.03125, %v2290_v11 }
 0xd87   : > { %v2293_v13 = vpop.xlane.xlu1 %2292 }
 0xd88   : > { %v2296_v14 = vadd.f32 1e-05, %v2294_v12  ;;  %v2295_v17 = vmul.f32 0.03125, %v2293_v13 }
 0xd8a   : > { %4791 = vrsqrt.f32 %v2296_v14  ;;  %v2297_v18 = vadd.f32 1e-05, %v2295_v17 }
 0xd8c   : > { %4793 = vrsqrt.f32 %v2297_v18 }
 0xd94   : > { %v4792_v19 = vpop.eup %4791 }
 0xd95   : > { %v2300_v21 = vmul.f32 %v4792_v19, %v2284_v29 }
 0xd96   : > { %v4794_v22 = vpop.eup %4793 }
 0xd97   : > { %v2308_v25 = vmul.f32 %v4217_v20, %v2300_v21  ;;  %v2301_v27 = vmul.f32 %v4794_v22, %v2285_v61  ;;  %v2507_v61 = vrot.slane %v2493_v15, %v5219_v36 }
 0xd99   : > { %v2309_v31 = vmul.f32 %v4217_v20, %v2301_v27  ;;  %v5444_v33 = vadd.f32 %v4218_v28, %v2308_v25  ;;  %v5496_v63 = vrot.slane %v2507_v61, %v5225_v39 }
 0xd9b   : > { %v5446_v35 = vadd.f32 %v4218_v28, %v2309_v31 }
 0xd9d   : > { %v2325_v37 = vpack.c.bf16 %v5446_v35, %v5444_v33 }
 0xd9f   : > { %4512 = vmatmul.mubr.msk.bf16.vlgmr.msra.gmra.mrb[44].mxu1 %vm1169_vm1, %v2325_v37 }
 0xda0   : > { %4529 = vmatprep.mubr.msk.bf16.mxu1 %vm4890_vm2, %v4889_v3  ;;  %4528 = vmatpush3.bf16.xpose.msra.mxu1 %v2516_v30 }
 0xda1   : > { %4533 = vmatprep.subr.bf16.mxu1 %v4889_v3 }
 0xe72   : > { %v2385_v48 = vpop.f32.mrb[44].mxu1 }
 0xe73   : > { %v2386_v50 = vadd.f32 %v4219_v34, %v2385_v48  ;;  %v4513_v51 = vpop.f32.mrb[45].mxu1 }
 0xe74   : > { %v2388_v52 = vpop.f32.mrb[46].mxu1 }
 0xe75   : > { %v5470_v54 = vpack.c.bf16 %v2386_v50, %v2386_v50  ;;  %v4514_v43 = vpop.f32.mrb[47].mxu1  ;;  %v2389_v56 = vadd.f32 %v4219_v34, %v2388_v52 }
 0xe77   : > { %4530 = vmatmul.mubr.msk.bf16.vlgmr.msra.gmra.mrb[48].mxu1 %vm1274_vm3, %v5470_v54  ;;  %v5479_v53 = vpack.c.bf16 %v2389_v56, %v2389_v56 }
 0xe78   : > { %4534 = vmatpush3.bf16.xpose.msra.mxu1 %v2562_v55  ;;  %4535 = vmatprep.mubr.msk.bf16.mxu1 %vm4890_vm2, %v4889_v3 }
 0xe79   : > { %4539 = vmatprep.subr.bf16.mxu1 %v4889_v3 }
 0xe7f   : > { %4536 = vmatmul.mubr.msk.bf16.vlgmr.msra.gmra.mrb[52].mxu1 %vm1274_vm3, %v5479_v53 }
 0xe80   : > { %4541 = vmatprep.mubr.msk.bf16.mxu1 %vm4890_vm2, %v4889_v3 }
 0xf4a   : > { %v2552_v16 = vpop.f32.mrb[48].mxu1 }
 0xf4b   : > { %v2604_v23 = vmul.f32 0.35355338, %v2552_v16  ;;  %v4531_v60 = vpop.f32.mrb[49].mxu1 }
 0xf4c   : > { %v2555_v24 = vpop.f32.mrb[50].mxu1 }
 0xf4d   : > { %v4532_v29 = vpop.f32.mrb[51].mxu1  ;;  %v2616_v32 = vadd.f32 %v5490_v59, %v2604_v23 }
 0xf4f   : > { %v2618_v62 = vsel %vm1274_vm3, %v2616_v32, -inf }
 0xf50   : > { %2619 = vmax.xlane.f32.xlu0 %v2618_v62 }
 0xf52   : > { %v2598_v0 = vpop.f32.mrb[52].mxu1 }
 0xf53   : > { %v2605_v1 = vmul.f32 0.35355338, %v2598_v0  ;;  %v4537_v2 = vpop.f32.mrb[53].mxu1 }
 0xf54   : > { %v2601_v4 = vpop.f32.mrb[54].mxu1 }
 0xf55   : > { %v4538_v26 = vpop.f32.mrb[55].mxu1  ;;  %v2617_v5 = vadd.f32 %v5496_v63, %v2605_v1 }
 0xf57   : > { %v2621_v6 = vsel %vm1274_vm3, %v2617_v5, -inf }
 0xf58   : > { %2622 = vmax.xlane.f32.xlu1 %v2621_v6 }
 0xf69   : > { %2692 = vrot.lane.b32.xlu1 %v5468_v49, %s4891_s27 }
 0xfdd   : > { %v2620_v36 = vpop.xlane.xlu0 %2619 }
 0xfde   : > { %v2624_v7 = vsub.f32 %v2616_v32, %v2620_v36 }
 0xfe0   : > { %v2626_v8 = vmul.f32 1.442695, %v2624_v7 }
 0xfe2   : > { %4795 = vpow2.f32 %v2626_v8 }
 0xfe5   : > { %v2623_v9 = vpop.xlane.xlu1 %2622 }
 0xfe6   : > { %v2625_v39 = vsub.f32 %v2617_v5, %v2623_v9 }
 0xfe8   : > { %v2628_v10 = vmul.f32 1.442695, %v2625_v39 }
 0xfe9   : > { %v2693_v18 = vpop.permute.xlu1 %2692 }
 0xfea   : > { %4797 = vpow2.f32 %v2628_v10  ;;  %v2698_v37 = vsel %vm1403_vm4, %v2693_v18, 0 }
 0xfec   : > { %v4796_v11 = vpop.eup %4795 }
 0xfed   : > { %v2630_v12 = vsel %vm1274_vm3, %v4796_v11, 0.0 }
 0xfee   : > { %2631 = vadd.xlane.f32.xlu0 %v2630_v12 }
 0xff4   : > { %v4798_v13 = vpop.eup %4797 }
 0xff5   : > { %v2633_v14 = vsel %vm1274_vm3, %v4798_v13, 0.0 }
 0xff6   : > { %2634 = vadd.xlane.f32.xlu1 %v2633_v14 }
0x1004   : > { %2643 = vrot.lane.b32.xlu0 %v5458_v45, %s4891_s27 }
0x1007   : > { %2743 = vrot.lane.b32.xlu1 %v5458_v45, %s4895_s18 }
0x1008   : > { %2794 = vrot.lane.b32.xlu0 %v5468_v49, %s4895_s18 }
0x100b   : > { %2741 = vrot.lane.b32.xlu1 %v5470_v54, %s4895_s18 }
0x100c   : > { %2792 = vrot.lane.b32.xlu0 %v5479_v53, %s4895_s18  ;;  %s5895_s18 = sld [smem:[#allocation7_spill]] }
0x1012   : > { %p4264_p5 = scmp.ne.s32.totalorder %s5895_s18, 1 }
0x1013   : > { %vm4907_vm8 = vmmov (!%p4264_p5), 0  }
0x107b   : > { %v2632_v17 = vpop.xlane.xlu0 %2631 }
0x107c   : > { %4799 = vrcp.f32 %v2632_v17 }
0x107f   : > { %v2644_v19 = vpop.permute.xlu0 %2643 }
0x1080   : > { %v2649_v20 = vsel %vm1403_vm4, %v2644_v19, 0 }
0x1081   : > { %4540 = vmatpush3.bf16.msra.mxu1 %v2649_v20 }
0x1082   : > { %4545 = vmatprep.subr.bf16.mxu1 %v4889_v3 }
0x1083   : > { %v2635_v21 = vpop.xlane.xlu1 %2634  ;;  %v2795_v42 = vpop.permute.xlu0 %2794 }
0x1084   : > { %4801 = vrcp.f32 %v2635_v21  ;;  %v2800_v46 = vsel %vm1274_vm3, %v2795_v42, 0 }
0x1086   : > { %v4800_v22 = vpop.eup %4799 }
0x1087   : > { %v2638_v25 = vmul.f32 %v4800_v22, %v4796_v11  ;;  %v2744_v27 = vpop.permute.xlu1 %2743  ;;  %v2793_v47 = vpop.permute.xlu0 %2792 }
0x1088   : > { %v2749_v28 = vsel %vm1274_vm3, %v2744_v27, 0 }
0x1089   : > { %4552 = vmatpush3.bf16.xpose.msra.mxu0 %v2749_v28  ;;  %v2640_v31 = vpack.c.bf16 %v2638_v25, %v2638_v25 }
0x108a   : > { %4563 = vmatprep.subr.bf16.mxu0 %v4889_v3 }
0x108b   : > { %4542 = vmatmul.mubr.msk.bf16.vlgmr.msra.gmra.mrb[56].mxu1 %vm1274_vm3, %v2640_v31  ;;  %v2742_v41 = vpop.permute.xlu1 %2741 }
0x108c   : > { %4546 = vmatpush3.bf16.msra.mxu1 %v2698_v37  ;;  %4547 = vmatprep.mubr.msk.bf16.mxu1 %vm4890_vm2, %v4889_v3 }
0x108d   : > { %4557 = vmatprep.subr.bf16.mxu1 %v4889_v3 }
0x108e   : > { %v4802_v38 = vpop.eup %4801 }
0x108f   : > { %v2639_v40 = vmul.f32 %v4802_v38, %v4798_v13 }
0x1090   : > { %4554 = vmatmul.mubr.msk.bf16.vlgmr.msra.gmra.mrb[32].mxu0 %vm1274_vm3, %v2742_v41 }
0x1091   : > { %v2641_v44 = vpack.c.bf16 %v2639_v40, %v2639_v40  ;;  %4565 = vmatprep.mubr.msk.bf16.mxu0 %vm4890_vm2, %v4889_v3 }
0x1093   : > { %4548 = vmatmul.mubr.msk.bf16.vlgmr.msra.gmra.mrb[60].mxu1 %vm1274_vm3, %v2641_v44 }
0x1094   : > { %4559 = vmatprep.mubr.msk.bf16.mxu1 %vm4890_vm2, %v4889_v3 }
0x1095   : > { %4558 = vmatpush3.bf16.xpose.msra.mxu1 %v2800_v46 }
0x1096   : > { %4569 = vmatprep.subr.bf16.mxu1 %v4889_v3 }
0x109c   : > { %4560 = vmatmul.mubr.msk.bf16.vlgmr.msra.gmra.mrb[64].mxu1 %vm1274_vm3, %v2793_v47 }
0x109d   : > { %4571 = vmatprep.mubr.msk.bf16.mxu1 %vm4890_vm2, %v4889_v3 }
0x115e   : > { %v5534_v30 = vpop.f32.mrb[56].mxu1 }
0x115f   : > { %v4543_v34 = vpop.f32.mrb[57].mxu1 }
0x1160   : > { %v2688_v48 = vpop.f32.mrb[58].mxu1 }
0x1161   : > { %v4544_v50 = vpop.f32.mrb[59].mxu1 }
0x1163   : > { %v2785_v51 = vpop.f32.mrb[32].mxu0 }
0x1164   : > { %v2842_v52 = vmul.f32 0.35355338, %v2785_v51  ;;  %v4555_v43 = vpop.f32.mrb[33].mxu0 }
0x1165   : > { %v2788_v55 = vpop.f32.mrb[34].mxu0 }
0x1166   : > { %v5536_v56 = vpop.f32.mrb[60].mxu1  ;;  %v4556_v57 = vpop.f32.mrb[35].mxu0  ;;  %v2844_v58 = vadd.f32 %v2842_v52, %v5490_v59 }
0x1167   : > { %v4549_v15 = vpop.f32.mrb[61].mxu1 }
0x1168   : > { %v2737_v16 = vpop.f32.mrb[62].mxu1  ;;  %v2846_v23 = vsel %vm1274_vm3, %v2844_v58, -inf }
0x1169   : > { %v4550_v60 = vpop.f32.mrb[63].mxu1  ;;  %2847 = vmax.xlane.f32.xlu1 %v2846_v23 }
0x116f   : > { %v2836_v24 = vpop.f32.mrb[64].mxu1 }
0x1170   : > { %v2843_v29 = vmul.f32 0.35355338, %v2836_v24  ;;  %v4561_v32 = vpop.f32.mrb[65].mxu1 }
0x1171   : > { %v2839_v61 = vpop.f32.mrb[66].mxu1 }
0x1172   : > { %v4562_v62 = vpop.f32.mrb[67].mxu1  ;;  %v2845_v0 = vadd.f32 %v2843_v29, %v5496_v63 }
0x1174   : > { %v2849_v1 = vsel %vm1274_vm3, %v2845_v0, -inf }
0x1175   : > { %2850 = vmax.xlane.f32.xlu0 %v2849_v1 }
0x117a   : > { %2918 = vrot.lane.b32.xlu1 %v5468_v49, %s4894_s9 }
0x11f6   : > { %v2848_v2 = vpop.xlane.xlu1 %2847 }
0x11f7   : > { %v2852_v4 = vsub.f32 %v2844_v58, %v2848_v2 }
0x11f9   : > { %v2854_v26 = vmul.f32 1.442695, %v2852_v4 }
0x11fa   : > { %v2919_v5 = vpop.permute.xlu1 %2918 }
0x11fb   : > { %4803 = vpow2.f32 %v2854_v26  ;;  %v2924_v6 = vsel %vm1403_vm4, %v2919_v5, 0 }
0x11fc   : > { %4570 = vmatpush3.bf16.msra.mxu1 %v2924_v6 }
0x11fd   : > { %4581 = vmatprep.subr.bf16.mxu1 %v4889_v3 }
0x1202   : > { %v2851_v36 = vpop.xlane.xlu0 %2850 }
0x1203   : > { %v2853_v7 = vsub.f32 %v2845_v0, %v2851_v36 }
0x1205   : > { %v4804_v8 = vpop.eup %4803  ;;  %v2856_v9 = vmul.f32 1.442695, %v2853_v7 }
0x1206   : > { %v2858_v39 = vsel %vm1274_vm3, %v4804_v8, 0.0 }
0x1207   : > { %4805 = vpow2.f32 %v2856_v9  ;;  %2859 = vadd.xlane.f32.xlu0 %v2858_v39 }
0x1211   : > { %v4806_v10 = vpop.eup %4805 }
0x1212   : > { %v2861_v11 = vsel %vm1274_vm3, %v4806_v10, 0.0 }
0x1213   : > { %2862 = vadd.xlane.f32.xlu1 %v2861_v11 }
0x121d   : > { %2870 = vrot.lane.b32.xlu0 %v5458_v45, %s4894_s9  ;;  %s5885_s9 = scalar_lea.vmem %s5808_s16, %s5062_s8 }
0x1221   : > { %3018 = vrot.lane.b32.xlu0 %v5468_v49, %s4898_s24 }
0x1224   : > { %2968 = vrot.lane.b32.xlu1 %v5458_v45, %s4898_s24 }
0x1225   : > { %3016 = vrot.lane.b32.xlu0 %v5479_v53, %s4898_s24 }
0x1228   : > { %2966 = vrot.lane.b32.xlu1 %v5470_v54, %s4898_s24 }
0x1294   : > { %v2860_v12 = vpop.xlane.xlu0 %2859 }
0x1295   : > { %4807 = vrcp.f32 %v2860_v12 }
0x1298   : > { %v2871_v13 = vpop.permute.xlu0 %2870 }
0x1299   : > { %v2876_v14 = vsel %vm1403_vm4, %v2871_v13, 0 }
0x129a   : > { %4564 = vmatpush3.bf16.msra.mxu0 %v2876_v14 }
0x129b   : > { %4575 = vmatprep.subr.bf16.mxu0 %v4889_v3 }
0x129c   : > { %v3019_v31 = vpop.permute.xlu0 %3018 }
0x129d   : > { %v3024_v38 = vsel %vm1274_vm3, %v3019_v31, 0 }
0x129f   : > { %v4808_v17 = vpop.eup %4807 }
0x12a0   : > { %v2866_v18 = vmul.f32 %v4808_v17, %v4804_v8  ;;  %v2863_v19 = vpop.xlane.xlu1 %2862  ;;  %v3017_v40 = vpop.permute.xlu0 %3016 }
0x12a1   : > { %4809 = vrcp.f32 %v2863_v19 }
0x12a2   : > { %v2868_v20 = vpack.c.bf16 %v2866_v18, %v2866_v18 }
0x12a4   : > { %v2969_v21 = vpop.permute.xlu1 %2968  ;;  %4566 = vmatmul.mubr.msk.bf16.vlgmr.msra.gmra.mrb[36].mxu0 %vm1274_vm3, %v2868_v20 }
0x12a5   : > { %v2974_v22 = vsel %vm1274_vm3, %v2969_v21, 0  ;;  %4577 = vmatprep.mubr.msk.bf16.mxu0 %vm4890_vm2, %v4889_v3 }
0x12a6   : > { %4576 = vmatpush3.bf16.xpose.msra.mxu0 %v2974_v22 }
0x12a7   : > { %4587 = vmatprep.subr.bf16.mxu0 %v4889_v3 }
0x12a8   : > { %v2967_v28 = vpop.permute.xlu1 %2966 }
0x12ab   : > { %v4810_v25 = vpop.eup %4809 }
0x12ac   : > { %v2867_v27 = vmul.f32 %v4810_v25, %v4806_v10 }
0x12ad   : > { %4578 = vmatmul.mubr.msk.bf16.vlgmr.msra.gmra.mrb[40].mxu0 %vm1274_vm3, %v2967_v28 }
0x12ae   : > { %v2869_v37 = vpack.c.bf16 %v2867_v27, %v2867_v27  ;;  %4589 = vmatprep.mubr.msk.bf16.mxu0 %vm4890_vm2, %v4889_v3 }
0x12b0   : > { %4572 = vmatmul.mubr.msk.bf16.vlgmr.msra.gmra.mrb[68].mxu1 %vm1274_vm3, %v2869_v37 }
0x12b1   : > { %4582 = vmatpush3.bf16.xpose.msra.mxu1 %v3024_v38  ;;  %4583 = vmatprep.mubr.msk.bf16.mxu1 %vm4890_vm2, %v4889_v3 }
0x12b2   : > { %4593 = vmatprep.subr.bf16.mxu1 %v4889_v3 }
0x12b8   : > { %4584 = vmatmul.mubr.msk.bf16.vlgmr.msra.gmra.mrb[72].mxu1 %vm1274_vm3, %v3017_v40 }
0x12b9   : > { %4595 = vmatprep.mubr.msk.bf16.mxu1 %vm4890_vm2, %v4889_v3 }
0x1377   : > { %v5576_v41 = vpop.f32.mrb[36].mxu0 }
0x1378   : > { %v4567_v42 = vpop.f32.mrb[37].mxu0 }
0x1379   : > { %v2915_v44 = vpop.f32.mrb[38].mxu0 }
0x137a   : > { %v4568_v46 = vpop.f32.mrb[39].mxu0 }
0x1380   : > { %v3010_v47 = vpop.f32.mrb[40].mxu0 }
0x1381   : > { %v3066_v34 = vmul.f32 0.35355338, %v3010_v47  ;;  %v4579_v48 = vpop.f32.mrb[41].mxu0 }
0x1382   : > { %v3013_v50 = vpop.f32.mrb[42].mxu0 }
0x1383   : > { %v5578_v51 = vpop.f32.mrb[68].mxu1  ;;  %v4580_v52 = vpop.f32.mrb[43].mxu0  ;;  %v3068_v43 = vadd.f32 %v3066_v34, %v5490_v59 }
0x1384   : > { %v4722_v55 = vpack.i.bf16 %v5578_v51, %v5576_v41  ;;  %v4573_v57 = vpop.f32.mrb[69].mxu1 }
0x1385   : > { %v2963_v58 = vpop.f32.mrb[70].mxu1  ;;  %v3070_v15 = vsel %vm1274_vm3, %v3068_v43, -inf }
0x1386   : > { %v4574_v16 = vpop.f32.mrb[71].mxu1  ;;  %3071 = vmax.xlane.f32.xlu1 %v3070_v15 }
0x138b   : > { %v3060_v23 = vpop.f32.mrb[72].mxu1 }
0x138c   : > { %v3067_v60 = vmul.f32 0.35355338, %v3060_v23  ;;  %v4585_v24 = vpop.f32.mrb[73].mxu1 }
0x138d   : > { %v3063_v29 = vpop.f32.mrb[74].mxu1 }
0x138e   : > { %v4586_v32 = vpop.f32.mrb[75].mxu1  ;;  %v3069_v61 = vadd.f32 %v3067_v60, %v5496_v63 }
0x1390   : > { %v3073_v62 = vsel %vm1274_vm3, %v3069_v61, -inf }
0x1391   : > { %3074 = vmax.xlane.f32.xlu0 %v3073_v62 }
0x1397   : > { %3142 = vrot.lane.b32.xlu1 %v5468_v49, %s4897_s25 }
0x1413   : > { %v3072_v0 = vpop.xlane.xlu1 %3071 }
0x1414   : > { %v3076_v1 = vsub.f32 %v3068_v43, %v3072_v0 }
0x1416   : > { %v3078_v2 = vmul.f32 1.442695, %v3076_v1 }
0x1417   : > { %v3143_v4 = vpop.permute.xlu1 %3142 }
0x1418   : > { %4811 = vpow2.f32 %v3078_v2  ;;  %v3148_v26 = vsel %vm1403_vm4, %v3143_v4, 0 }
0x1419   : > { %4594 = vmatpush3.bf16.msra.mxu1 %v3148_v26 }
0x141a   : > { %4605 = vmatprep.subr.bf16.mxu1 %v4889_v3 }
0x141e   : > { %v3075_v5 = vpop.xlane.xlu0 %3074 }
0x141f   : > { %v3077_v6 = vsub.f32 %v3069_v61, %v3075_v5 }
0x1421   : > { %v3080_v36 = vmul.f32 1.442695, %v3077_v6 }
0x1422   : > { %v4812_v7 = vpop.eup %4811 }
0x1423   : > { %4813 = vpow2.f32 %v3080_v36  ;;  %v3082_v8 = vsel %vm1274_vm3, %v4812_v7, 0.0 }
0x1424   : > { %3083 = vadd.xlane.f32.xlu0 %v3082_v8 }
0x142d   : > { %v4814_v9 = vpop.eup %4813 }
0x142e   : > { %v3085_v39 = vsel %vm1274_vm3, %v4814_v9, 0.0 }
0x142f   : > { %3086 = vadd.xlane.f32.xlu1 %v3085_v39 }
0x143a   : > { %3094 = vrot.lane.b32.xlu0 %v5458_v45, %s4897_s25  ;;  %s5886_s25 = scalar_lea.vmem %s5809_s17, %s5062_s8 }
0x143e   : > { %3242 = vrot.lane.b32.xlu0 %v5468_v49, %s4901_s28 }
0x1440   : > { %3192 = vrot.lane.b32.xlu1 %v5458_v45, %s4901_s28 }
0x1442   : > { %3240 = vrot.lane.b32.xlu0 %v5479_v53, %s4901_s28 }
0x1444   : > { %3190 = vrot.lane.b32.xlu1 %v5470_v54, %s4901_s28  ;;  %s5887_s28 = sld [smem:[#allocation24_spill]] }
0x14b1   : > { %v3084_v10 = vpop.xlane.xlu0 %3083 }
0x14b2   : > { %4815 = vrcp.f32 %v3084_v10 }
0x14b5   : > { %v3095_v11 = vpop.permute.xlu0 %3094 }
0x14b6   : > { %v3100_v12 = vsel %vm1403_vm4, %v3095_v11, 0 }
0x14b7   : > { %4588 = vmatpush3.bf16.msra.mxu0 %v3100_v12  ;;  %v4751_v12 = vld [vmem:[%s5114_s11] sm:$0xff]  }
0x14b8   : > { %4599 = vmatprep.subr.bf16.mxu0 %v4889_v3 }
0x14b9   : > { %v3243_v22 = vpop.permute.xlu0 %3242 }
0x14ba   : > { %v3248_v27 = vsel %vm1274_vm3, %v3243_v22, 0 }
0x14bc   : > { %v4816_v13 = vpop.eup %4815  ;;  %v3087_v14 = vpop.xlane.xlu1 %3086 }
0x14bd   : > { %v3090_v17 = vmul.f32 %v4816_v13, %v4812_v7  ;;  %4817 = vrcp.f32 %v3087_v14  ;;  %v3241_v28 = vpop.permute.xlu0 %3240  ;;  %v3470_v13 = vsel %vm1169_vm1, %v4751_v12, 0  ;;  %v4752_v14 = vld [vmem:[%s5114_s11 + $0x8] sm:$0xff]  }
0x14bf   : > { %v3092_v18 = vpack.c.bf16 %v3090_v17, %v3090_v17  ;;  %v3473_v17 = vsel %vm1169_vm1, %v4752_v14, 0 }
0x14c0   : > { %v3193_v19 = vpop.permute.xlu1 %3192 }
0x14c1   : > { %v3198_v20 = vsel %vm1274_vm3, %v3193_v19, 0  ;;  %4590 = vmatmul.mubr.msk.bf16.vlgmr.msra.gmra.mrb[44].mxu0 %vm1274_vm3, %v3092_v18 }
0x14c2   : > { %4600 = vmatpush3.bf16.xpose.msra.mxu0 %v3198_v20  ;;  %4601 = vmatprep.mubr.msk.bf16.mxu0 %vm4890_vm2, %v4889_v3 }
0x14c3   : > { %4611 = vmatprep.subr.bf16.mxu0 %v4889_v3 }
0x14c4   : > { %v3191_v21 = vpop.permute.xlu1 %3190 }
0x14c7   : > { %v4818_v54 = vpop.eup %4817 }
0x14c8   : > { %v3091_v53 = vmul.f32 %v4818_v54, %v4814_v9 }
0x14c9   : > { %4602 = vmatmul.mubr.msk.bf16.vlgmr.msra.gmra.mrb[48].mxu0 %vm1274_vm3, %v3191_v21 }
0x14ca   : > { %v3093_v25 = vpack.c.bf16 %v3091_v53, %v3091_v53  ;;  %4613 = vmatprep.mubr.msk.bf16.mxu0 %vm4890_vm2, %v4889_v3 }
0x14cc   : > { %4596 = vmatmul.mubr.msk.bf16.vlgmr.msra.gmra.mrb[76].mxu1 %vm1274_vm3, %v3093_v25 }
0x14cd   : > { %4606 = vmatpush3.bf16.xpose.msra.mxu1 %v3248_v27  ;;  %4607 = vmatprep.mubr.msk.bf16.mxu1 %vm4890_vm2, %v4889_v3 }
0x14ce   : > { %4617 = vmatprep.subr.bf16.mxu1 %v4889_v3 }
0x14d4   : > { %4608 = vmatmul.mubr.msk.bf16.vlgmr.msra.gmra.mrb[80].mxu1 %vm1274_vm3, %v3241_v28 }
0x14d5   : > { %4619 = vmatprep.mubr.msk.bf16.mxu1 %vm4890_vm2, %v4889_v3 }
0x1594   : > { %v3136_v31 = vpop.f32.mrb[44].mxu0 }
0x1595   : > { %v4591_v37 = vpop.f32.mrb[45].mxu0 }
0x1596   : > { %v3139_v38 = vpop.f32.mrb[46].mxu0 }
0x1597   : > { %v4592_v40 = vpop.f32.mrb[47].mxu0 }
0x159c   : > { %v3234_v42 = vpop.f32.mrb[48].mxu0 }
0x159d   : > { %v3290_v44 = vmul.f32 0.35355338, %v3234_v42  ;;  %v4603_v46 = vpop.f32.mrb[49].mxu0 }
0x159e   : > { %v3237_v47 = vpop.f32.mrb[50].mxu0 }
0x159f   : > { %v3184_v34 = vpop.f32.mrb[76].mxu1  ;;  %v4604_v48 = vpop.f32.mrb[51].mxu0  ;;  %v3292_v50 = vadd.f32 %v3290_v44, %v5490_v59 }
0x15a0   : > { %v4727_v52 = vpack.i.bf16 %v3184_v34, %v3136_v31  ;;  %v4597_v43 = vpop.f32.mrb[77].mxu1 }
0x15a1   : > { %v3187_v57 = vpop.f32.mrb[78].mxu1  ;;  %v3294_v58 = vsel %vm1274_vm3, %v3292_v50, -inf }
0x15a2   : > { %v4598_v15 = vpop.f32.mrb[79].mxu1  ;;  %3295 = vmax.xlane.f32.xlu1 %v3294_v58 }
0x15a7   : > { %v3284_v16 = vpop.f32.mrb[80].mxu1 }
0x15a8   : > { %v3291_v23 = vmul.f32 0.35355338, %v3284_v16  ;;  %v4609_v60 = vpop.f32.mrb[81].mxu1 }
0x15a9   : > { %v3287_v24 = vpop.f32.mrb[82].mxu1 }
0x15aa   : > { %v4610_v29 = vpop.f32.mrb[83].mxu1  ;;  %v3293_v32 = vadd.f32 %v3291_v23, %v5496_v63 }
0x15ac   : > { %v3297_v61 = vsel %vm1274_vm3, %v3293_v32, -inf }
0x15ad   : > { %3298 = vmax.xlane.f32.xlu0 %v3297_v61 }
0x162f   : > { %v3296_v62 = vpop.xlane.xlu1 %3295 }
0x1630   : > { %v3300_v0 = vsub.f32 %v3292_v50, %v3296_v62 }
0x1632   : > { %v3302_v59 = vmul.f32 1.442695, %v3300_v0  ;;  %v4753_v0 = vld [vmem:[%s5131_s0] sm:$0xff]  }
0x1634   : > { %4819 = vpow2.f32 %v3302_v59  ;;  %v3602_v59 = vsel %vm1169_vm1, %v4753_v0, 0 }
0x163a   : > { %v3299_v1 = vpop.xlane.xlu0 %3298 }
0x163b   : > { %v3301_v2 = vsub.f32 %v3293_v32, %v3299_v1 }
0x163d   : > { %v3304_v4 = vmul.f32 1.442695, %v3301_v2 }
0x163e   : > { %v4820_v26 = vpop.eup %4819 }
0x163f   : > { %4821 = vpow2.f32 %v3304_v4  ;;  %v3306_v5 = vsel %vm1274_vm3, %v4820_v26, 0.0 }
0x1640   : > { %3307 = vadd.xlane.f32.xlu0 %v3306_v5 }
0x1649   : > { %v4822_v6 = vpop.eup %4821 }
0x164a   : > { %v3309_v36 = vsel %vm1274_vm3, %v4822_v6, 0.0 }
0x164b   : > { %3310 = vadd.xlane.f32.xlu1 %v3309_v36 }
0x1656   : > { %3318 = vrot.lane.b32.xlu0 %v5458_v45, %s4900_s4 }
0x165a   : > { %4728 = vrot.lane.b32.xlu0 %v4727_v52, %s4904_s10  ;;  %s5888_s10 = scalar_lea.vmem %s5887_s28, %s5062_s8 }
0x165c   : > { %3366 = vrot.lane.b32.xlu1 %v5468_v49, %s4900_s4  ;;  %s5896_s4 = sld [smem:[#allocation28_spill]] (!%p4264_p5) }
0x1660   : > { %4723 = vrot.lane.b32.xlu1 %v4722_v55, %s4903_s1 }
0x16cd   : > { %v3308_v63 = vpop.xlane.xlu0 %3307 }
0x16ce   : > { %4823 = vrcp.f32 %v3308_v63 }
0x16d1   : > { %v3319_v7 = vpop.permute.xlu0 %3318 }
0x16d2   : > { %v3324_v8 = vsel %vm1403_vm4, %v3319_v7, 0  ;;  %v4754_v7 = vld [vmem:[%s5131_s0 + $0x8] sm:$0xff]  }
0x16d3   : > { %4612 = vmatpush3.bf16.msra.mxu0 %v3324_v8  ;;  %v3605_v8 = vsel %vm1169_vm1, %v4754_v7, 0 }
0x16d4   : > { %4623 = vmatprep.subr.bf16.mxu0 %v4889_v3 }
0x16d5   : > { %v4729_v38 = vpop.permute.xlu0 %4728 }
0x16d6   : > { %v4731_v44 = vunpack.i.h.bf16 %v4729_v38  ;;  %v4730_v46 = vunpack.i.l.bf16 %v4729_v38 }
0x16d8   : > { %v4824_v9 = vpop.eup %4823  ;;  %v3311_v45 = vpop.xlane.xlu1 %3310 }
0x16d9   : > { %v3314_v39 = vmul.f32 %v4824_v9, %v4820_v26  ;;  %4825 = vrcp.f32 %v3311_v45  ;;  %v4755_v9 = vld [vmem:[%s5131_s0 + $0x10] sm:$0xff]  }
0x16da   : > { %v3608_v45 = vsel %vm1169_vm1, %v4755_v9, 0 }
0x16db   : > { %v3316_v10 = vpack.c.bf16 %v3314_v39, %v3314_v39  ;;  %v4756_v39 = vld [vmem:[%s5131_s0 + $0x18] sm:$0xff]  }
0x16dc   : > { %v3367_v49 = vpop.permute.xlu1 %3366 }
0x16dd   : > { %v3372_v11 = vsel %vm1403_vm4, %v3367_v49, 0  ;;  %4614 = vmatmul.mubr.msk.bf16.vlgmr.msra.gmra.mrb[52].mxu0 %vm1274_vm3, %v3316_v10  ;;  %v3611_v10 = vsel %vm1169_vm1, %v4756_v39, 0  ;;  %v4757_v49 = vld [vmem:[%s5140_s7] sm:$0xff]  }
0x16de   : > { %4618 = vmatpush3.bf16.msra.mxu1 %v3372_v11  ;;  %4627 = vmatprep.mubr.msk.bf16.mxu0 %vm4890_vm2, %v4889_v3  ;;  %v3683_v11 = vsel %vm3678_vm7, %v4757_v49, 0 }
0x16df   : > { %4631 = vmatprep.subr.bf16.mxu1 %v4889_v3  ;;  %4624 = vmatpush3.bf16.xpose.msra.mxu0 %v3470_v13 }
0x16e0   : > { %4625 = vmatprep.subr.bf16.mxu0 %v4889_v3  ;;  %v4724_v28 = vpop.permute.xlu1 %4723 }
0x16e1   : > { %v4726_v31 = vunpack.i.h.bf16 %v4724_v28  ;;  %v4725_v37 = vunpack.i.l.bf16 %v4724_v28  ;;  %v4758_v28 = vld [vmem:[%s5140_s7 + $0x8] sm:$0xff]  }
0x16e3   : > { %v4826_v41 = vpop.eup %4825  ;;  %v3439_v40 = vsel %vm1274_vm3, %v5536_v56, %v4726_v31  ;;  %v3438_v42 = vsel %vm1274_vm3, %v5534_v30, %v4725_v37  ;;  %v4246_v30 = vld [vmem:[%s5885_s9] ss:$0 sm:$0xff]  ;;  %v3686_v31 = vsel %vm3678_vm7, %v4758_v28, 0  ;;  %s5893_s9 = sld [smem:[#allocation27_spill]]  ;;  %v4842_v28 = vld [vmem:[%s5896_s4 + $0x38] sm:$0xff] (!%p4264_p5)  }
0x16e4   : > { %v3315_v51 = vmul.f32 %v4826_v41, %v4822_v6  ;;  %v3440_v50 = vsel %vm2193_vm5, %v3438_v42, %v4730_v46  ;;  %v3441_v52 = vsel %vm2193_vm5, %v3439_v40, %v4731_v44  ;;  %v4252_v37 = vld [vmem:[%s5889_s3] ss:$0 sm:$0xff] }
0x16e6   : > { %v3317_v55 = vpack.c.bf16 %v3315_v51, %v3315_v51 }
0x16e7   : > { %4626 = vmatpush3.bf16.xpose.msra.mxu0 %v3473_v17 }
0x16e8   : > { %4620 = vmatmul.mubr.msk.bf16.vlgmr.msra.gmra.mrb[84].mxu1 %vm1274_vm3, %v3317_v55  ;;  %4643 = vmatprep.subr.bf16.mxu0 %v4889_v3 }
0x16e9   : > { %4639 = vmatprep.mubr.msk.bf16.mxu1 %vm4890_vm2, %v4889_v3  ;;  %4632 = vmatpush3.bf16.xpose.msra.mxu1 %v3602_v59  ;;  %s5894_s0 = scalar_lea.vmem %s5893_s9, %s5062_s8 }
0x16ea   : > { %4633 = vmatprep.subr.bf16.mxu1 %v4889_v3  ;;  %v4263_v39 = vld [vmem:[%s5894_s0] ss:$0 sm:$0xff]  ;;  %s5897_s0 = sld [smem:[#allocation29_spill]] (!%p4264_p5) }
0x16f1   : > { %4634 = vmatpush3.bf16.xpose.msra.mxu1 %v3605_v8  ;;  %v4262_v8 = vld [vmem:[%s5892_s30] ss:$0 sm:$0xff] }
0x16f2   : > { %4635 = vmatprep.subr.bf16.mxu1 %v4889_v3 }
0x16f9   : > { %4636 = vmatpush3.bf16.xpose.msra.mxu1 %v3608_v45 }
0x16fa   : > { %4637 = vmatprep.subr.bf16.mxu1 %v4889_v3 }
0x1701   : > { %4638 = vmatpush3.bf16.xpose.msra.mxu1 %v3611_v10 }
0x17b0   : > { %v3360_v18 = vpop.f32.mrb[52].mxu0 }
0x17b1   : > { %v4615_v19 = vpop.f32.mrb[53].mxu0 }
0x17b2   : > { %v3363_v20 = vpop.f32.mrb[54].mxu0  ;;  %v4250_v19 = vld [vmem:[%s5886_s25] ss:$0 sm:$0xff] }
0x17b3   : > { %v4616_v54 = vpop.f32.mrb[55].mxu0 }
0x17bb   : > { %v3408_v53 = vpop.f32.mrb[84].mxu1 }
0x17bc   : > { %v4732_v21 = vpack.i.bf16 %v3408_v53, %v3360_v18  ;;  %v4621_v22 = vpop.f32.mrb[85].mxu1  ;;  %v4251_v53 = vld [vmem:[%s5888_s10] ss:$0 sm:$0xff] }
0x17bd   : > { %v3411_v25 = vpop.f32.mrb[86].mxu1 }
0x17be   : > { %v4622_v27 = vpop.f32.mrb[87].mxu1  ;;  %4733 = vrot.lane.b32.xlu1 %v4732_v21, %s4905_s26 }
0x1830   : > { %v4734_v47 = vpop.permute.xlu1 %4733 }
0x1831   : > { %v4736_v34 = vunpack.i.h.bf16 %v4734_v47  ;;  %v4735_v48 = vunpack.i.l.bf16 %v4734_v47 }
0x1833   : > { %v3443_v43 = vsel %vm2196_vm6, %v3441_v52, %v4736_v34  ;;  %v3442_v57 = vsel %vm2196_vm6, %v3440_v50, %v4735_v48  ;;  %v4258_v52 = vld [vmem:[%s5890_s6] ss:$0 sm:$0xff] }
0x1834   : > { %v3449_v58 = vpack.c.bf16 %v3443_v43, %v3442_v57 }
0x1836   : > { %4628 = vmatmul.mubr.msk.bf16.vlgmr.msra.gmra.mrb[56].mxu0 %vm1169_vm1, %v3449_v58 }
0x1837   : > { %4647 = vmatprep.mubr.msk.bf16.mxu0 %vm4890_vm2, %v4889_v3  ;;  %4644 = vmatpush3.bf16.xpose.msra.mxu0 %v3683_v11 }
0x1838   : > { %4645 = vmatprep.subr.bf16.mxu0 %v4889_v3 }
0x183f   : > { %4646 = vmatpush3.bf16.xpose.msra.mxu0 %v3686_v31  ;;  %v3870_v31 = vsel (!%p4264_p5), %vm1169_vm1, %v4842_v28, 0 }
0x1909   : > { %v3509_v56 = vpop.f32.mrb[56].mxu0 }
0x190a   : > { %v3510_v15 = vadd.f32 %v4246_v30, %v3509_v56  ;;  %v4629_v16 = vpop.f32.mrb[57].mxu0 }
0x190b   : > { %v3512_v23 = vpop.f32.mrb[58].mxu0 }
0x190c   : > { %v3513_v60 = vadd.f32 %v4246_v30, %v3512_v23  ;;  %v4630_v24 = vpop.f32.mrb[59].mxu0  ;;  %v3516_v29 = vadd.f32 %v3510_v15, %v5444_v33 }
0x190e   : > { %v3520_v32 = vsel %vm1169_vm1, %v3516_v29, 0.0  ;;  %v3517_v61 = vadd.f32 %v3513_v60, %v5446_v35 }
0x190f   : > { %3521 = vadd.xlane.f32.xlu0 %v3520_v32 }
0x1910   : > { %v3523_v62 = vsel %vm1169_vm1, %v3517_v61, 0.0 }
0x1911   : > { %3524 = vadd.xlane.f32.xlu1 %v3523_v62 }
0x199c   : > { %v3522_v1 = vpop.xlane.xlu0 %3521 }
0x199d   : > { %v3526_v2 = vmul.f32 0.03125, %v3522_v1 }
0x199e   : > { %v3525_v4 = vpop.xlane.xlu1 %3524 }
0x199f   : > { %v3528_v33 = vsub.f32 %v3516_v29, %v3526_v2  ;;  %v3527_v26 = vmul.f32 0.03125, %v3525_v4 }
0x19a1   : > { %v3529_v5 = vsub.f32 %v3517_v61, %v3527_v26  ;;  %v3530_v35 = vmul.f32 %v3528_v33, %v3528_v33 }
0x19a3   : > { %v3532_v6 = vsel %vm1169_vm1, %v3530_v35, 0.0  ;;  %v3531_v36 = vmul.f32 %v3529_v5, %v3529_v5 }
0x19a4   : > { %3533 = vadd.xlane.f32.xlu0 %v3532_v6 }
0x19a5   : > { %v3535_v63 = vsel %vm1169_vm1, %v3531_v36, 0.0 }
0x19a8   : > { %3536 = vadd.xlane.f32.xlu0 %v3535_v63 }
0x1a31   : > { %v3534_v41 = vpop.xlane.xlu0 %3533 }
0x1a32   : > { %v3538_v51 = vmul.f32 0.03125, %v3534_v41 }
0x1a34   : > { %v3540_v55 = vadd.f32 1e-05, %v3538_v51 }
0x1a35   : > { %v3537_v12 = vpop.xlane.xlu0 %3536 }
0x1a36   : > { %4827 = vrsqrt.f32 %v3540_v55  ;;  %v3539_v13 = vmul.f32 0.03125, %v3537_v12  ;;  %v4835_v55 = vld [vmem:[%s5896_s4] sm:$0xff] (!%p4264_p5)   ;;  %v4906_v12 = vmov (!%p4264_p5), 0.0  }
0x1a37   : > { %4651 = vmatprep.subr.bf16.mxu0 (!%p4264_p5), %v4906_v12 }
0x1a38   : > { %v3541_v14 = vadd.f32 1e-05, %v3539_v13  ;;  %v3849_v13 = vsel (!%p4264_p5), %vm1169_vm1, %v4835_v55, 0 }
0x1a3a   : > { %4829 = vrsqrt.f32 %v3541_v14  ;;  %v4836_v14 = vld [vmem:[%s5896_s4 + $0x8] sm:$0xff] (!%p4264_p5)  }
0x1a40   : > { %v4828_v17 = vpop.eup %4827 }
0x1a41   : > { %v3544_v18 = vmul.f32 %v4828_v17, %v3528_v33  ;;  %v3852_v17 = vsel (!%p4264_p5), %vm1169_vm1, %v4836_v14, 0 }
0x1a43   : > { %v3552_v54 = vmul.f32 %v4250_v19, %v3544_v18  ;;  %v4837_v18 = vld [vmem:[%s5896_s4 + $0x10] sm:$0xff] (!%p4264_p5)  }
0x1a44   : > { %v4830_v20 = vpop.eup %4829 }
0x1a45   : > { %v3545_v3 = vmul.f32 %v4830_v20, %v3529_v5  ;;  %v3560_v22 = vadd.f32 %v4251_v53, %v3552_v54  ;;  %v4838_v20 = vld [vmem:[%s5896_s4 + $0x18] sm:$0xff] (!%p4264_p5)  }
0x1a46   : > { %v3858_v54 = vsel (!%p4264_p5), %vm1169_vm1, %v4838_v20, 0 }
0x1a47   : > { %v3553_v21 = vmul.f32 %v4250_v19, %v3545_v3  ;;  %v3855_v19 = vsel (!%p4264_p5), %vm1169_vm1, %v4837_v18, 0  ;;  %v4839_v3 = vld [vmem:[%s5896_s4 + $0x20] sm:$0xff] (!%p4264_p5)  }
0x1a49   : > { %v3561_v25 = vadd.f32 %v4251_v53, %v3553_v21  ;;  %v3861_v53 = vsel (!%p4264_p5), %vm1169_vm1, %v4839_v3, 0  ;;  %v4840_v21 = vld [vmem:[%s5896_s4 + $0x28] sm:$0xff] (!%p4264_p5)  }
0x1a4b   : > { %v3571_v27 = vpack.c.bf16 %v3561_v25, %v3560_v22 }
0x1a4d   : > { %4640 = vmatmul.mubr.msk.bf16.vlgmr.msra.gmra.mrb[88].mxu1 %vm1169_vm1, %v3571_v27 }
0x1b20   : > { %v3647_v38 = vpop.f32.mrb[88].mxu1 }
0x1b21   : > { %v3648_v40 = vadd.f32 %v4252_v37, %v3647_v38  ;;  %v4641_v42 = vpop.f32.mrb[89].mxu1  ;;  %v4265_v38 = vld [vmem:[%s5897_s0] ss:$0 sm:$0xff] (!%p4264_p5) }
0x1b22   : > { %v3650_v44 = vpop.f32.mrb[90].mxu1 }
0x1b23   : > { %v3651_v46 = vadd.f32 %v4252_v37, %v3650_v44  ;;  %v4642_v47 = vpop.f32.mrb[91].mxu1  ;;  %v3654_v34 = vmax.f32 %v3648_v40, 0.0 }
0x1b25   : > { %v3655_v48 = vmax.f32 %v3651_v46, 0.0 }
0x1b27   : > { %v3661_v50 = vpack.c.bf16 %v3655_v48, %v3654_v34 }
0x1b29   : > { %4648 = vmatmul.mubr.msk.bf16.vlgmr.msra.gmra.mrb[60].mxu0 %vm3678_vm7, %v3661_v50 }
0x1b2a   : > { %4667 = vmatprep.mubr.msk.bf16.mxu0 (!%p4264_p5), %vm4907_vm8, %v4906_v12  ;;  %4652 = vmatpush3.bf16.xpose.msra.mxu0 (!%p4264_p5), %v3849_v13 }
0x1b2b   : > { %4653 = vmatprep.subr.bf16.mxu0 (!%p4264_p5), %v4906_v12 }
0x1b32   : > { %4654 = vmatpush3.bf16.xpose.msra.mxu0 (!%p4264_p5), %v3852_v17 }
0x1b33   : > { %4655 = vmatprep.subr.bf16.mxu0 (!%p4264_p5), %v4906_v12 }
0x1b3a   : > { %4656 = vmatpush3.bf16.xpose.msra.mxu0 (!%p4264_p5), %v3855_v19 }
0x1b3b   : > { %4657 = vmatprep.subr.bf16.mxu0 (!%p4264_p5), %v4906_v12 }
0x1b42   : > { %4658 = vmatpush3.bf16.xpose.msra.mxu0 (!%p4264_p5), %v3858_v54 }
0x1b43   : > { %4659 = vmatprep.subr.bf16.mxu0 (!%p4264_p5), %v4906_v12 }
0x1b4a   : > { %4660 = vmatpush3.bf16.xpose.msra.mxu0 (!%p4264_p5), %v3861_v53 }
0x1b4b   : > { %4661 = vmatprep.subr.bf16.mxu0 (!%p4264_p5), %v4906_v12 }
0x1bfc   : > { %v3722_v43 = vpop.f32.mrb[60].mxu0 }
0x1bfd   : > { %v3723_v57 = vadd.f32 %v4258_v52, %v3722_v43  ;;  %v4649_v58 = vpop.f32.mrb[61].mxu0 }
0x1bfe   : > { %v3725_v30 = vpop.f32.mrb[62].mxu0 }
0x1bff   : > { %v3726_v56 = vadd.f32 %v4258_v52, %v3725_v30  ;;  %v4650_v15 = vpop.f32.mrb[63].mxu0  ;;  %v3729_v16 = vadd.f32 %v3723_v57, %v3560_v22  ;;  %v3864_v22 = vsel (!%p4264_p5), %vm1169_vm1, %v4840_v21, 0 }
0x1c00   : > { %4662 = vmatpush3.bf16.xpose.msra.mxu0 (!%p4264_p5), %v3864_v22 }
0x1c01   : > { %v3733_v23 = vsel %vm1169_vm1, %v3729_v16, 0.0  ;;  %v3730_v60 = vadd.f32 %v3726_v56, %v3561_v25  ;;  %4663 = vmatprep.subr.bf16.mxu0 (!%p4264_p5), %v4906_v12  ;;  %v4841_v25 = vld [vmem:[%s5896_s4 + $0x30] sm:$0xff] (!%p4264_p5)  }
0x1c02   : > { %3734 = vadd.xlane.f32.xlu1 %v3733_v23  ;;  %v3867_v27 = vsel (!%p4264_p5), %vm1169_vm1, %v4841_v25, 0 }
0x1c03   : > { %v3736_v24 = vsel %vm1169_vm1, %v3730_v60, 0.0 }
0x1c04   : > { %3737 = vadd.xlane.f32.xlu0 %v3736_v24 }
0x1c08   : > { %4664 = vmatpush3.bf16.xpose.msra.mxu0 (!%p4264_p5), %v3867_v27 }
0x1c09   : > { %4665 = vmatprep.subr.bf16.mxu0 (!%p4264_p5), %v4906_v12 }
0x1c10   : > { %4666 = vmatpush3.bf16.xpose.msra.mxu0 (!%p4264_p5), %v3870_v31 }
0x1c8f   : > { %v3735_v29 = vpop.xlane.xlu1 %3734 }
0x1c90   : > { %v3739_v32 = vmul.f32 0.03125, %v3735_v29 }
0x1c91   : > { %v3738_v61 = vpop.xlane.xlu0 %3737 }
0x1c92   : > { %v3741_v62 = vsub.f32 %v3729_v16, %v3739_v32  ;;  %v3740_v0 = vmul.f32 0.03125, %v3738_v61 }
0x1c94   : > { %v3742_v59 = vsub.f32 %v3730_v60, %v3740_v0  ;;  %v3743_v1 = vmul.f32 %v3741_v62, %v3741_v62 }
0x1c96   : > { %v3745_v2 = vsel %vm1169_vm1, %v3743_v1, 0.0  ;;  %v3744_v4 = vmul.f32 %v3742_v59, %v3742_v59 }
0x1c97   : > { %3746 = vadd.xlane.f32.xlu1 %v3745_v2 }
0x1c98   : > { %v3748_v33 = vsel %vm1169_vm1, %v3744_v4, 0.0 }
0x1c99   : > { %3749 = vadd.xlane.f32.xlu0 %v3748_v33 }
0x1d24   : > { %v3747_v26 = vpop.xlane.xlu1 %3746 }
0x1d25   : > { %v3751_v5 = vmul.f32 0.03125, %v3747_v26 }
0x1d26   : > { %v3750_v35 = vpop.xlane.xlu0 %3749 }
0x1d27   : > { %v3753_v6 = vadd.f32 1e-05, %v3751_v5  ;;  %v3752_v36 = vmul.f32 0.03125, %v3750_v35 }
0x1d29   : > { %4831 = vrsqrt.f32 %v3753_v6  ;;  %v3754_v63 = vadd.f32 1e-05, %v3752_v36 }
0x1d2b   : > { %4833 = vrsqrt.f32 %v3754_v63 }
0x1d33   : > { %v4832_v7 = vpop.eup %4831 }
0x1d34   : > { %v3757_v9 = vmul.f32 %v4832_v7, %v3741_v62 }
0x1d35   : > { %v4834_v45 = vpop.eup %4833 }
0x1d36   : > { %v3765_v10 = vmul.f32 %v4262_v8, %v3757_v9  ;;  %v3758_v49 = vmul.f32 %v4834_v45, %v3742_v59  ;;  %3780 = sbr.rel (%p4264_p5) target bundleno = 8017 (0x1f51), region = 136 }
0x1d38   : > { %v3773_v11 = vadd.f32 %v4263_v39, %v3765_v10  ;;  %v3766_v41 = vmul.f32 %v4262_v8, %v3758_v49 }
0x1d3a   : > { %3775 = vst.msk [vmem:[#allocation2] sm:$0xff] %vm1169_vm1, %v3773_v11  ;;  %v3774_v51 = vadd.f32 %v4263_v39, %v3766_v41 }
0x1d3c   : > { %3776 = vst.msk [vmem:[#allocation2 + $0x8] sm:$0xff] %vm1169_vm1, %v3774_v51  ;;  %v3798_v37 = vpack.c.bf16 (!%p4264_p5), %v3774_v51, %v3773_v11 }
0x1d3e   : > { %4668 = vmatmul.mubr.msk.bf16.vlgmr.msra.gmra.mrb[0].mxu0 %vm1169_vm1, %v3798_v37 }
0x1e11   : > { %v3906_v40 = vpop.f32.mrb[0].mxu0 }
0x1e12   : > { %v3907_v42 = vadd.f32 %v4265_v38, %v3906_v40  ;;  %v4669_v44 = vpop.f32.mrb[1].mxu0 }
0x1e13   : > { %v3909_v46 = vpop.f32.mrb[2].mxu0 }
0x1e14   : > { %3913 = vmax.xlane.f32.xlu0 %v3907_v42  ;;  %v4670_v47 = vpop.f32.mrb[3].mxu0  ;;  %v3910_v34 = vadd.f32 %v4265_v38, %v3909_v46 }
0x1e18   : > { %3915 = vmax.xlane.f32.xlu0 %v3910_v34 }
0x1ea1   : > { %v3914_v48 = vpop.xlane.xlu0 %3913 }
0x1ea2   : > { %v3917_v50 = vsub.f32 %v3907_v42, %v3914_v48 }
0x1ea4   : > { %v3919_v52 = vmul.f32 1.442695, %v3917_v50 }
0x1ea5   : > { %v3916_v43 = vpop.xlane.xlu0 %3915 }
0x1ea6   : > { %4843 = vpow2.f32 %v3919_v52  ;;  %v3918_v57 = vsub.f32 %v3910_v34, %v3916_v43 }
0x1ea8   : > { %v3921_v58 = vmul.f32 1.442695, %v3918_v57 }
0x1eaa   : > { %4845 = vpow2.f32 %v3921_v58 }
0x1eb0   : > { %v4844_v30 = vpop.eup %4843 }
0x1eb1   : > { %3923 = vadd.xlane.f32.xlu1 %v4844_v30 }
0x1eb4   : > { %v4846_v56 = vpop.eup %4845 }
0x1eb5   : > { %3925 = vadd.xlane.f32.xlu1 %v4846_v56 }
0x1f3e   : > { %v3924_v15 = vpop.xlane.xlu1 %3923 }
0x1f3f   : > { %4847 = vrcp.f32 %v3924_v15 }
0x1f42   : > { %v3926_v16 = vpop.xlane.xlu1 %3925 }
0x1f43   : > { %4849 = vrcp.f32 %v3926_v16 }
0x1f49   : > { %v4848_v23 = vpop.eup %4847 }
0x1f4a   : > { %v3928_v60 = vmul.f32 %v4848_v23, %v4844_v30 }
0x1f4c   : > { %3931 = vst [vmem:[#allocation3] sm:$0xff] %v3928_v60 }
0x1f4d   : > { %v4850_v24 = vpop.eup %4849 }
0x1f4e   : > { %v3930_v29 = vmul.f32 %v4850_v24, %v4846_v56 }
0x1f50   : > { %3932 = vst [vmem:[#allocation3 + $0x8] sm:$0xff] %v3930_v29 }
0x1f51 PF: > { %s5898_s18 = sld [smem:[#allocation7_spill]]  ;;  %s4908_s25 = smov [#allocation3]  }
0x1f52   : > { %s3939_s24 = sshll.u32 %s4908_s25, 4  ;;  %s3940_s24 = int_to_ptr.vmem [resolvable:$true] %s3939_s24 }
0x1f53   : > { %s4851_s8 = scalar_lea.vmem %s3940_s24, 256  ;;  %p4858_p10 = scmp.lt.s32.totalorder %s3940_s24, %s3940_s24 }
0x1f54   : > { %p4852_p7 = scmp.ne.s32.totalorder %s3940_s24, %s4851_s8  ;;  %p4859_p11 = scmp.lt.s32.totalorder %s4851_s8, %s4851_s8 }
0x1f56   : > { %p4860_p12 = por %p4859_p11, %p4858_p10 }
0x1f57   : > { %p4676_p6 = scmp.eq.s32.totalorder %s5898_s18, 1 }
0x1f59   : > { %p4853_p8 = pnand %p4852_p7, %p4676_p6 }
0x1f5b   : > { %p4854_p9 = pneg %p4853_p8 }
0x1f5d   : > { %p4861_p13 = pnand %p4860_p12, %p4854_p9 }
0x1f5f   : > { %4864 = shalt.err (!%p4861_p13)
}
0x1f60   : > { %s5899_s26 = sld [smem:[#allocation30_spill]] }
0x1f66   : > { %s4865_s23 = scalar_lea.hbm %s5899_s26, 256 }
0x1f67   : > { %p4866_p0 = scmp.ne.s32.totalorder %s5899_s26, %s4865_s23  ;;  %p4871_p3 = scmp.lt.u32.totalorder %s4865_s23, %s5899_s26 }
0x1f69   : > { %p4867_p1 = pnand %p4866_p0, %p4676_p6 }
0x1f6b   : > { %p4868_p2 = pneg %p4867_p1 }
0x1f6d   : > { %p4873_p4 = pnand %p4871_p3, %p4868_p2 }
0x1f6f   : > { %4876 = shalt.err (!%p4873_p4)
}
0x1f70   : > { %s4909_s19 = smov 128  }
0x1f71   : > { %4673 = dma.vmem_to_hbm [thread:$0]  (%p4676_p6), %s3940_s24, 256, %s5899_s26, [#allocation4], %s4909_s19, %s4909_s19, %s4903_s1  }
0x1f72   : > { %4882 = dma.done.wait (%p4676_p6), [#allocation4], 256  }
0x1f73   : > { %4884 = vsyncadd (%p4676_p6), [#allocation4], 4294967040 }
0x1f74 PF: > { %s5900_s30 = sld [smem:[#allocation6_spill]] }
0x1f7a   : > { %s38_s7 = sadd.s32 1, %s5900_s30  }
0x1f7b   : > { %p35_p5 = scmp.ge.s32.totalorder %s38_s7, 4  }
0x1f7d   :  { %37 = sbr.rel (!%p35_p5) target bundleno = 23 (0x17), region = 220 }
0x1f84   :  { %3955 = vsyncpa [#allocation4], 1 }
0x1f85   :  { %3957 = vsyncpa [#allocation4 + $0x1], 1 }

</bundles_post_ra>
